<compile_context>
chip_gen: v7x
topology: tpu7x:2x2x1
jax: 0.10.0
libtpu: 0.0.40
codegen_flags: <defaults>
</compile_context>

<pallas_src>
import functools

import jax
import jax.numpy as jnp
from jax.experimental import pallas as pl
from jax.experimental.pallas import tpu as pltpu


def _round_up(x, m):
    return (x + m - 1) // m * m


def _choose_tile(dim, pref, full_cap):
    """Return (tile, padded_dim).

    Prefer a `pref`-wide tile when `dim` is already a multiple (no padding copy,
    and >=2 blocks so v7x's two TensorCores both get work); otherwise use a
    full-extent block for small/ragged dims (legal regardless of (8,128)); only
    pad when the dim is both large and ragged.
    """
    if dim % pref == 0:
        return min(pref, dim), dim
    if dim <= full_cap:
        return dim, dim
    return pref, _round_up(dim, pref)


# ----------------------------------------------------------------------------
# Fused Pallas kernel:  out = act( (A @ W) * scale + bias )
#   A, W in bf16; accumulation + epilogue in f32; per-output-channel scale/bias
#   (folded eval-mode BatchNorm); act in {"leaky", "tanh", "none"}.
# ----------------------------------------------------------------------------
def _matmul_fused_kernel(a_ref, w_ref, scale_ref, bias_ref, o_ref, acc_ref, *, act):
    k = pl.program_id(2)

    @pl.when(k == 0)
    def _():
        acc_ref[...] = jnp.zeros_like(acc_ref)

    acc_ref[...] += jnp.dot(a_ref[...], w_ref[...], preferred_element_type=jnp.float32)

    @pl.when(k == pl.num_programs(2) - 1)
    def _():
        y = acc_ref[...] * scale_ref[...] + bias_ref[...]   # single f32 FMA epilogue
        if act == "leaky":
            y = jnp.where(y >= 0.0, y, 0.2 * y)
        elif act == "tanh":
            y = jnp.tanh(y)                                  # EUP slot (free-ish)
        o_ref[...] = y.astype(o_ref.dtype)


def matmul_fused(a, w, scale, bias, act, out_dtype=jnp.bfloat16):
    """(M,K) @ (K,N) with fused per-channel scale/bias + activation."""
    M, K = a.shape
    K2, N = w.shape
    assert K == K2

    tm, Mp = _choose_tile(M, 256, 1024)
    tk, Kp = _choose_tile(K, 512, 2048)
    tn, Np = _choose_tile(N, 256, 1024)

    a = a.astype(jnp.bfloat16)
    w = w.astype(jnp.bfloat16)
    scale = scale.astype(jnp.float32).reshape(1, N)
    bias = bias.astype(jnp.float32).reshape(1, N)

    # Padding only triggers for large ragged dims (never at the demo shapes).
    if (Mp, Kp) != (M, K):
        a = jnp.pad(a, ((0, Mp - M), (0, Kp - K)))
    if (Kp, Np) != (K, N):
        w = jnp.pad(w, ((0, Kp - K), (0, Np - N)))
        scale = jnp.pad(scale, ((0, 0), (0, Np - N)))
        bias = jnp.pad(bias, ((0, 0), (0, Np - N)))

    cost = pl.CostEstimate(
        flops=2 * Mp * Kp * Np,
        transcendentals=(Mp * Np if act == "tanh" else 0),
        bytes_accessed=(2 * Mp * Kp + 2 * Kp * Np + 8 * Np
                        + Mp * Np * jnp.dtype(out_dtype).itemsize),
    )

    out = pl.pallas_call(
        functools.partial(_matmul_fused_kernel, act=act),
        out_shape=jax.ShapeDtypeStruct((Mp, Np), out_dtype),
        grid_spec=pltpu.PrefetchScalarGridSpec(
            num_scalar_prefetch=0,
            grid=(Mp // tm, Np // tn, Kp // tk),
            in_specs=[
                pl.BlockSpec((tm, tk), lambda i, j, k: (i, k)),
                pl.BlockSpec((tk, tn), lambda i, j, k: (k, j)),
                pl.BlockSpec((1, tn), lambda i, j, k: (0, j)),
                pl.BlockSpec((1, tn), lambda i, j, k: (0, j)),
            ],
            out_specs=pl.BlockSpec((tm, tn), lambda i, j, k: (i, j)),
            scratch_shapes=[pltpu.VMEM((tm, tn), jnp.float32)],
        ),
        compiler_params=pltpu.CompilerParams(
            dimension_semantics=("parallel", "parallel", "arbitrary")),
        cost_estimate=cost,
    )(a, w, scale, bias)

    if (Mp, Np) != (M, N):
        out = out[:M, :N]
    return out


# ----------------------------------------------------------------------------
# im2col patch extraction (JAX glue; the matmul runs in Pallas)
# ----------------------------------------------------------------------------
def _patches(x_nhwc, k, stride, pad):
    """Return (N, Ho, Wo, k*k*C) patch tensor, last axis ordered (kh, kw, C)."""
    N, H, W, C = x_nhwc.shape
    xp = jnp.pad(x_nhwc, ((0, 0), (pad, pad), (pad, pad), (0, 0)))
    Ho = (H + 2 * pad - k) // stride + 1
    Wo = (W + 2 * pad - k) // stride + 1
    cols = []
    for di in range(k):
        for dj in range(k):
            cols.append(
                xp[:, di:di + stride * (Ho - 1) + 1:stride,
                      dj:dj + stride * (Wo - 1) + 1:stride, :])
    return jnp.concatenate(cols, axis=-1), Ho, Wo


def conv2d_fused(x_nhwc, w_oihw, scale, bias, act, stride=2, pad=1,
                 out_dtype=jnp.bfloat16):
    """nn.Conv2d(k, stride, pad, bias=False) + folded BN + activation (NHWC)."""
    N = x_nhwc.shape[0]
    cout, cin, k, _ = w_oihw.shape
    patches, Ho, Wo = _patches(x_nhwc, k, stride, pad)
    # (Cout,Cin,kh,kw) -> (kh,kw,Cin,Cout) -> (k*k*Cin, Cout): matches patch order.
    w_mat = jnp.transpose(w_oihw, (2, 3, 1, 0)).reshape(k * k * cin, cout)
    y = matmul_fused(patches.reshape(-1, k * k * cin), w_mat, scale, bias, act,
                     out_dtype=out_dtype)
    return y.reshape(N, Ho, Wo, cout)


def conv_transpose2d_fused(x_nhwc, w_iohw, scale, bias, act,
                           out_dtype=jnp.bfloat16):
    """nn.ConvTranspose2d(k=4, s=2, p=1, bias=False) + folded BN + activation.

    Sub-pixel decomposition (no zero-dilated input):
      y[:, 2m+rh, 2n+rw, co] = sum_{d,e,ci} xpad[:, m+rh+d, n+rw+e, ci]
                                            * w[ci, co, 3-rh-2d, 3-rw-2e]
    All 4 parities share one 2x2 patch matrix of the 1-padded input and are
    computed by a single fused matmul with 4*Cout output columns, then
    interleaved into the 2x-upsampled output.
    """
    N, H, W, cin = x_nhwc.shape
    cin2, cout, k, _ = w_iohw.shape
    assert cin == cin2 and k == 4

    # 2x2 patches of the 1-padded input at all (H+1)x(W+1) positions.
    patches, _, _ = _patches(x_nhwc, 2, 1, 1)            # (N, H+1, W+1, 4*cin)

    # (Cin,Cout,4,4) -> reverse kh,kw -> split each 4 into (tap d, parity r)
    # -> (d, e, ci, rh, rw, co) -> (4*Cin, 4*Cout).
    w_rev = w_iohw[:, :, ::-1, ::-1].reshape(cin, cout, 2, 2, 2, 2)
    w_mat = jnp.transpose(w_rev, (2, 4, 0, 3, 5, 1)).reshape(4 * cin, 4 * cout)

    scale4 = jnp.tile(scale, 4)                          # column order (rh, rw, co)
    bias4 = jnp.tile(bias, 4)

    z = matmul_fused(patches.reshape(-1, 4 * cin), w_mat, scale4, bias4, act,
                     out_dtype=out_dtype)
    z = z.reshape(N, H + 1, W + 1, 2, 2, cout)

    # Interleave parities: y[:, 2m+rh, 2n+rw, :] = z[:, m+rh, n+rw, rh, rw, :].
    rows = []
    for rh in (0, 1):
        cols = [z[:, rh:rh + H, rw:rw + W, rh, rw, :] for rw in (0, 1)]
        rows.append(jnp.stack(cols, axis=3))             # (N, H, W, 2, cout)
    y = jnp.stack(rows, axis=2)                          # (N, H, 2, W, 2, cout)
    return y.reshape(N, 2 * H, 2 * W, cout)


# ----------------------------------------------------------------------------
# NetG parameters (deterministic synthetic init) and forward
# ----------------------------------------------------------------------------
def _bn_fold(gamma, beta, mean, var, eps=1e-5):
    scale = gamma / jnp.sqrt(var + eps)
    return scale, beta - mean * scale


def init_netg_params(key, nc=3, ngf=8):
    c = [nc, ngf, ngf * 2, ngf * 4, ngf * 8]
    layers = []
    keys = iter(jax.random.split(key, 64))

    def bn(nch):
        gamma = 1.0 + 0.1 * jax.random.normal(next(keys), (nch,), jnp.float32)
        beta = 0.1 * jax.random.normal(next(keys), (nch,), jnp.float32)
        mean = 0.1 * jax.random.normal(next(keys), (nch,), jnp.float32)
        var = jax.random.uniform(next(keys), (nch,), jnp.float32, 0.5, 1.5)
        return _bn_fold(gamma, beta, mean, var)

    # 4 downsampling convs
    for i in range(4):
        w = 0.05 * jax.random.normal(next(keys), (c[i + 1], c[i], 4, 4), jnp.float32)
        if i == 0:
            scale, bias = jnp.ones((c[i + 1],)), jnp.zeros((c[i + 1],))  # no BN first
        else:
            scale, bias = bn(c[i + 1])
        layers.append(dict(type="conv", w=w, scale=scale, bias=bias, act="leaky"))

    # 4 upsampling transposed convs
    for i in range(4):
        cin, cout = c[4 - i], c[3 - i]
        w = 0.05 * jax.random.normal(next(keys), (cin, cout, 4, 4), jnp.float32)
        if i < 3:
            scale, bias = bn(cout)
            act = "leaky"
        else:
            scale, bias = jnp.ones((cout,)), jnp.zeros((cout,))  # last: no BN
            act = "tanh"
        layers.append(dict(type="deconv", w=w, scale=scale, bias=bias, act=act))

    return layers


def netg_forward(x_nchw, layers):
    # Interface NCHW (PyTorch); internal NHWC bf16; final output f32 NCHW.
    x = jnp.transpose(x_nchw, (0, 2, 3, 1)).astype(jnp.bfloat16)
    n_layers = len(layers)
    for i, lyr in enumerate(layers):
        out_dtype = jnp.float32 if i == n_layers - 1 else jnp.bfloat16
        if lyr["type"] == "conv":
            x = conv2d_fused(x, lyr["w"], lyr["scale"], lyr["bias"], lyr["act"],
                             stride=2, pad=1, out_dtype=out_dtype)
        else:
            x = conv_transpose2d_fused(x, lyr["w"], lyr["scale"], lyr["bias"],
                                       lyr["act"], out_dtype=out_dtype)
    return jnp.transpose(x, (0, 3, 1, 2))


if __name__ == "__main__":
    key = jax.random.PRNGKey(0)
    k_param, k_input = jax.random.split(key)

    nc, ngf = 3, 8            # small synthetic config (module default ngf=96)
    batch, H, W = 2, 32, 32   # H, W must be divisible by 16 (4 stride-2 stages)

    layers = init_netg_params(k_param, nc=nc, ngf=ngf)
    x = jax.random.normal(k_input, (batch, nc, H, W), jnp.float32)

    fwd = jax.jit(lambda x: netg_forward(x, layers))
    y = fwd(x)
    jax.block_until_ready(y)

    assert y.shape == (batch, nc, H, W), y.shape
    assert bool(jnp.all(jnp.isfinite(y)))
    assert bool(jnp.all(jnp.abs(y) <= 1.0 + 1e-6))  # tanh output range
    print("KERNEL_OK")
</pallas_src>

<mosaic_0001>
module attributes {stable_mosaic.version = 11 : i64} {
  func.func @_matmul_fused_kernel(%arg0: i32, %arg1: i32, %arg2: i32, %arg3: memref<256x48xbf16, #tpu.memory_space<vmem>>, %arg4: memref<48x8xbf16, #tpu.memory_space<vmem>>, %arg5: memref<1x8xf32, #tpu.memory_space<vmem>>, %arg6: memref<1x8xf32, #tpu.memory_space<vmem>>, %arg7: memref<256x8xbf16, #tpu.memory_space<vmem>>, %arg8: memref<256x8xf32, #tpu.memory_space<vmem>>) attributes {dimension_semantics = [#tpu.dimension_semantics<parallel>, #tpu.dimension_semantics<parallel>, #tpu.dimension_semantics<arbitrary>], iteration_bounds = array<i64: 2, 1, 1>, scalar_prefetch = 0 : i64, scratch_operands = 1 : i64, tpu.core_type = #tpu.core_type<tc>, window_params = [{transform_indices = @transform_0, window_bounds = array<i64: 256, 48>}, {transform_indices = @transform_1, window_bounds = array<i64: 48, 8>}, {transform_indices = @transform_2, window_bounds = array<i64: 1, 8>}, {transform_indices = @transform_3, window_bounds = array<i64: 1, 8>}, {transform_indices = @transform_4, window_bounds = array<i64: 256, 8>}]} {
    %c0_i32 = arith.constant 0 : i32
    %0 = arith.cmpi eq, %arg2, %c0_i32 : i32
    %1 = arith.extui %0 : i1 to i32
    %c0_i32_0 = arith.constant 0 : i32
    %2 = arith.cmpi ne, %1, %c0_i32_0 : i32
    scf.if %2 {
      %cst_10 = arith.constant 0.000000e+00 : f32
      %12 = vector.broadcast %cst_10 : f32 to vector<256x8xf32>
      %c0_11 = arith.constant 0 : index
      %c0_12 = arith.constant 0 : index
      %13 = vector.load %arg8[%c0_11, %c0_12] : memref<256x8xf32, #tpu.memory_space<vmem>>, vector<256x8xf32>
      tpu.vector_store %arg8[%c0_11, %c0_12], %12 {strides = array<i32>} : memref<256x8xf32, #tpu.memory_space<vmem>>, vector<256x8xf32>,
    } else {
    }
    %c0 = arith.constant 0 : index
    %c0_1 = arith.constant 0 : index
    %3 = vector.load %arg8[%c0, %c0_1] : memref<256x8xf32, #tpu.memory_space<vmem>>, vector<256x8xf32>
    %c0_2 = arith.constant 0 : index
    %c0_3 = arith.constant 0 : index
    %4 = vector.load %arg3[%c0_2, %c0_3] : memref<256x48xbf16, #tpu.memory_space<vmem>>, vector<256x48xbf16>
    %c0_4 = arith.constant 0 : index
    %c0_5 = arith.constant 0 : index
    %5 = vector.load %arg4[%c0_4, %c0_5] : memref<48x8xbf16, #tpu.memory_space<vmem>>, vector<48x8xbf16>
    %cst = arith.constant dense<0.000000e+00> : vector<256x8xf32>
    %6 = tpu.matmul %4, %5, %cst {dimension_numbers = #tpu.dot_dimension_numbers<[1], [0], [0], [1], [0, 0, 1, 1], [], []>} : vector<256x48xbf16>, vector<48x8xbf16>, vector<256x8xf32> -> vector<256x8xf32>
    %7 = arith.addf %3, %6 : vector<256x8xf32>
    %c0_6 = arith.constant 0 : index
    %c0_7 = arith.constant 0 : index
    %8 = vector.load %arg8[%c0_6, %c0_7] : memref<256x8xf32, #tpu.memory_space<vmem>>, vector<256x8xf32>
    tpu.vector_store %arg8[%c0_6, %c0_7], %7 {strides = array<i32>} : memref<256x8xf32, #tpu.memory_space<vmem>>, vector<256x8xf32>,
    %c0_i32_8 = arith.constant 0 : i32
    %9 = arith.cmpi eq, %arg2, %c0_i32_8 : i32
    %10 = arith.extui %9 : i1 to i32
    %c0_i32_9 = arith.constant 0 : i32
    %11 = arith.cmpi ne, %10, %c0_i32_9 : i32
    scf.if %11 {
      %c0_10 = arith.constant 0 : index
      %c0_11 = arith.constant 0 : index
      %12 = vector.load %arg8[%c0_10, %c0_11] : memref<256x8xf32, #tpu.memory_space<vmem>>, vector<256x8xf32>
      %c0_12 = arith.constant 0 : index
      %c0_13 = arith.constant 0 : index
      %13 = vector.load %arg5[%c0_12, %c0_13] : memref<1x8xf32, #tpu.memory_space<vmem>>, vector<1x8xf32>
      %14 = vector.broadcast %13 : vector<1x8xf32> to vector<256x8xf32>
      %15 = arith.mulf %12, %14 : vector<256x8xf32>
      %c0_14 = arith.constant 0 : index
      %c0_15 = arith.constant 0 : index
      %16 = vector.load %arg6[%c0_14, %c0_15] : memref<1x8xf32, #tpu.memory_space<vmem>>, vector<1x8xf32>
      %17 = vector.broadcast %16 : vector<1x8xf32> to vector<256x8xf32>
      %18 = arith.addf %15, %17 : vector<256x8xf32>
      %cst_16 = arith.constant 0.000000e+00 : f32
      %19 = vector.broadcast %cst_16 : f32 to vector<256x8xf32>
      %20 = arith.cmpf oge, %18, %19 : vector<256x8xf32>
      %cst_17 = arith.constant 2.000000e-01 : f32
      %21 = vector.broadcast %cst_17 : f32 to vector<256x8xf32>
      %22 = arith.mulf %21, %18 : vector<256x8xf32>
      %23 = arith.select %20, %18, %22 : vector<256x8xi1>, vector<256x8xf32>
      %24 = arith.truncf %23 : vector<256x8xf32> to vector<256x8xbf16>
      %c0_18 = arith.constant 0 : index
      %c0_19 = arith.constant 0 : index
      %25 = vector.load %arg7[%c0_18, %c0_19] : memref<256x8xbf16, #tpu.memory_space<vmem>>, vector<256x8xbf16>
      tpu.vector_store %arg7[%c0_18, %c0_19], %24 {strides = array<i32>} : memref<256x8xbf16, #tpu.memory_space<vmem>>, vector<256x8xbf16>,
    } else {
    }
    return
  }
  func.func @transform_0(%arg0: i32, %arg1: i32, %arg2: i32) -> (i32, i32) {
    %c0_i32 = arith.constant 0 : i32
    return %arg0, %arg2 : i32, i32
  }
  func.func @transform_1(%arg0: i32, %arg1: i32, %arg2: i32) -> (i32, i32) {
    %c0_i32 = arith.constant 0 : i32
    return %arg2, %arg1 : i32, i32
  }
  func.func @transform_2(%arg0: i32, %arg1: i32, %arg2: i32) -> (i32, i32) {
    %c0_i32 = arith.constant 0 : i32
    %c0_i32_0 = arith.constant 0 : i32
    return %c0_i32, %arg1 : i32, i32
  }
  func.func @transform_3(%arg0: i32, %arg1: i32, %arg2: i32) -> (i32, i32) {
    %c0_i32 = arith.constant 0 : i32
    %c0_i32_0 = arith.constant 0 : i32
    return %c0_i32, %arg1 : i32, i32
  }
  func.func @transform_4(%arg0: i32, %arg1: i32, %arg2: i32) -> (i32, i32) {
    %c0_i32 = arith.constant 0 : i32
    return %arg0, %arg1 : i32, i32
  }
}

module attributes {stable_mosaic.version = 11 : i64} {
  func.func @_matmul_fused_kernel(%arg0: i32, %arg1: i32, %arg2: i32, %arg3: memref<128x128xbf16, #tpu.memory_space<vmem>>, %arg4: memref<128x16xbf16, #tpu.memory_space<vmem>>, %arg5: memref<1x16xf32, #tpu.memory_space<vmem>>, %arg6: memref<1x16xf32, #tpu.memory_space<vmem>>, %arg7: memref<128x16xbf16, #tpu.memory_space<vmem>>, %arg8: memref<128x16xf32, #tpu.memory_space<vmem>>) attributes {dimension_semantics = [#tpu.dimension_semantics<parallel>, #tpu.dimension_semantics<parallel>, #tpu.dimension_semantics<arbitrary>], iteration_bounds = array<i64: 1, 1, 1>, scalar_prefetch = 0 : i64, scratch_operands = 1 : i64, tpu.core_type = #tpu.core_type<tc>, window_params = [{transform_indices = @transform_0, window_bounds = array<i64: 128, 128>}, {transform_indices = @transform_1, window_bounds = array<i64: 128, 16>}, {transform_indices = @transform_2, window_bounds = array<i64: 1, 16>}, {transform_indices = @transform_3, window_bounds = array<i64: 1, 16>}, {transform_indices = @transform_4, window_bounds = array<i64: 128, 16>}]} {
    %c0_i32 = arith.constant 0 : i32
    %0 = arith.cmpi eq, %arg2, %c0_i32 : i32
    %1 = arith.extui %0 : i1 to i32
    %c0_i32_0 = arith.constant 0 : i32
    %2 = arith.cmpi ne, %1, %c0_i32_0 : i32
    scf.if %2 {
      %cst_10 = arith.constant 0.000000e+00 : f32
      %12 = vector.broadcast %cst_10 : f32 to vector<128x16xf32>
      %c0_11 = arith.constant 0 : index
      %c0_12 = arith.constant 0 : index
      %13 = vector.load %arg8[%c0_11, %c0_12] : memref<128x16xf32, #tpu.memory_space<vmem>>, vector<128x16xf32>
      tpu.vector_store %arg8[%c0_11, %c0_12], %12 {strides = array<i32>} : memref<128x16xf32, #tpu.memory_space<vmem>>, vector<128x16xf32>,
    } else {
    }
    %c0 = arith.constant 0 : index
    %c0_1 = arith.constant 0 : index
    %3 = vector.load %arg8[%c0, %c0_1] : memref<128x16xf32, #tpu.memory_space<vmem>>, vector<128x16xf32>
    %c0_2 = arith.constant 0 : index
    %c0_3 = arith.constant 0 : index
    %4 = vector.load %arg3[%c0_2, %c0_3] : memref<128x128xbf16, #tpu.memory_space<vmem>>, vector<128x128xbf16>
    %c0_4 = arith.constant 0 : index
    %c0_5 = arith.constant 0 : index
    %5 = vector.load %arg4[%c0_4, %c0_5] : memref<128x16xbf16, #tpu.memory_space<vmem>>, vector<128x16xbf16>
    %cst = arith.constant dense<0.000000e+00> : vector<128x16xf32>
    %6 = tpu.matmul %4, %5, %cst {dimension_numbers = #tpu.dot_dimension_numbers<[1], [0], [0], [1], [0, 0, 1, 1], [], []>} : vector<128x128xbf16>, vector<128x16xbf16>, vector<128x16xf32> -> vector<128x16xf32>
    %7 = arith.addf %3, %6 : vector<128x16xf32>
    %c0_6 = arith.constant 0 : index
    %c0_7 = arith.constant 0 : index
    %8 = vector.load %arg8[%c0_6, %c0_7] : memref<128x16xf32, #tpu.memory_space<vmem>>, vector<128x16xf32>
    tpu.vector_store %arg8[%c0_6, %c0_7], %7 {strides = array<i32>} : memref<128x16xf32, #tpu.memory_space<vmem>>, vector<128x16xf32>,
    %c0_i32_8 = arith.constant 0 : i32
    %9 = arith.cmpi eq, %arg2, %c0_i32_8 : i32
    %10 = arith.extui %9 : i1 to i32
    %c0_i32_9 = arith.constant 0 : i32
    %11 = arith.cmpi ne, %10, %c0_i32_9 : i32
    scf.if %11 {
      %c0_10 = arith.constant 0 : index
      %c0_11 = arith.constant 0 : index
      %12 = vector.load %arg8[%c0_10, %c0_11] : memref<128x16xf32, #tpu.memory_space<vmem>>, vector<128x16xf32>
      %c0_12 = arith.constant 0 : index
      %c0_13 = arith.constant 0 : index
      %13 = vector.load %arg5[%c0_12, %c0_13] : memref<1x16xf32, #tpu.memory_space<vmem>>, vector<1x16xf32>
      %14 = vector.broadcast %13 : vector<1x16xf32> to vector<128x16xf32>
      %15 = arith.mulf %12, %14 : vector<128x16xf32>
      %c0_14 = arith.constant 0 : index
      %c0_15 = arith.constant 0 : index
      %16 = vector.load %arg6[%c0_14, %c0_15] : memref<1x16xf32, #tpu.memory_space<vmem>>, vector<1x16xf32>
      %17 = vector.broadcast %16 : vector<1x16xf32> to vector<128x16xf32>
      %18 = arith.addf %15, %17 : vector<128x16xf32>
      %cst_16 = arith.constant 0.000000e+00 : f32
      %19 = vector.broadcast %cst_16 : f32 to vector<128x16xf32>
      %20 = arith.cmpf oge, %18, %19 : vector<128x16xf32>
      %cst_17 = arith.constant 2.000000e-01 : f32
      %21 = vector.broadcast %cst_17 : f32 to vector<128x16xf32>
      %22 = arith.mulf %21, %18 : vector<128x16xf32>
      %23 = arith.select %20, %18, %22 : vector<128x16xi1>, vector<128x16xf32>
      %24 = arith.truncf %23 : vector<128x16xf32> to vector<128x16xbf16>
      %c0_18 = arith.constant 0 : index
      %c0_19 = arith.constant 0 : index
      %25 = vector.load %arg7[%c0_18, %c0_19] : memref<128x16xbf16, #tpu.memory_space<vmem>>, vector<128x16xbf16>
      tpu.vector_store %arg7[%c0_18, %c0_19], %24 {strides = array<i32>} : memref<128x16xbf16, #tpu.memory_space<vmem>>, vector<128x16xbf16>,
    } else {
    }
    return
  }
  func.func @transform_0(%arg0: i32, %arg1: i32, %arg2: i32) -> (i32, i32) {
    %c0_i32 = arith.constant 0 : i32
    return %arg0, %arg2 : i32, i32
  }
  func.func @transform_1(%arg0: i32, %arg1: i32, %arg2: i32) -> (i32, i32) {
    %c0_i32 = arith.constant 0 : i32
    return %arg2, %arg1 : i32, i32
  }
  func.func @transform_2(%arg0: i32, %arg1: i32, %arg2: i32) -> (i32, i32) {
    %c0_i32 = arith.constant 0 : i32
    %c0_i32_0 = arith.constant 0 : i32
    return %c0_i32, %arg1 : i32, i32
  }
  func.func @transform_3(%arg0: i32, %arg1: i32, %arg2: i32) -> (i32, i32) {
    %c0_i32 = arith.constant 0 : i32
    %c0_i32_0 = arith.constant 0 : i32
    return %c0_i32, %arg1 : i32, i32
  }
  func.func @transform_4(%arg0: i32, %arg1: i32, %arg2: i32) -> (i32, i32) {
    %c0_i32 = arith.constant 0 : i32
    return %arg0, %arg1 : i32, i32
  }
}

module attributes {stable_mosaic.version = 11 : i64} {
  func.func @_matmul_fused_kernel(%arg0: i32, %arg1: i32, %arg2: i32, %arg3: memref<32x256xbf16, #tpu.memory_space<vmem>>, %arg4: memref<256x32xbf16, #tpu.memory_space<vmem>>, %arg5: memref<1x32xf32, #tpu.memory_space<vmem>>, %arg6: memref<1x32xf32, #tpu.memory_space<vmem>>, %arg7: memref<32x32xbf16, #tpu.memory_space<vmem>>, %arg8: memref<32x32xf32, #tpu.memory_space<vmem>>) attributes {dimension_semantics = [#tpu.dimension_semantics<parallel>, #tpu.dimension_semantics<parallel>, #tpu.dimension_semantics<arbitrary>], iteration_bounds = array<i64: 1, 1, 1>, scalar_prefetch = 0 : i64, scratch_operands = 1 : i64, tpu.core_type = #tpu.core_type<tc>, window_params = [{transform_indices = @transform_0, window_bounds = array<i64: 32, 256>}, {transform_indices = @transform_1, window_bounds = array<i64: 256, 32>}, {transform_indices = @transform_2, window_bounds = array<i64: 1, 32>}, {transform_indices = @transform_3, window_bounds = array<i64: 1, 32>}, {transform_indices = @transform_4, window_bounds = array<i64: 32, 32>}]} {
    %c0_i32 = arith.constant 0 : i32
    %0 = arith.cmpi eq, %arg2, %c0_i32 : i32
    %1 = arith.extui %0 : i1 to i32
    %c0_i32_0 = arith.constant 0 : i32
    %2 = arith.cmpi ne, %1, %c0_i32_0 : i32
    scf.if %2 {
      %cst_10 = arith.constant 0.000000e+00 : f32
      %12 = vector.broadcast %cst_10 : f32 to vector<32x32xf32>
      %c0_11 = arith.constant 0 : index
      %c0_12 = arith.constant 0 : index
      %13 = vector.load %arg8[%c0_11, %c0_12] : memref<32x32xf32, #tpu.memory_space<vmem>>, vector<32x32xf32>
      tpu.vector_store %arg8[%c0_11, %c0_12], %12 {strides = array<i32>} : memref<32x32xf32, #tpu.memory_space<vmem>>, vector<32x32xf32>,
    } else {
    }
    %c0 = arith.constant 0 : index
    %c0_1 = arith.constant 0 : index
    %3 = vector.load %arg8[%c0, %c0_1] : memref<32x32xf32, #tpu.memory_space<vmem>>, vector<32x32xf32>
    %c0_2 = arith.constant 0 : index
    %c0_3 = arith.constant 0 : index
    %4 = vector.load %arg3[%c0_2, %c0_3] : memref<32x256xbf16, #tpu.memory_space<vmem>>, vector<32x256xbf16>
    %c0_4 = arith.constant 0 : index
    %c0_5 = arith.constant 0 : index
    %5 = vector.load %arg4[%c0_4, %c0_5] : memref<256x32xbf16, #tpu.memory_space<vmem>>, vector<256x32xbf16>
    %cst = arith.constant dense<0.000000e+00> : vector<32x32xf32>
    %6 = tpu.matmul %4, %5, %cst {dimension_numbers = #tpu.dot_dimension_numbers<[1], [0], [0], [1], [0, 0, 1, 1], [], []>} : vector<32x256xbf16>, vector<256x32xbf16>, vector<32x32xf32> -> vector<32x32xf32>
    %7 = arith.addf %3, %6 : vector<32x32xf32>
    %c0_6 = arith.constant 0 : index
    %c0_7 = arith.constant 0 : index
    %8 = vector.load %arg8[%c0_6, %c0_7] : memref<32x32xf32, #tpu.memory_space<vmem>>, vector<32x32xf32>
    tpu.vector_store %arg8[%c0_6, %c0_7], %7 {strides = array<i32>} : memref<32x32xf32, #tpu.memory_space<vmem>>, vector<32x32xf32>,
    %c0_i32_8 = arith.constant 0 : i32
    %9 = arith.cmpi eq, %arg2, %c0_i32_8 : i32
    %10 = arith.extui %9 : i1 to i32
    %c0_i32_9 = arith.constant 0 : i32
    %11 = arith.cmpi ne, %10, %c0_i32_9 : i32
    scf.if %11 {
      %c0_10 = arith.constant 0 : index
      %c0_11 = arith.constant 0 : index
      %12 = vector.load %arg8[%c0_10, %c0_11] : memref<32x32xf32, #tpu.memory_space<vmem>>, vector<32x32xf32>
      %c0_12 = arith.constant 0 : index
      %c0_13 = arith.constant 0 : index
      %13 = vector.load %arg5[%c0_12, %c0_13] : memref<1x32xf32, #tpu.memory_space<vmem>>, vector<1x32xf32>
      %14 = vector.broadcast %13 : vector<1x32xf32> to vector<32x32xf32>
      %15 = arith.mulf %12, %14 : vector<32x32xf32>
      %c0_14 = arith.constant 0 : index
      %c0_15 = arith.constant 0 : index
      %16 = vector.load %arg6[%c0_14, %c0_15] : memref<1x32xf32, #tpu.memory_space<vmem>>, vector<1x32xf32>
      %17 = vector.broadcast %16 : vector<1x32xf32> to vector<32x32xf32>
      %18 = arith.addf %15, %17 : vector<32x32xf32>
      %cst_16 = arith.constant 0.000000e+00 : f32
      %19 = vector.broadcast %cst_16 : f32 to vector<32x32xf32>
      %20 = arith.cmpf oge, %18, %19 : vector<32x32xf32>
      %cst_17 = arith.constant 2.000000e-01 : f32
      %21 = vector.broadcast %cst_17 : f32 to vector<32x32xf32>
      %22 = arith.mulf %21, %18 : vector<32x32xf32>
      %23 = arith.select %20, %18, %22 : vector<32x32xi1>, vector<32x32xf32>
      %24 = arith.truncf %23 : vector<32x32xf32> to vector<32x32xbf16>
      %c0_18 = arith.constant 0 : index
      %c0_19 = arith.constant 0 : index
      %25 = vector.load %arg7[%c0_18, %c0_19] : memref<32x32xbf16, #tpu.memory_space<vmem>>, vector<32x32xbf16>
      tpu.vector_store %arg7[%c0_18, %c0_19], %24 {strides = array<i32>} : memref<32x32xbf16, #tpu.memory_space<vmem>>, vector<32x32xbf16>,
    } else {
    }
    return
  }
  func.func @transform_0(%arg0: i32, %arg1: i32, %arg2: i32) -> (i32, i32) {
    %c0_i32 = arith.constant 0 : i32
    return %arg0, %arg2 : i32, i32
  }
  func.func @transform_1(%arg0: i32, %arg1: i32, %arg2: i32) -> (i32, i32) {
    %c0_i32 = arith.constant 0 : i32
    return %arg2, %arg1 : i32, i32
  }
  func.func @transform_2(%arg0: i32, %arg1: i32, %arg2: i32) -> (i32, i32) {
    %c0_i32 = arith.constant 0 : i32
    %c0_i32_0 = arith.constant 0 : i32
    return %c0_i32, %arg1 : i32, i32
  }
  func.func @transform_3(%arg0: i32, %arg1: i32, %arg2: i32) -> (i32, i32) {
    %c0_i32 = arith.constant 0 : i32
    %c0_i32_0 = arith.constant 0 : i32
    return %c0_i32, %arg1 : i32, i32
  }
  func.func @transform_4(%arg0: i32, %arg1: i32, %arg2: i32) -> (i32, i32) {
    %c0_i32 = arith.constant 0 : i32
    return %arg0, %arg1 : i32, i32
  }
}

module attributes {stable_mosaic.version = 11 : i64} {
  func.func @_matmul_fused_kernel(%arg0: i32, %arg1: i32, %arg2: i32, %arg3: memref<8x512xbf16, #tpu.memory_space<vmem>>, %arg4: memref<512x64xbf16, #tpu.memory_space<vmem>>, %arg5: memref<1x64xf32, #tpu.memory_space<vmem>>, %arg6: memref<1x64xf32, #tpu.memory_space<vmem>>, %arg7: memref<8x64xbf16, #tpu.memory_space<vmem>>, %arg8: memref<8x64xf32, #tpu.memory_space<vmem>>) attributes {dimension_semantics = [#tpu.dimension_semantics<parallel>, #tpu.dimension_semantics<parallel>, #tpu.dimension_semantics<arbitrary>], iteration_bounds = array<i64: 1, 1, 1>, scalar_prefetch = 0 : i64, scratch_operands = 1 : i64, tpu.core_type = #tpu.core_type<tc>, window_params = [{transform_indices = @transform_0, window_bounds = array<i64: 8, 512>}, {transform_indices = @transform_1, window_bounds = array<i64: 512, 64>}, {transform_indices = @transform_2, window_bounds = array<i64: 1, 64>}, {transform_indices = @transform_3, window_bounds = array<i64: 1, 64>}, {transform_indices = @transform_4, window_bounds = array<i64: 8, 64>}]} {
    %c0_i32 = arith.constant 0 : i32
    %0 = arith.cmpi eq, %arg2, %c0_i32 : i32
    %1 = arith.extui %0 : i1 to i32
    %c0_i32_0 = arith.constant 0 : i32
    %2 = arith.cmpi ne, %1, %c0_i32_0 : i32
    scf.if %2 {
      %cst_10 = arith.constant 0.000000e+00 : f32
      %12 = vector.broadcast %cst_10 : f32 to vector<8x64xf32>
      %c0_11 = arith.constant 0 : index
      %c0_12 = arith.constant 0 : index
      %13 = vector.load %arg8[%c0_11, %c0_12] : memref<8x64xf32, #tpu.memory_space<vmem>>, vector<8x64xf32>
      tpu.vector_store %arg8[%c0_11, %c0_12], %12 {strides = array<i32>} : memref<8x64xf32, #tpu.memory_space<vmem>>, vector<8x64xf32>,
    } else {
    }
    %c0 = arith.constant 0 : index
    %c0_1 = arith.constant 0 : index
    %3 = vector.load %arg8[%c0, %c0_1] : memref<8x64xf32, #tpu.memory_space<vmem>>, vector<8x64xf32>
    %c0_2 = arith.constant 0 : index
    %c0_3 = arith.constant 0 : index
    %4 = vector.load %arg3[%c0_2, %c0_3] : memref<8x512xbf16, #tpu.memory_space<vmem>>, vector<8x512xbf16>
    %c0_4 = arith.constant 0 : index
    %c0_5 = arith.constant 0 : index
    %5 = vector.load %arg4[%c0_4, %c0_5] : memref<512x64xbf16, #tpu.memory_space<vmem>>, vector<512x64xbf16>
    %cst = arith.constant dense<0.000000e+00> : vector<8x64xf32>
    %6 = tpu.matmul %4, %5, %cst {dimension_numbers = #tpu.dot_dimension_numbers<[1], [0], [0], [1], [0, 0, 1, 1], [], []>} : vector<8x512xbf16>, vector<512x64xbf16>, vector<8x64xf32> -> vector<8x64xf32>
    %7 = arith.addf %3, %6 : vector<8x64xf32>
    %c0_6 = arith.constant 0 : index
    %c0_7 = arith.constant 0 : index
    %8 = vector.load %arg8[%c0_6, %c0_7] : memref<8x64xf32, #tpu.memory_space<vmem>>, vector<8x64xf32>
    tpu.vector_store %arg8[%c0_6, %c0_7], %7 {strides = array<i32>} : memref<8x64xf32, #tpu.memory_space<vmem>>, vector<8x64xf32>,
    %c0_i32_8 = arith.constant 0 : i32
    %9 = arith.cmpi eq, %arg2, %c0_i32_8 : i32
    %10 = arith.extui %9 : i1 to i32
    %c0_i32_9 = arith.constant 0 : i32
    %11 = arith.cmpi ne, %10, %c0_i32_9 : i32
    scf.if %11 {
      %c0_10 = arith.constant 0 : index
      %c0_11 = arith.constant 0 : index
      %12 = vector.load %arg8[%c0_10, %c0_11] : memref<8x64xf32, #tpu.memory_space<vmem>>, vector<8x64xf32>
      %c0_12 = arith.constant 0 : index
      %c0_13 = arith.constant 0 : index
      %13 = vector.load %arg5[%c0_12, %c0_13] : memref<1x64xf32, #tpu.memory_space<vmem>>, vector<1x64xf32>
      %14 = vector.broadcast %13 : vector<1x64xf32> to vector<8x64xf32>
      %15 = arith.mulf %12, %14 : vector<8x64xf32>
      %c0_14 = arith.constant 0 : index
      %c0_15 = arith.constant 0 : index
      %16 = vector.load %arg6[%c0_14, %c0_15] : memref<1x64xf32, #tpu.memory_space<vmem>>, vector<1x64xf32>
      %17 = vector.broadcast %16 : vector<1x64xf32> to vector<8x64xf32>
      %18 = arith.addf %15, %17 : vector<8x64xf32>
      %cst_16 = arith.constant 0.000000e+00 : f32
      %19 = vector.broadcast %cst_16 : f32 to vector<8x64xf32>
      %20 = arith.cmpf oge, %18, %19 : vector<8x64xf32>
      %cst_17 = arith.constant 2.000000e-01 : f32
      %21 = vector.broadcast %cst_17 : f32 to vector<8x64xf32>
      %22 = arith.mulf %21, %18 : vector<8x64xf32>
      %23 = arith.select %20, %18, %22 : vector<8x64xi1>, vector<8x64xf32>
      %24 = arith.truncf %23 : vector<8x64xf32> to vector<8x64xbf16>
      %c0_18 = arith.constant 0 : index
      %c0_19 = arith.constant 0 : index
      %25 = vector.load %arg7[%c0_18, %c0_19] : memref<8x64xbf16, #tpu.memory_space<vmem>>, vector<8x64xbf16>
      tpu.vector_store %arg7[%c0_18, %c0_19], %24 {strides = array<i32>} : memref<8x64xbf16, #tpu.memory_space<vmem>>, vector<8x64xbf16>,
    } else {
    }
    return
  }
  func.func @transform_0(%arg0: i32, %arg1: i32, %arg2: i32) -> (i32, i32) {
    %c0_i32 = arith.constant 0 : i32
    return %arg0, %arg2 : i32, i32
  }
  func.func @transform_1(%arg0: i32, %arg1: i32, %arg2: i32) -> (i32, i32) {
    %c0_i32 = arith.constant 0 : i32
    return %arg2, %arg1 : i32, i32
  }
  func.func @transform_2(%arg0: i32, %arg1: i32, %arg2: i32) -> (i32, i32) {
    %c0_i32 = arith.constant 0 : i32
    %c0_i32_0 = arith.constant 0 : i32
    return %c0_i32, %arg1 : i32, i32
  }
  func.func @transform_3(%arg0: i32, %arg1: i32, %arg2: i32) -> (i32, i32) {
    %c0_i32 = arith.constant 0 : i32
    %c0_i32_0 = arith.constant 0 : i32
    return %c0_i32, %arg1 : i32, i32
  }
  func.func @transform_4(%arg0: i32, %arg1: i32, %arg2: i32) -> (i32, i32) {
    %c0_i32 = arith.constant 0 : i32
    return %arg0, %arg1 : i32, i32
  }
}

module attributes {stable_mosaic.version = 11 : i64} {
  func.func @_matmul_fused_kernel(%arg0: i32, %arg1: i32, %arg2: i32, %arg3: memref<18x256xbf16, #tpu.memory_space<vmem>>, %arg4: memref<256x128xbf16, #tpu.memory_space<vmem>>, %arg5: memref<1x128xf32, #tpu.memory_space<vmem>>, %arg6: memref<1x128xf32, #tpu.memory_space<vmem>>, %arg7: memref<18x128xbf16, #tpu.memory_space<vmem>>, %arg8: memref<18x128xf32, #tpu.memory_space<vmem>>) attributes {dimension_semantics = [#tpu.dimension_semantics<parallel>, #tpu.dimension_semantics<parallel>, #tpu.dimension_semantics<arbitrary>], iteration_bounds = array<i64: 1, 1, 1>, scalar_prefetch = 0 : i64, scratch_operands = 1 : i64, tpu.core_type = #tpu.core_type<tc>, window_params = [{transform_indices = @transform_0, window_bounds = array<i64: 18, 256>}, {transform_indices = @transform_1, window_bounds = array<i64: 256, 128>}, {transform_indices = @transform_2, window_bounds = array<i64: 1, 128>}, {transform_indices = @transform_3, window_bounds = array<i64: 1, 128>}, {transform_indices = @transform_4, window_bounds = array<i64: 18, 128>}]} {
    %c0_i32 = arith.constant 0 : i32
    %0 = arith.cmpi eq, %arg2, %c0_i32 : i32
    %1 = arith.extui %0 : i1 to i32
    %c0_i32_0 = arith.constant 0 : i32
    %2 = arith.cmpi ne, %1, %c0_i32_0 : i32
    scf.if %2 {
      %cst_10 = arith.constant 0.000000e+00 : f32
      %12 = vector.broadcast %cst_10 : f32 to vector<18x128xf32>
      %c0_11 = arith.constant 0 : index
      %c0_12 = arith.constant 0 : index
      %13 = vector.load %arg8[%c0_11, %c0_12] : memref<18x128xf32, #tpu.memory_space<vmem>>, vector<18x128xf32>
      tpu.vector_store %arg8[%c0_11, %c0_12], %12 {strides = array<i32>} : memref<18x128xf32, #tpu.memory_space<vmem>>, vector<18x128xf32>,
    } else {
    }
    %c0 = arith.constant 0 : index
    %c0_1 = arith.constant 0 : index
    %3 = vector.load %arg8[%c0, %c0_1] : memref<18x128xf32, #tpu.memory_space<vmem>>, vector<18x128xf32>
    %c0_2 = arith.constant 0 : index
    %c0_3 = arith.constant 0 : index
    %4 = vector.load %arg3[%c0_2, %c0_3] : memref<18x256xbf16, #tpu.memory_space<vmem>>, vector<18x256xbf16>
    %c0_4 = arith.constant 0 : index
    %c0_5 = arith.constant 0 : index
    %5 = vector.load %arg4[%c0_4, %c0_5] : memref<256x128xbf16, #tpu.memory_space<vmem>>, vector<256x128xbf16>
    %cst = arith.constant dense<0.000000e+00> : vector<18x128xf32>
    %6 = tpu.matmul %4, %5, %cst {dimension_numbers = #tpu.dot_dimension_numbers<[1], [0], [0], [1], [0, 0, 1, 1], [], []>} : vector<18x256xbf16>, vector<256x128xbf16>, vector<18x128xf32> -> vector<18x128xf32>
    %7 = arith.addf %3, %6 : vector<18x128xf32>
    %c0_6 = arith.constant 0 : index
    %c0_7 = arith.constant 0 : index
    %8 = vector.load %arg8[%c0_6, %c0_7] : memref<18x128xf32, #tpu.memory_space<vmem>>, vector<18x128xf32>
    tpu.vector_store %arg8[%c0_6, %c0_7], %7 {strides = array<i32>} : memref<18x128xf32, #tpu.memory_space<vmem>>, vector<18x128xf32>,
    %c0_i32_8 = arith.constant 0 : i32
    %9 = arith.cmpi eq, %arg2, %c0_i32_8 : i32
    %10 = arith.extui %9 : i1 to i32
    %c0_i32_9 = arith.constant 0 : i32
    %11 = arith.cmpi ne, %10, %c0_i32_9 : i32
    scf.if %11 {
      %c0_10 = arith.constant 0 : index
      %c0_11 = arith.constant 0 : index
      %12 = vector.load %arg8[%c0_10, %c0_11] : memref<18x128xf32, #tpu.memory_space<vmem>>, vector<18x128xf32>
      %c0_12 = arith.constant 0 : index
      %c0_13 = arith.constant 0 : index
      %13 = vector.load %arg5[%c0_12, %c0_13] : memref<1x128xf32, #tpu.memory_space<vmem>>, vector<1x128xf32>
      %14 = vector.broadcast %13 : vector<1x128xf32> to vector<18x128xf32>
      %15 = arith.mulf %12, %14 : vector<18x128xf32>
      %c0_14 = arith.constant 0 : index
      %c0_15 = arith.constant 0 : index
      %16 = vector.load %arg6[%c0_14, %c0_15] : memref<1x128xf32, #tpu.memory_space<vmem>>, vector<1x128xf32>
      %17 = vector.broadcast %16 : vector<1x128xf32> to vector<18x128xf32>
      %18 = arith.addf %15, %17 : vector<18x128xf32>
      %cst_16 = arith.constant 0.000000e+00 : f32
      %19 = vector.broadcast %cst_16 : f32 to vector<18x128xf32>
      %20 = arith.cmpf oge, %18, %19 : vector<18x128xf32>
      %cst_17 = arith.constant 2.000000e-01 : f32
      %21 = vector.broadcast %cst_17 : f32 to vector<18x128xf32>
      %22 = arith.mulf %21, %18 : vector<18x128xf32>
      %23 = arith.select %20, %18, %22 : vector<18x128xi1>, vector<18x128xf32>
      %24 = arith.truncf %23 : vector<18x128xf32> to vector<18x128xbf16>
      %c0_18 = arith.constant 0 : index
      %c0_19 = arith.constant 0 : index
      %25 = vector.load %arg7[%c0_18, %c0_19] : memref<18x128xbf16, #tpu.memory_space<vmem>>, vector<18x128xbf16>
      tpu.vector_store %arg7[%c0_18, %c0_19], %24 {strides = array<i32>} : memref<18x128xbf16, #tpu.memory_space<vmem>>, vector<18x128xbf16>,
    } else {
    }
    return
  }
  func.func @transform_0(%arg0: i32, %arg1: i32, %arg2: i32) -> (i32, i32) {
    %c0_i32 = arith.constant 0 : i32
    return %arg0, %arg2 : i32, i32
  }
  func.func @transform_1(%arg0: i32, %arg1: i32, %arg2: i32) -> (i32, i32) {
    %c0_i32 = arith.constant 0 : i32
    return %arg2, %arg1 : i32, i32
  }
  func.func @transform_2(%arg0: i32, %arg1: i32, %arg2: i32) -> (i32, i32) {
    %c0_i32 = arith.constant 0 : i32
    %c0_i32_0 = arith.constant 0 : i32
    return %c0_i32, %arg1 : i32, i32
  }
  func.func @transform_3(%arg0: i32, %arg1: i32, %arg2: i32) -> (i32, i32) {
    %c0_i32 = arith.constant 0 : i32
    %c0_i32_0 = arith.constant 0 : i32
    return %c0_i32, %arg1 : i32, i32
  }
  func.func @transform_4(%arg0: i32, %arg1: i32, %arg2: i32) -> (i32, i32) {
    %c0_i32 = arith.constant 0 : i32
    return %arg0, %arg1 : i32, i32
  }
}

module attributes {stable_mosaic.version = 11 : i64} {
  func.func @_matmul_fused_kernel(%arg0: i32, %arg1: i32, %arg2: i32, %arg3: memref<50x128xbf16, #tpu.memory_space<vmem>>, %arg4: memref<128x64xbf16, #tpu.memory_space<vmem>>, %arg5: memref<1x64xf32, #tpu.memory_space<vmem>>, %arg6: memref<1x64xf32, #tpu.memory_space<vmem>>, %arg7: memref<50x64xbf16, #tpu.memory_space<vmem>>, %arg8: memref<50x64xf32, #tpu.memory_space<vmem>>) attributes {dimension_semantics = [#tpu.dimension_semantics<parallel>, #tpu.dimension_semantics<parallel>, #tpu.dimension_semantics<arbitrary>], iteration_bounds = array<i64: 1, 1, 1>, scalar_prefetch = 0 : i64, scratch_operands = 1 : i64, tpu.core_type = #tpu.core_type<tc>, window_params = [{transform_indices = @transform_0, window_bounds = array<i64: 50, 128>}, {transform_indices = @transform_1, window_bounds = array<i64: 128, 64>}, {transform_indices = @transform_2, window_bounds = array<i64: 1, 64>}, {transform_indices = @transform_3, window_bounds = array<i64: 1, 64>}, {transform_indices = @transform_4, window_bounds = array<i64: 50, 64>}]} {
    %c0_i32 = arith.constant 0 : i32
    %0 = arith.cmpi eq, %arg2, %c0_i32 : i32
    %1 = arith.extui %0 : i1 to i32
    %c0_i32_0 = arith.constant 0 : i32
    %2 = arith.cmpi ne, %1, %c0_i32_0 : i32
    scf.if %2 {
      %cst_10 = arith.constant 0.000000e+00 : f32
      %12 = vector.broadcast %cst_10 : f32 to vector<50x64xf32>
      %c0_11 = arith.constant 0 : index
      %c0_12 = arith.constant 0 : index
      %13 = vector.load %arg8[%c0_11, %c0_12] : memref<50x64xf32, #tpu.memory_space<vmem>>, vector<50x64xf32>
      tpu.vector_store %arg8[%c0_11, %c0_12], %12 {strides = array<i32>} : memref<50x64xf32, #tpu.memory_space<vmem>>, vector<50x64xf32>,
    } else {
    }
    %c0 = arith.constant 0 : index
    %c0_1 = arith.constant 0 : index
    %3 = vector.load %arg8[%c0, %c0_1] : memref<50x64xf32, #tpu.memory_space<vmem>>, vector<50x64xf32>
    %c0_2 = arith.constant 0 : index
    %c0_3 = arith.constant 0 : index
    %4 = vector.load %arg3[%c0_2, %c0_3] : memref<50x128xbf16, #tpu.memory_space<vmem>>, vector<50x128xbf16>
    %c0_4 = arith.constant 0 : index
    %c0_5 = arith.constant 0 : index
    %5 = vector.load %arg4[%c0_4, %c0_5] : memref<128x64xbf16, #tpu.memory_space<vmem>>, vector<128x64xbf16>
    %cst = arith.constant dense<0.000000e+00> : vector<50x64xf32>
    %6 = tpu.matmul %4, %5, %cst {dimension_numbers = #tpu.dot_dimension_numbers<[1], [0], [0], [1], [0, 0, 1, 1], [], []>} : vector<50x128xbf16>, vector<128x64xbf16>, vector<50x64xf32> -> vector<50x64xf32>
    %7 = arith.addf %3, %6 : vector<50x64xf32>
    %c0_6 = arith.constant 0 : index
    %c0_7 = arith.constant 0 : index
    %8 = vector.load %arg8[%c0_6, %c0_7] : memref<50x64xf32, #tpu.memory_space<vmem>>, vector<50x64xf32>
    tpu.vector_store %arg8[%c0_6, %c0_7], %7 {strides = array<i32>} : memref<50x64xf32, #tpu.memory_space<vmem>>, vector<50x64xf32>,
    %c0_i32_8 = arith.constant 0 : i32
    %9 = arith.cmpi eq, %arg2, %c0_i32_8 : i32
    %10 = arith.extui %9 : i1 to i32
    %c0_i32_9 = arith.constant 0 : i32
    %11 = arith.cmpi ne, %10, %c0_i32_9 : i32
    scf.if %11 {
      %c0_10 = arith.constant 0 : index
      %c0_11 = arith.constant 0 : index
      %12 = vector.load %arg8[%c0_10, %c0_11] : memref<50x64xf32, #tpu.memory_space<vmem>>, vector<50x64xf32>
      %c0_12 = arith.constant 0 : index
      %c0_13 = arith.constant 0 : index
      %13 = vector.load %arg5[%c0_12, %c0_13] : memref<1x64xf32, #tpu.memory_space<vmem>>, vector<1x64xf32>
      %14 = vector.broadcast %13 : vector<1x64xf32> to vector<50x64xf32>
      %15 = arith.mulf %12, %14 : vector<50x64xf32>
      %c0_14 = arith.constant 0 : index
      %c0_15 = arith.constant 0 : index
      %16 = vector.load %arg6[%c0_14, %c0_15] : memref<1x64xf32, #tpu.memory_space<vmem>>, vector<1x64xf32>
      %17 = vector.broadcast %16 : vector<1x64xf32> to vector<50x64xf32>
      %18 = arith.addf %15, %17 : vector<50x64xf32>
      %cst_16 = arith.constant 0.000000e+00 : f32
      %19 = vector.broadcast %cst_16 : f32 to vector<50x64xf32>
      %20 = arith.cmpf oge, %18, %19 : vector<50x64xf32>
      %cst_17 = arith.constant 2.000000e-01 : f32
      %21 = vector.broadcast %cst_17 : f32 to vector<50x64xf32>
      %22 = arith.mulf %21, %18 : vector<50x64xf32>
      %23 = arith.select %20, %18, %22 : vector<50x64xi1>, vector<50x64xf32>
      %24 = arith.truncf %23 : vector<50x64xf32> to vector<50x64xbf16>
      %c0_18 = arith.constant 0 : index
      %c0_19 = arith.constant 0 : index
      %25 = vector.load %arg7[%c0_18, %c0_19] : memref<50x64xbf16, #tpu.memory_space<vmem>>, vector<50x64xbf16>
      tpu.vector_store %arg7[%c0_18, %c0_19], %24 {strides = array<i32>} : memref<50x64xbf16, #tpu.memory_space<vmem>>, vector<50x64xbf16>,
    } else {
    }
    return
  }
  func.func @transform_0(%arg0: i32, %arg1: i32, %arg2: i32) -> (i32, i32) {
    %c0_i32 = arith.constant 0 : i32
    return %arg0, %arg2 : i32, i32
  }
  func.func @transform_1(%arg0: i32, %arg1: i32, %arg2: i32) -> (i32, i32) {
    %c0_i32 = arith.constant 0 : i32
    return %arg2, %arg1 : i32, i32
  }
  func.func @transform_2(%arg0: i32, %arg1: i32, %arg2: i32) -> (i32, i32) {
    %c0_i32 = arith.constant 0 : i32
    %c0_i32_0 = arith.constant 0 : i32
    return %c0_i32, %arg1 : i32, i32
  }
  func.func @transform_3(%arg0: i32, %arg1: i32, %arg2: i32) -> (i32, i32) {
    %c0_i32 = arith.constant 0 : i32
    %c0_i32_0 = arith.constant 0 : i32
    return %c0_i32, %arg1 : i32, i32
  }
  func.func @transform_4(%arg0: i32, %arg1: i32, %arg2: i32) -> (i32, i32) {
    %c0_i32 = arith.constant 0 : i32
    return %arg0, %arg1 : i32, i32
  }
}

module attributes {stable_mosaic.version = 11 : i64} {
  func.func @_matmul_fused_kernel(%arg0: i32, %arg1: i32, %arg2: i32, %arg3: memref<162x64xbf16, #tpu.memory_space<vmem>>, %arg4: memref<64x32xbf16, #tpu.memory_space<vmem>>, %arg5: memref<1x32xf32, #tpu.memory_space<vmem>>, %arg6: memref<1x32xf32, #tpu.memory_space<vmem>>, %arg7: memref<162x32xbf16, #tpu.memory_space<vmem>>, %arg8: memref<162x32xf32, #tpu.memory_space<vmem>>) attributes {dimension_semantics = [#tpu.dimension_semantics<parallel>, #tpu.dimension_semantics<parallel>, #tpu.dimension_semantics<arbitrary>], iteration_bounds = array<i64: 1, 1, 1>, scalar_prefetch = 0 : i64, scratch_operands = 1 : i64, tpu.core_type = #tpu.core_type<tc>, window_params = [{transform_indices = @transform_0, window_bounds = array<i64: 162, 64>}, {transform_indices = @transform_1, window_bounds = array<i64: 64, 32>}, {transform_indices = @transform_2, window_bounds = array<i64: 1, 32>}, {transform_indices = @transform_3, window_bounds = array<i64: 1, 32>}, {transform_indices = @transform_4, window_bounds = array<i64: 162, 32>}]} {
    %c0_i32 = arith.constant 0 : i32
    %0 = arith.cmpi eq, %arg2, %c0_i32 : i32
    %1 = arith.extui %0 : i1 to i32
    %c0_i32_0 = arith.constant 0 : i32
    %2 = arith.cmpi ne, %1, %c0_i32_0 : i32
    scf.if %2 {
      %cst_10 = arith.constant 0.000000e+00 : f32
      %12 = vector.broadcast %cst_10 : f32 to vector<162x32xf32>
      %c0_11 = arith.constant 0 : index
      %c0_12 = arith.constant 0 : index
      %13 = vector.load %arg8[%c0_11, %c0_12] : memref<162x32xf32, #tpu.memory_space<vmem>>, vector<162x32xf32>
      tpu.vector_store %arg8[%c0_11, %c0_12], %12 {strides = array<i32>} : memref<162x32xf32, #tpu.memory_space<vmem>>, vector<162x32xf32>,
    } else {
    }
    %c0 = arith.constant 0 : index
    %c0_1 = arith.constant 0 : index
    %3 = vector.load %arg8[%c0, %c0_1] : memref<162x32xf32, #tpu.memory_space<vmem>>, vector<162x32xf32>
    %c0_2 = arith.constant 0 : index
    %c0_3 = arith.constant 0 : index
    %4 = vector.load %arg3[%c0_2, %c0_3] : memref<162x64xbf16, #tpu.memory_space<vmem>>, vector<162x64xbf16>
    %c0_4 = arith.constant 0 : index
    %c0_5 = arith.constant 0 : index
    %5 = vector.load %arg4[%c0_4, %c0_5] : memref<64x32xbf16, #tpu.memory_space<vmem>>, vector<64x32xbf16>
    %cst = arith.constant dense<0.000000e+00> : vector<162x32xf32>
    %6 = tpu.matmul %4, %5, %cst {dimension_numbers = #tpu.dot_dimension_numbers<[1], [0], [0], [1], [0, 0, 1, 1], [], []>} : vector<162x64xbf16>, vector<64x32xbf16>, vector<162x32xf32> -> vector<162x32xf32>
    %7 = arith.addf %3, %6 : vector<162x32xf32>
    %c0_6 = arith.constant 0 : index
    %c0_7 = arith.constant 0 : index
    %8 = vector.load %arg8[%c0_6, %c0_7] : memref<162x32xf32, #tpu.memory_space<vmem>>, vector<162x32xf32>
    tpu.vector_store %arg8[%c0_6, %c0_7], %7 {strides = array<i32>} : memref<162x32xf32, #tpu.memory_space<vmem>>, vector<162x32xf32>,
    %c0_i32_8 = arith.constant 0 : i32
    %9 = arith.cmpi eq, %arg2, %c0_i32_8 : i32
    %10 = arith.extui %9 : i1 to i32
    %c0_i32_9 = arith.constant 0 : i32
    %11 = arith.cmpi ne, %10, %c0_i32_9 : i32
    scf.if %11 {
      %c0_10 = arith.constant 0 : index
      %c0_11 = arith.constant 0 : index
      %12 = vector.load %arg8[%c0_10, %c0_11] : memref<162x32xf32, #tpu.memory_space<vmem>>, vector<162x32xf32>
      %c0_12 = arith.constant 0 : index
      %c0_13 = arith.constant 0 : index
      %13 = vector.load %arg5[%c0_12, %c0_13] : memref<1x32xf32, #tpu.memory_space<vmem>>, vector<1x32xf32>
      %14 = vector.broadcast %13 : vector<1x32xf32> to vector<162x32xf32>
      %15 = arith.mulf %12, %14 : vector<162x32xf32>
      %c0_14 = arith.constant 0 : index
      %c0_15 = arith.constant 0 : index
      %16 = vector.load %arg6[%c0_14, %c0_15] : memref<1x32xf32, #tpu.memory_space<vmem>>, vector<1x32xf32>
      %17 = vector.broadcast %16 : vector<1x32xf32> to vector<162x32xf32>
      %18 = arith.addf %15, %17 : vector<162x32xf32>
      %cst_16 = arith.constant 0.000000e+00 : f32
      %19 = vector.broadcast %cst_16 : f32 to vector<162x32xf32>
      %20 = arith.cmpf oge, %18, %19 : vector<162x32xf32>
      %cst_17 = arith.constant 2.000000e-01 : f32
      %21 = vector.broadcast %cst_17 : f32 to vector<162x32xf32>
      %22 = arith.mulf %21, %18 : vector<162x32xf32>
      %23 = arith.select %20, %18, %22 : vector<162x32xi1>, vector<162x32xf32>
      %24 = arith.truncf %23 : vector<162x32xf32> to vector<162x32xbf16>
      %c0_18 = arith.constant 0 : index
      %c0_19 = arith.constant 0 : index
      %25 = vector.load %arg7[%c0_18, %c0_19] : memref<162x32xbf16, #tpu.memory_space<vmem>>, vector<162x32xbf16>
      tpu.vector_store %arg7[%c0_18, %c0_19], %24 {strides = array<i32>} : memref<162x32xbf16, #tpu.memory_space<vmem>>, vector<162x32xbf16>,
    } else {
    }
    return
  }
  func.func @transform_0(%arg0: i32, %arg1: i32, %arg2: i32) -> (i32, i32) {
    %c0_i32 = arith.constant 0 : i32
    return %arg0, %arg2 : i32, i32
  }
  func.func @transform_1(%arg0: i32, %arg1: i32, %arg2: i32) -> (i32, i32) {
    %c0_i32 = arith.constant 0 : i32
    return %arg2, %arg1 : i32, i32
  }
  func.func @transform_2(%arg0: i32, %arg1: i32, %arg2: i32) -> (i32, i32) {
    %c0_i32 = arith.constant 0 : i32
    %c0_i32_0 = arith.constant 0 : i32
    return %c0_i32, %arg1 : i32, i32
  }
  func.func @transform_3(%arg0: i32, %arg1: i32, %arg2: i32) -> (i32, i32) {
    %c0_i32 = arith.constant 0 : i32
    %c0_i32_0 = arith.constant 0 : i32
    return %c0_i32, %arg1 : i32, i32
  }
  func.func @transform_4(%arg0: i32, %arg1: i32, %arg2: i32) -> (i32, i32) {
    %c0_i32 = arith.constant 0 : i32
    return %arg0, %arg1 : i32, i32
  }
}

module attributes {stable_mosaic.version = 11 : i64} {
  func.func @_matmul_fused_kernel(%arg0: i32, %arg1: i32, %arg2: i32, %arg3: memref<578x32xbf16, #tpu.memory_space<vmem>>, %arg4: memref<32x12xbf16, #tpu.memory_space<vmem>>, %arg5: memref<1x12xf32, #tpu.memory_space<vmem>>, %arg6: memref<1x12xf32, #tpu.memory_space<vmem>>, %arg7: memref<578x12xf32, #tpu.memory_space<vmem>>, %arg8: memref<578x12xf32, #tpu.memory_space<vmem>>) attributes {dimension_semantics = [#tpu.dimension_semantics<parallel>, #tpu.dimension_semantics<parallel>, #tpu.dimension_semantics<arbitrary>], iteration_bounds = array<i64: 1, 1, 1>, scalar_prefetch = 0 : i64, scratch_operands = 1 : i64, tpu.core_type = #tpu.core_type<tc>, window_params = [{transform_indices = @transform_0, window_bounds = array<i64: 578, 32>}, {transform_indices = @transform_1, window_bounds = array<i64: 32, 12>}, {transform_indices = @transform_2, window_bounds = array<i64: 1, 12>}, {transform_indices = @transform_3, window_bounds = array<i64: 1, 12>}, {transform_indices = @transform_4, window_bounds = array<i64: 578, 12>}]} {
    %c0_i32 = arith.constant 0 : i32
    %0 = arith.cmpi eq, %arg2, %c0_i32 : i32
    %1 = arith.extui %0 : i1 to i32
    %c0_i32_0 = arith.constant 0 : i32
    %2 = arith.cmpi ne, %1, %c0_i32_0 : i32
    scf.if %2 {
      %cst_10 = arith.constant 0.000000e+00 : f32
      %12 = vector.broadcast %cst_10 : f32 to vector<578x12xf32>
      %c0_11 = arith.constant 0 : index
      %c0_12 = arith.constant 0 : index
      %13 = vector.load %arg8[%c0_11, %c0_12] : memref<578x12xf32, #tpu.memory_space<vmem>>, vector<578x12xf32>
      tpu.vector_store %arg8[%c0_11, %c0_12], %12 {strides = array<i32>} : memref<578x12xf32, #tpu.memory_space<vmem>>, vector<578x12xf32>,
    } else {
    }
    %c0 = arith.constant 0 : index
    %c0_1 = arith.constant 0 : index
    %3 = vector.load %arg8[%c0, %c0_1] : memref<578x12xf32, #tpu.memory_space<vmem>>, vector<578x12xf32>
    %c0_2 = arith.constant 0 : index
    %c0_3 = arith.constant 0 : index
    %4 = vector.load %arg3[%c0_2, %c0_3] : memref<578x32xbf16, #tpu.memory_space<vmem>>, vector<578x32xbf16>
    %c0_4 = arith.constant 0 : index
    %c0_5 = arith.constant 0 : index
    %5 = vector.load %arg4[%c0_4, %c0_5] : memref<32x12xbf16, #tpu.memory_space<vmem>>, vector<32x12xbf16>
    %cst = arith.constant dense<0.000000e+00> : vector<578x12xf32>
    %6 = tpu.matmul %4, %5, %cst {dimension_numbers = #tpu.dot_dimension_numbers<[1], [0], [0], [1], [0, 0, 1, 1], [], []>} : vector<578x32xbf16>, vector<32x12xbf16>, vector<578x12xf32> -> vector<578x12xf32>
    %7 = arith.addf %3, %6 : vector<578x12xf32>
    %c0_6 = arith.constant 0 : index
    %c0_7 = arith.constant 0 : index
    %8 = vector.load %arg8[%c0_6, %c0_7] : memref<578x12xf32, #tpu.memory_space<vmem>>, vector<578x12xf32>
    tpu.vector_store %arg8[%c0_6, %c0_7], %7 {strides = array<i32>} : memref<578x12xf32, #tpu.memory_space<vmem>>, vector<578x12xf32>,
    %c0_i32_8 = arith.constant 0 : i32
    %9 = arith.cmpi eq, %arg2, %c0_i32_8 : i32
    %10 = arith.extui %9 : i1 to i32
    %c0_i32_9 = arith.constant 0 : i32
    %11 = arith.cmpi ne, %10, %c0_i32_9 : i32
    scf.if %11 {
      %c0_10 = arith.constant 0 : index
      %c0_11 = arith.constant 0 : index
      %12 = vector.load %arg8[%c0_10, %c0_11] : memref<578x12xf32, #tpu.memory_space<vmem>>, vector<578x12xf32>
      %c0_12 = arith.constant 0 : index
      %c0_13 = arith.constant 0 : index
      %13 = vector.load %arg5[%c0_12, %c0_13] : memref<1x12xf32, #tpu.memory_space<vmem>>, vector<1x12xf32>
      %14 = vector.broadcast %13 : vector<1x12xf32> to vector<578x12xf32>
      %15 = arith.mulf %12, %14 : vector<578x12xf32>
      %c0_14 = arith.constant 0 : index
      %c0_15 = arith.constant 0 : index
      %16 = vector.load %arg6[%c0_14, %c0_15] : memref<1x12xf32, #tpu.memory_space<vmem>>, vector<1x12xf32>
      %17 = vector.broadcast %16 : vector<1x12xf32> to vector<578x12xf32>
      %18 = arith.addf %15, %17 : vector<578x12xf32>
      %19 = math.tanh %18 : vector<578x12xf32>
      %c0_16 = arith.constant 0 : index
      %c0_17 = arith.constant 0 : index
      %20 = vector.load %arg7[%c0_16, %c0_17] : memref<578x12xf32, #tpu.memory_space<vmem>>, vector<578x12xf32>
      tpu.vector_store %arg7[%c0_16, %c0_17], %19 {strides = array<i32>} : memref<578x12xf32, #tpu.memory_space<vmem>>, vector<578x12xf32>,
    } else {
    }
    return
  }
  func.func @transform_0(%arg0: i32, %arg1: i32, %arg2: i32) -> (i32, i32) {
    %c0_i32 = arith.constant 0 : i32
    return %arg0, %arg2 : i32, i32
  }
  func.func @transform_1(%arg0: i32, %arg1: i32, %arg2: i32) -> (i32, i32) {
    %c0_i32 = arith.constant 0 : i32
    return %arg2, %arg1 : i32, i32
  }
  func.func @transform_2(%arg0: i32, %arg1: i32, %arg2: i32) -> (i32, i32) {
    %c0_i32 = arith.constant 0 : i32
    %c0_i32_0 = arith.constant 0 : i32
    return %c0_i32, %arg1 : i32, i32
  }
  func.func @transform_3(%arg0: i32, %arg1: i32, %arg2: i32) -> (i32, i32) {
    %c0_i32 = arith.constant 0 : i32
    %c0_i32_0 = arith.constant 0 : i32
    return %c0_i32, %arg1 : i32, i32
  }
  func.func @transform_4(%arg0: i32, %arg1: i32, %arg2: i32) -> (i32, i32) {
    %c0_i32 = arith.constant 0 : i32
    return %arg0, %arg1 : i32, i32
  }
}

</mosaic_0001>

<bundles_post_ra>
// kernel: _lambda_.8
= control target key start
LH: loop header
LB: loop body
LE: loop exit
PB: predicated region body
PF: predicated region fallthrough
CT: control target
= control target key end

     0   :  { %s1546_s15 = smov 0   ;;  %s1548_s16 = smov 0   ;;  %s1885_s0 = inlined_call_operand.vmem [shape: bf16[512,48], index: 0, kind: input, shape index: {}]   ;;  %s1886_s1 = inlined_call_operand.vmem [shape: bf16[48,8], index: 1, kind: input, shape index: {}]   ;;  %s1887_s2 = inlined_call_operand.vmem [shape: f32[1,8], index: 2, kind: input, shape index: {}]   ;;  %s1888_s3 = inlined_call_operand.vmem [shape: f32[1,8], index: 3, kind: input, shape index: {}]   ;;  %s1889_s4 = inlined_call_operand.vmem [shape: bf16[512,8], index: 4, kind: output, shape index: {}]  }
   0x1   :  { %s1550_s17 = smov 0  }
   0x2 LB: > { %s33_s18 = sadd.s32 1, %s1514_s16  ;;  %p1281_p0 = scmp.ge.s32.totalorder %s1518_s17, 1  ;;  %s1518_s17 = sphi %s1550_s17, %s14_s17   ;;  %s1514_s16 = sphi %s1548_s16, %s1891_s16   ;;  %s1510_s15 = sphi %s1546_s15, %s1890_s15  }
   0x3   : > { %p35_p1 = scmp.ge.s32.totalorder %s33_s18, 2  ;;  %p221_p2 = scmp.lt.s32.totalorder %s1518_s17, 3 }
   0x5   : > { %s1893_s18 = smov (%p35_p1, %s33_s18), 0  ;;  %p222_p3 = pnand %p1281_p0, %p221_p2 }
   0x6   : > { %v1477_v0 = vld [vmem:[%s1886_s1] sm:$0xff] (!%p222_p3)   ;;  %s1282_s21 = sshll.u32 (!%p222_p3), %s1510_s15, 5  ;;  %v1478_v1 = vld [vmem:[%s1886_s1 + $0x8] sm:$0xff] (!%p222_p3)   ;;  %vm305_vm0 = vcmask (!%p222_p3), 64512   ;;  %v1479_v2 = vld [vmem:[%s1886_s1 + $0x10] sm:$0xff] (!%p222_p3)   ;;  %v1520_v3 = vmov (!%p222_p3), 0.0  }
   0x7   : > { %225 = sbr.rel (%p222_p3) target bundleno = 304 (0x130), region = 36  ;;  %p268_p4 = scmp.lt.s32.totalorder (!%p222_p3), %s1282_s21, 63  ;;  %1408 = vmatprep.subr.bf16.mxu0 (!%p222_p3), %v1477_v0  ;;  %1446 = vmatprep.subr.bf16.mxu1 (!%p222_p3), %v1477_v0  ;;  %308 = vst.msk [vmem:[#allocation2 + $0x10] sm:$0xff] (!%p222_p3), %vm305_vm0, %v1520_v3  ;;  %306 = vst.msk [vmem:[#allocation2] sm:$0xff] (!%p222_p3), %vm305_vm0, %v1520_v3  ;;  %vm506_vm1 = vcmask (!%p222_p3), 392192   ;;  %vm1118_vm2 = vcmask (!%p222_p3), 60416  }
   0x8   : > { %1409 = vmatpush3.bf16.msra.mxu0 (!%p222_p3), %v1477_v0  ;;  %1449 = vmatpush3.bf16.msra.mxu1 (!%p222_p3), %v1477_v0  ;;  %307 = vst.msk [vmem:[#allocation2 + $0x8] sm:$0xff] (!%p222_p3), %vm305_vm0, %v1520_v3  ;;  %309 = vst.msk [vmem:[#allocation2 + $0x18] sm:$0xff] (!%p222_p3), %vm305_vm0, %v1520_v3  ;;  %v1658_v48 = vld [vmem:[%s1887_s2] ss:$0 sm:$0xff] (!%p222_p3) }
   0x9   : > { %1410 = vmatprep.subr.bf16.mxu0 (!%p222_p3), %v1478_v1  ;;  %1447 = vmatprep.subr.bf16.mxu1 (!%p222_p3), %v1478_v1  ;;  %310 = vst.msk [vmem:[#allocation2 + $0x20] sm:$0xff] (!%p222_p3), %vm305_vm0, %v1520_v3  ;;  %311 = vst.msk [vmem:[#allocation2 + $0x28] sm:$0xff] (!%p222_p3), %vm305_vm0, %v1520_v3  ;;  %v1663_v53 = vld [vmem:[%s1888_s3] ss:$0 sm:$0xff] (!%p222_p3) }
   0xa   : > { %312 = vst.msk [vmem:[#allocation2 + $0x30] sm:$0xff] (!%p222_p3), %vm305_vm0, %v1520_v3  ;;  %313 = vst.msk [vmem:[#allocation2 + $0x38] sm:$0xff] (!%p222_p3), %vm305_vm0, %v1520_v3 }
   0xb   : > { %314 = vst.msk [vmem:[#allocation2 + $0x40] sm:$0xff] (!%p222_p3), %vm305_vm0, %v1520_v3  ;;  %315 = vst.msk [vmem:[#allocation2 + $0x48] sm:$0xff] (!%p222_p3), %vm305_vm0, %v1520_v3 }
   0xc   : > { %316 = vst.msk [vmem:[#allocation2 + $0x50] sm:$0xff] (!%p222_p3), %vm305_vm0, %v1520_v3  ;;  %317 = vst.msk [vmem:[#allocation2 + $0x58] sm:$0xff] (!%p222_p3), %vm305_vm0, %v1520_v3  ;;  %1411 = vmatpush3.bf16.msra.mxu0 (!%p222_p3), %v1478_v1  ;;  %1450 = vmatpush3.bf16.msra.mxu1 (!%p222_p3), %v1478_v1 }
   0xd   : > { %318 = vst.msk [vmem:[#allocation2 + $0x60] sm:$0xff] (!%p222_p3), %vm305_vm0, %v1520_v3  ;;  %319 = vst.msk [vmem:[#allocation2 + $0x68] sm:$0xff] (!%p222_p3), %vm305_vm0, %v1520_v3  ;;  %1412 = vmatprep.subr.bf16.mxu0 (!%p222_p3), %v1479_v2  ;;  %1448 = vmatprep.subr.bf16.mxu1 (!%p222_p3), %v1479_v2 }
   0xe   : > { %s1895_s21 = smov (!%p268_p4, %s1282_s21), 63  ;;  %320 = vst.msk [vmem:[#allocation2 + $0x70] sm:$0xff] %vm305_vm0, %v1520_v3  ;;  %321 = vst.msk [vmem:[#allocation2 + $0x78] sm:$0xff] %vm305_vm0, %v1520_v3  ;;  %v340_v20 = vld [vmem:[#allocation2 + $0x10] sm:$0xff]  ;;  %v338_v22 = vld [vmem:[#allocation2] sm:$0xff] }
   0xf   : > { %322 = vst.msk [vmem:[#allocation2 + $0x80] sm:$0xff] %vm305_vm0, %v1520_v3  ;;  %323 = vst.msk [vmem:[#allocation2 + $0x88] sm:$0xff] %vm305_vm0, %v1520_v3  ;;  %s1283_s26 = sshll.u32 %s1895_s21, 2  ;;  %v341_v26 = vld [vmem:[#allocation2 + $0x18] sm:$0xff]  ;;  %v339_v32 = vld [vmem:[#allocation2 + $0x8] sm:$0xff] }
  0x10   : > { %324 = vst.msk [vmem:[#allocation2 + $0x90] sm:$0xff] %vm305_vm0, %v1520_v3  ;;  %325 = vst.msk [vmem:[#allocation2 + $0x98] sm:$0xff] %vm305_vm0, %v1520_v3  ;;  %s1613_s29 = scalar_lea.vmem %s1885_s0, %s1283_s26  ;;  %1413 = vmatpush3.bf16.msra.mxu0 %v1479_v2  ;;  %1451 = vmatpush3.bf16.msra.mxu1 %v1479_v2  ;;  %v342_v46 = vld [vmem:[#allocation2 + $0x20] sm:$0xff]  ;;  %v343_v58 = vld [vmem:[#allocation2 + $0x28] sm:$0xff]  ;;  %s1690_s10 = scalar_lea.vmem %s1889_s4, %s1283_s26 }
  0x11   : > { %326 = vst.msk [vmem:[#allocation2 + $0xa0] sm:$0xff] %vm305_vm0, %v1520_v3  ;;  %327 = vst.msk [vmem:[#allocation2 + $0xa8] sm:$0xff] %vm305_vm0, %v1520_v3  ;;  %v1480_v4 = vld [vmem:[%s1613_s29] sm:$0xff]   ;;  %v1482_v6 = vld [vmem:[%s1613_s29 + $0x8] sm:$0xff]  }
  0x12   : > { %328 = vst.msk [vmem:[#allocation2 + $0xb0] sm:$0xff] %vm305_vm0, %v1520_v3  ;;  %329 = vst.msk [vmem:[#allocation2 + $0xb8] sm:$0xff] %vm305_vm0, %v1520_v3  ;;  %v1481_v5 = vld [vmem:[%s1613_s29 + $0x40] sm:$0xff]   ;;  %1414 = vmatprep.mubr.msk.bf16.mxu0 %vm506_vm1, %v1480_v4  ;;  %v1483_v7 = vld [vmem:[%s1613_s29 + $0x48] sm:$0xff]  }
  0x13   : > { %330 = vst.msk [vmem:[#allocation2 + $0xc0] sm:$0xff] %vm305_vm0, %v1520_v3  ;;  %331 = vst.msk [vmem:[#allocation2 + $0xc8] sm:$0xff] %vm305_vm0, %v1520_v3  ;;  %1430 = vmatprep.mubr.msk.bf16.mxu1 %vm506_vm1, %v1481_v5  ;;  %v1484_v8 = vld [vmem:[%s1613_s29 + $0x10] sm:$0xff]   ;;  %1415 = vmatmul.mubr.msk.bf16.vlgmr.msra.gmra.mrb[0].mxu0 %vm506_vm1, %v1482_v6  ;;  %v1486_v10 = vld [vmem:[%s1613_s29 + $0x18] sm:$0xff]  }
  0x14   : > { %332 = vst.msk [vmem:[#allocation2 + $0xd0] sm:$0xff] %vm305_vm0, %v1520_v3  ;;  %333 = vst.msk [vmem:[#allocation2 + $0xd8] sm:$0xff] %vm305_vm0, %v1520_v3  ;;  %v1485_v9 = vld [vmem:[%s1613_s29 + $0x50] sm:$0xff]   ;;  %1431 = vmatmul.mubr.msk.bf16.vlgmr.msra.gmra.mrb[0].mxu1 %vm506_vm1, %v1483_v7  ;;  %1418 = vmatprep.mubr.msk.bf16.mxu0 %vm506_vm1, %v1484_v8  ;;  %v1487_v11 = vld [vmem:[%s1613_s29 + $0x58] sm:$0xff]  }
  0x15   : > { %334 = vst.msk [vmem:[#allocation2 + $0xe0] sm:$0xff] %vm305_vm0, %v1520_v3  ;;  %335 = vst.msk [vmem:[#allocation2 + $0xe8] sm:$0xff] %vm305_vm0, %v1520_v3  ;;  %1434 = vmatprep.mubr.msk.bf16.mxu1 %vm506_vm1, %v1485_v9  ;;  %v1488_v12 = vld [vmem:[%s1613_s29 + $0x20] sm:$0xff]   ;;  %v1490_v14 = vld [vmem:[%s1613_s29 + $0x28] sm:$0xff]  }
  0x16   : > { %336 = vst.msk [vmem:[#allocation2 + $0xf0] sm:$0xff] %vm305_vm0, %v1520_v3  ;;  %337 = vst.msk [vmem:[#allocation2 + $0xf8] sm:$0xff] %vm305_vm0, %v1520_v3  ;;  %v1489_v13 = vld [vmem:[%s1613_s29 + $0x60] sm:$0xff]   ;;  %v1491_v15 = vld [vmem:[%s1613_s29 + $0x68] sm:$0xff]  }
  0x17   : > { %v1492_v16 = vld [vmem:[%s1613_s29 + $0x30] sm:$0xff]   ;;  %v1494_v18 = vld [vmem:[%s1613_s29 + $0x38] sm:$0xff]   ;;  %v354_v23 = vld [vmem:[#allocation2 + $0x80] sm:$0xff] }
  0x18   : > { %v1493_v17 = vld [vmem:[%s1613_s29 + $0x70] sm:$0xff]   ;;  %v1495_v19 = vld [vmem:[%s1613_s29 + $0x78] sm:$0xff]   ;;  %v355_v33 = vld [vmem:[#allocation2 + $0x88] sm:$0xff] }
  0x19   : > { %v356_v21 = vld [vmem:[#allocation2 + $0x90] sm:$0xff]  ;;  %v357_v27 = vld [vmem:[#allocation2 + $0x98] sm:$0xff]  ;;  %v358_v47 = vld [vmem:[#allocation2 + $0xa0] sm:$0xff] }
  0x1a   : > { %v344_v44 = vld [vmem:[#allocation2 + $0x30] sm:$0xff]  ;;  %v345_v51 = vld [vmem:[#allocation2 + $0x38] sm:$0xff]  ;;  %v359_v59 = vld [vmem:[#allocation2 + $0xa8] sm:$0xff] }
  0x1b   : > { %1419 = vmatmul.mubr.msk.bf16.gmra.mrb[4].mxu0 %vm506_vm1, %v1486_v10  ;;  %v360_v45 = vld [vmem:[#allocation2 + $0xb0] sm:$0xff]  ;;  %v361_v52 = vld [vmem:[#allocation2 + $0xb8] sm:$0xff] }
  0x1c   : > { %1435 = vmatmul.mubr.msk.bf16.gmra.mrb[4].mxu1 %vm506_vm1, %v1487_v11  ;;  %1422 = vmatprep.mubr.msk.bf16.mxu0 %vm506_vm1, %v1488_v12 }
  0x1d   : > { %1438 = vmatprep.mubr.msk.bf16.mxu1 %vm506_vm1, %v1489_v13 }
  0x23   : > { %1423 = vmatmul.mubr.msk.bf16.gmra.mrb[8].mxu0 %vm506_vm1, %v1490_v14 }
  0x24   : > { %1439 = vmatmul.mubr.msk.bf16.gmra.mrb[8].mxu1 %vm506_vm1, %v1491_v15  ;;  %1426 = vmatprep.mubr.msk.bf16.mxu0 %vm506_vm1, %v1492_v16 }
  0x25   : > { %1442 = vmatprep.mubr.msk.bf16.mxu1 %vm506_vm1, %v1493_v17 }
  0x2b   : > { %1427 = vmatmul.mubr.msk.bf16.gmra.mrb[12].mxu0 %vm506_vm1, %v1494_v18 }
  0x2c   : > { %1443 = vmatmul.mubr.msk.bf16.gmra.mrb[12].mxu1 %vm506_vm1, %v1495_v19 }
  0xe6   : > { %v1416_v24 = vpop.f32.mrb[0].mxu0 }
  0xe7   : > { %v1432_v25 = vpop.f32.mrb[0].mxu1  ;;  %v718_v28 = vadd.f32 %v1416_v24, %v340_v20  ;;  %v589_v30 = vpop.f32.mrb[1].mxu0 }
  0xe8   : > { %v734_v29 = vadd.f32 %v1432_v25, %v356_v21  ;;  %v653_v31 = vpop.f32.mrb[1].mxu1  ;;  %v716_v34 = vadd.f32 %v589_v30, %v338_v22  ;;  %v1417_v36 = vpop.f32.mrb[2].mxu0 }
  0xe9   : > { %v732_v35 = vadd.f32 %v653_v31, %v354_v23  ;;  %v1433_v37 = vpop.f32.mrb[2].mxu1  ;;  %751 = vst.msk [vmem:[#allocation2 + $0x10] sm:$0xff] %vm305_vm0, %v718_v28  ;;  %v719_v38 = vadd.f32 %v1417_v36, %v341_v26  ;;  %v592_v40 = vpop.f32.mrb[3].mxu0 }
  0xea   : > { %767 = vst.msk [vmem:[#allocation2 + $0x90] sm:$0xff] %vm305_vm0, %v734_v29  ;;  %v735_v39 = vadd.f32 %v1433_v37, %v357_v27  ;;  %v656_v41 = vpop.f32.mrb[3].mxu1  ;;  %749 = vst.msk [vmem:[#allocation2] sm:$0xff] %vm305_vm0, %v716_v34  ;;  %v717_v42 = vadd.f32 %v592_v40, %v339_v32 }
  0xeb   : > { %765 = vst.msk [vmem:[#allocation2 + $0x80] sm:$0xff] %vm305_vm0, %v732_v35  ;;  %v733_v43 = vadd.f32 %v656_v41, %v355_v33  ;;  %752 = vst.msk [vmem:[#allocation2 + $0x18] sm:$0xff] %vm305_vm0, %v719_v38 }
  0xec   : > { %768 = vst.msk [vmem:[#allocation2 + $0x98] sm:$0xff] %vm305_vm0, %v735_v39  ;;  %750 = vst.msk [vmem:[#allocation2 + $0x8] sm:$0xff] %vm305_vm0, %v717_v42 }
  0xed   : > { %766 = vst.msk [vmem:[#allocation2 + $0x88] sm:$0xff] %vm305_vm0, %v733_v43 }
  0xee   : > { %v1420_v49 = vpop.f32.mrb[4].mxu0 }
  0xef   : > { %v1436_v50 = vpop.f32.mrb[4].mxu1  ;;  %v722_v54 = vadd.f32 %v1420_v49, %v344_v44  ;;  %v605_v56 = vpop.f32.mrb[5].mxu0 }
  0xf0   : > { %v738_v55 = vadd.f32 %v1436_v50, %v360_v45  ;;  %v669_v57 = vpop.f32.mrb[5].mxu1  ;;  %v786_v60 = vld [vmem:[#allocation2 + $0x10] sm:$0xff]  ;;  %v720_v62 = vadd.f32 %v605_v56, %v342_v46  ;;  %v1421_v0 = vpop.f32.mrb[6].mxu0 }
  0xf1   : > { %v802_v61 = vld [vmem:[#allocation2 + $0x90] sm:$0xff]  ;;  %v736_v63 = vadd.f32 %v669_v57, %v358_v47  ;;  %v1437_v1 = vpop.f32.mrb[6].mxu1  ;;  %v825_v2 = vmul.f32 %v1658_v48, %v786_v60  ;;  %v784_v4 = vld [vmem:[#allocation2] sm:$0xff]  ;;  %755 = vst.msk [vmem:[#allocation2 + $0x30] sm:$0xff] %vm305_vm0, %v722_v54  ;;  %v723_v6 = vadd.f32 %v1421_v0, %v345_v51  ;;  %v608_v8 = vpop.f32.mrb[7].mxu0 }
  0xf2   : > { %v841_v3 = vmul.f32 %v1658_v48, %v802_v61  ;;  %v800_v5 = vld [vmem:[#allocation2 + $0x80] sm:$0xff]  ;;  %771 = vst.msk [vmem:[#allocation2 + $0xb0] sm:$0xff] %vm305_vm0, %v738_v55  ;;  %v739_v7 = vadd.f32 %v1437_v1, %v361_v52  ;;  %v672_v9 = vpop.f32.mrb[7].mxu1  ;;  %v823_v10 = vmul.f32 %v1658_v48, %v784_v4  ;;  %v787_v12 = vld [vmem:[#allocation2 + $0x18] sm:$0xff]  ;;  %753 = vst.msk [vmem:[#allocation2 + $0x20] sm:$0xff] %vm305_vm0, %v720_v62 }
  0xf3   : > { %v839_v11 = vmul.f32 %v1658_v48, %v800_v5  ;;  %v803_v13 = vld [vmem:[#allocation2 + $0x98] sm:$0xff]  ;;  %769 = vst.msk [vmem:[#allocation2 + $0xa0] sm:$0xff] %vm305_vm0, %v736_v63  ;;  %v721_v14 = vadd.f32 %v608_v8, %v343_v58  ;;  %v737_v15 = vadd.f32 %v672_v9, %v359_v59  ;;  %v864_v16 = vadd.f32 %v1663_v53, %v825_v2  ;;  %v785_v20 = vld [vmem:[#allocation2 + $0x8] sm:$0xff] }
  0xf4   : > { %v880_v17 = vadd.f32 %v1663_v53, %v841_v3  ;;  %v826_v18 = vmul.f32 %v1658_v48, %v787_v12  ;;  %v842_v19 = vmul.f32 %v1658_v48, %v803_v13  ;;  %v801_v21 = vld [vmem:[#allocation2 + $0x88] sm:$0xff]  ;;  %756 = vst.msk [vmem:[#allocation2 + $0x38] sm:$0xff] %vm305_vm0, %v723_v6  ;;  %772 = vst.msk [vmem:[#allocation2 + $0xb8] sm:$0xff] %vm305_vm0, %v739_v7 }
  0xf5   : > { %v862_v22 = vadd.f32 %v1663_v53, %v823_v10  ;;  %v878_v23 = vadd.f32 %v1663_v53, %v839_v11  ;;  %v824_v24 = vmul.f32 %v1658_v48, %v785_v20  ;;  %v840_v25 = vmul.f32 %v1658_v48, %v801_v21  ;;  %754 = vst.msk [vmem:[#allocation2 + $0x28] sm:$0xff] %vm305_vm0, %v721_v14 }
  0xf6   : > { %770 = vst.msk [vmem:[#allocation2 + $0xa8] sm:$0xff] %vm305_vm0, %v737_v15  ;;  %vm896_vm3 = vcmp.ge.f32.partialorder %v864_v16, 0.0  ;;  %v928_v26 = vmul.f32 0.2, %v864_v16  ;;  %vm912_vm4 = vcmp.ge.f32.partialorder %v880_v17, 0.0  ;;  %v865_v32 = vadd.f32 %v1663_v53, %v826_v18  ;;  %v1694_v34 = vpop.f32.mrb[8].mxu0 }
  0xf7   : > { %v944_v27 = vmul.f32 0.2, %v880_v17  ;;  %vm894_vm5 = vcmp.ge.f32.partialorder %v862_v22, 0.0  ;;  %v926_v28 = vmul.f32 0.2, %v862_v22  ;;  %vm910_vm6 = vcmp.ge.f32.partialorder %v878_v23, 0.0 }
  0xf8   : > { %v942_v29 = vmul.f32 0.2, %v878_v23  ;;  %v960_v30 = vsel %vm896_vm3, %v864_v16, %v928_v26  ;;  %v881_v33 = vadd.f32 %v1663_v53, %v842_v19  ;;  %v1696_v35 = vpop.f32.mrb[8].mxu1  ;;  %v790_v40 = vld [vmem:[#allocation2 + $0x30] sm:$0xff]  ;;  %v1698_v42 = vpop.f32.mrb[9].mxu0  ;;  %vm897_vm7 = vcmp.ge.f32.partialorder %v865_v32, 0.0 }
  0xf9   : > { %v976_v31 = vsel %vm912_vm4, %v880_v17, %v944_v27  ;;  %v1359_v36 = vpack.c.bf16 %v960_v30, %v960_v30  ;;  %v958_v38 = vsel %vm894_vm5, %v862_v22, %v926_v28  ;;  %v806_v41 = vld [vmem:[#allocation2 + $0xb0] sm:$0xff]  ;;  %v1700_v43 = vpop.f32.mrb[9].mxu1  ;;  %v929_v46 = vmul.f32 0.2, %v865_v32  ;;  %v788_v47 = vld [vmem:[#allocation2 + $0x20] sm:$0xff]  ;;  %v1702_v49 = vpop.f32.mrb[10].mxu0 }
  0xfa   : > { %v1375_v37 = vpack.c.bf16 %v976_v31, %v976_v31  ;;  %v974_v39 = vsel %vm910_vm6, %v878_v23, %v942_v29  ;;  %v1357_v44 = vpack.c.bf16 %v958_v38, %v958_v38  ;;  %vm913_vm8 = vcmp.ge.f32.partialorder %v881_v33, 0.0  ;;  %v1710_v54 = vpop.f32.mrb[10].mxu1  ;;  %v804_v59 = vld [vmem:[#allocation2 + $0xa0] sm:$0xff]  ;;  %v1719_v60 = vpop.f32.mrb[11].mxu0 }
  0xfb   : > { %v1373_v45 = vpack.c.bf16 %v974_v39, %v974_v39  ;;  %1121 = vst.msk [vmem:[%s1690_s10 + $0x8] sm:$0xf] %vm1118_vm2, %v1359_v36  ;;  %v945_v50 = vmul.f32 0.2, %v881_v33  ;;  %v863_v51 = vadd.f32 %v1663_v53, %v824_v24  ;;  %v879_v52 = vadd.f32 %v1663_v53, %v840_v25  ;;  %v1721_v61 = vpop.f32.mrb[11].mxu1  ;;  %v791_v8 = vld [vmem:[#allocation2 + $0x38] sm:$0xff] }
  0xfc   : > { %1137 = vst.msk [vmem:[%s1690_s10 + $0x48] sm:$0xf] %vm1118_vm2, %v1375_v37  ;;  %1119 = vst.msk [vmem:[%s1690_s10] sm:$0xf] %vm1118_vm2, %v1357_v44  ;;  %v961_v55 = vsel %vm897_vm7, %v865_v32, %v929_v46  ;;  %v829_v56 = vmul.f32 %v1658_v48, %v790_v40  ;;  %v845_v57 = vmul.f32 %v1658_v48, %v806_v41  ;;  %v807_v9 = vld [vmem:[#allocation2 + $0xb8] sm:$0xff]  ;;  %v789_v15 = vld [vmem:[#allocation2 + $0x28] sm:$0xff] }
  0xfd   : > { %1135 = vst.msk [vmem:[%s1690_s10 + $0x40] sm:$0xf] %vm1118_vm2, %v1373_v45  ;;  %v827_v58 = vmul.f32 %v1658_v48, %v788_v47  ;;  %v1360_v62 = vpack.c.bf16 %v961_v55, %v961_v55  ;;  %v977_v63 = vsel %vm913_vm8, %v881_v33, %v945_v50  ;;  %vm895_vm9 = vcmp.ge.f32.partialorder %v863_v51, 0.0  ;;  %v805_v32 = vld [vmem:[#allocation2 + $0xa8] sm:$0xff]  ;;  %v348_v33 = vld [vmem:[#allocation2 + $0x50] sm:$0xff]  ;;  %v362_v55 = vld [vmem:[#allocation2 + $0xc0] sm:$0xff] }
  0xfe   : > { %v927_v0 = vmul.f32 0.2, %v863_v51  ;;  %v1376_v1 = vpack.c.bf16 %v977_v63, %v977_v63  ;;  %vm911_vm10 = vcmp.ge.f32.partialorder %v879_v52, 0.0  ;;  %v943_v2 = vmul.f32 0.2, %v879_v52  ;;  %v1729_v10 = vpop.f32.mrb[12].mxu0 }
  0xff   : > { %v868_v3 = vadd.f32 %v1663_v53, %v829_v56  ;;  %1122 = vst.msk [vmem:[%s1690_s10 + $0xc] sm:$0xf] %vm1118_vm2, %v1360_v62  ;;  %v884_v5 = vadd.f32 %v1663_v53, %v845_v57  ;;  %v866_v6 = vadd.f32 %v1663_v53, %v827_v58  ;;  %v843_v7 = vmul.f32 %v1658_v48, %v804_v59  ;;  %v1731_v11 = vpop.f32.mrb[12].mxu1  ;;  %v1735_v16 = vpop.f32.mrb[13].mxu0  ;;  %v364_v36 = vld [vmem:[#allocation2 + $0xd0] sm:$0xff]  ;;  %v349_v56 = vld [vmem:[#allocation2 + $0x58] sm:$0xff] }
 0x100   : > { %v959_v4 = vsel %vm895_vm9, %v863_v51, %v927_v0  ;;  %1138 = vst.msk [vmem:[%s1690_s10 + $0x4c] sm:$0xf] %vm1118_vm2, %v1376_v1  ;;  %v975_v13 = vsel %vm911_vm10, %v879_v52, %v943_v2  ;;  %v1737_v17 = vpop.f32.mrb[13].mxu1  ;;  %v1739_v20 = vpop.f32.mrb[14].mxu0  ;;  %v830_v25 = vmul.f32 %v1658_v48, %v791_v8  ;;  %v846_v30 = vmul.f32 %v1658_v48, %v807_v9  ;;  %v346_v52 = vld [vmem:[#allocation2 + $0x40] sm:$0xff]  ;;  %v365_v59 = vld [vmem:[#allocation2 + $0xd8] sm:$0xff] }
 0x101   : > { %v1358_v12 = vpack.c.bf16 %v959_v4, %v959_v4  ;;  %vm900_vm11 = vcmp.ge.f32.partialorder %v868_v3, 0.0  ;;  %v932_v14 = vmul.f32 0.2, %v868_v3  ;;  %v1374_v18 = vpack.c.bf16 %v975_v13, %v975_v13  ;;  %v1741_v21 = vpop.f32.mrb[14].mxu1  ;;  %v1747_v26 = vpop.f32.mrb[15].mxu0  ;;  %v363_v4 = vld [vmem:[#allocation2 + $0xc8] sm:$0xff] }
 0x102   : > { %vm916_vm12 = vcmp.ge.f32.partialorder %v884_v5, 0.0  ;;  %v948_v19 = vmul.f32 0.2, %v884_v5  ;;  %vm898_vm13 = vcmp.ge.f32.partialorder %v866_v6, 0.0  ;;  %v930_v23 = vmul.f32 0.2, %v866_v6 }
 0x103   : > { %1120 = vst.msk [vmem:[%s1690_s10 + $0x4] sm:$0xf] %vm1118_vm2, %v1358_v12  ;;  %v964_v22 = vsel %vm900_vm11, %v868_v3, %v932_v14  ;;  %v882_v24 = vadd.f32 %v1663_v53, %v843_v7  ;;  %v1749_v27 = vpop.f32.mrb[15].mxu1  ;;  %1136 = vst.msk [vmem:[%s1690_s10 + $0x44] sm:$0xf] %vm1118_vm2, %v1374_v18  ;;  %v828_v31 = vmul.f32 %v1658_v48, %v789_v15  ;;  %v350_v12 = vld [vmem:[#allocation2 + $0x60] sm:$0xff] }
 0x104   : > { %v1363_v28 = vpack.c.bf16 %v964_v22, %v964_v22  ;;  %v980_v29 = vsel %vm916_vm12, %v884_v5, %v948_v19  ;;  %v962_v38 = vsel %vm898_vm13, %v866_v6, %v930_v23  ;;  %v869_v41 = vadd.f32 %v1663_v53, %v830_v25  ;;  %v352_v5 = vld [vmem:[#allocation2 + $0x70] sm:$0xff]  ;;  %v366_v13 = vld [vmem:[#allocation2 + $0xe0] sm:$0xff]  ;;  %v353_v14 = vld [vmem:[#allocation2 + $0x78] sm:$0xff] }
 0x105   : > { %v1379_v37 = vpack.c.bf16 %v980_v29, %v980_v29  ;;  %vm914_vm14 = vcmp.ge.f32.partialorder %v882_v24, 0.0  ;;  %v946_v39 = vmul.f32 0.2, %v882_v24  ;;  %v1361_v40 = vpack.c.bf16 %v962_v38, %v962_v38  ;;  %v368_v6 = vld [vmem:[#allocation2 + $0xf0] sm:$0xff]  ;;  %v369_v18 = vld [vmem:[#allocation2 + $0xf8] sm:$0xff]  ;;  %v351_v19 = vld [vmem:[#allocation2 + $0x68] sm:$0xff] }
 0x106   : > { %1125 = vst.msk [vmem:[%s1690_s10 + $0x18] sm:$0xf] %vm1118_vm2, %v1363_v28  ;;  %v885_v44 = vadd.f32 %v1663_v53, %v846_v30  ;;  %v867_v45 = vadd.f32 %v1663_v53, %v828_v31  ;;  %v844_v47 = vmul.f32 %v1658_v48, %v805_v32  ;;  %v726_v50 = vadd.f32 %v1694_v34, %v348_v33  ;;  %v347_v34 = vld [vmem:[#allocation2 + $0x48] sm:$0xff] }
 0x107   : > { %1141 = vst.msk [vmem:[%s1690_s10 + $0x58] sm:$0xf] %vm1118_vm2, %v1379_v37  ;;  %v978_v46 = vsel %vm914_vm14, %v882_v24, %v946_v39  ;;  %v742_v51 = vadd.f32 %v1696_v35, %v364_v36  ;;  %1123 = vst.msk [vmem:[%s1690_s10 + $0x10] sm:$0xf] %vm1118_vm2, %v1361_v40  ;;  %vm901_vm15 = vcmp.ge.f32.partialorder %v869_v41, 0.0  ;;  %v724_v1 = vadd.f32 %v1698_v42, %v346_v52  ;;  %v367_v22 = vld [vmem:[#allocation2 + $0xe8] sm:$0xff] }
 0x108   : > { %v1377_v57 = vpack.c.bf16 %v978_v46, %v978_v46  ;;  %v933_v58 = vmul.f32 0.2, %v869_v41  ;;  %vm917_vm1 = vcmp.ge.f32.partialorder %v885_v44, 0.0  ;;  %v949_v62 = vmul.f32 0.2, %v885_v44  ;;  %759 = vst.msk [vmem:[#allocation2 + $0x50] sm:$0xff] %vm305_vm0, %v726_v50 }
 0x109   : > { %vm899_vm3 = vcmp.ge.f32.partialorder %v867_v45, 0.0  ;;  %v931_v63 = vmul.f32 0.2, %v867_v45  ;;  %v883_v0 = vadd.f32 %v1663_v53, %v844_v47  ;;  %775 = vst.msk [vmem:[#allocation2 + $0xd0] sm:$0xff] %vm305_vm0, %v742_v51  ;;  %v740_v2 = vadd.f32 %v1700_v43, %v362_v55  ;;  %757 = vst.msk [vmem:[#allocation2 + $0x40] sm:$0xff] %vm305_vm0, %v724_v1 }
 0x10a   : > { %1139 = vst.msk [vmem:[%s1690_s10 + $0x50] sm:$0xf] %vm1118_vm2, %v1377_v57  ;;  %v965_v35 = vsel %vm901_vm15, %v869_v41, %v933_v58  ;;  %v727_v3 = vadd.f32 %v1702_v49, %v349_v56  ;;  %v981_v8 = vsel %vm917_vm1, %v885_v44, %v949_v62  ;;  %v743_v49 = vadd.f32 %v1710_v54, %v365_v59 }
 0x10b   : > { %v1364_v7 = vpack.c.bf16 %v965_v35, %v965_v35  ;;  %v963_v9 = vsel %vm899_vm3, %v867_v45, %v931_v63  ;;  %vm915_vm4 = vcmp.ge.f32.partialorder %v883_v0, 0.0  ;;  %v1380_v15 = vpack.c.bf16 %v981_v8, %v981_v8  ;;  %773 = vst.msk [vmem:[#allocation2 + $0xc0] sm:$0xff] %vm305_vm0, %v740_v2 }
 0x10c   : > { %v1362_v42 = vpack.c.bf16 %v963_v9, %v963_v9  ;;  %v947_v43 = vmul.f32 0.2, %v883_v0  ;;  %760 = vst.msk [vmem:[#allocation2 + $0x58] sm:$0xff] %vm305_vm0, %v727_v3  ;;  %v725_v23 = vadd.f32 %v1719_v60, %v347_v34  ;;  %v741_v24 = vadd.f32 %v1721_v61, %v363_v4  ;;  %776 = vst.msk [vmem:[#allocation2 + $0xd8] sm:$0xff] %vm305_vm0, %v743_v49 }
 0x10d   : > { %1126 = vst.msk [vmem:[%s1690_s10 + $0x1c] sm:$0xf] %vm1118_vm2, %v1364_v7  ;;  %v730_v25 = vadd.f32 %v1729_v10, %v352_v5  ;;  %v746_v28 = vadd.f32 %v1731_v11, %v368_v6  ;;  %1142 = vst.msk [vmem:[%s1690_s10 + $0x5c] sm:$0xf] %vm1118_vm2, %v1380_v15  ;;  %v728_v54 = vadd.f32 %v1735_v16, %v350_v12 }
 0x10e   : > { %1124 = vst.msk [vmem:[%s1690_s10 + $0x14] sm:$0xf] %vm1118_vm2, %v1362_v42  ;;  %v979_v29 = vsel %vm915_vm4, %v883_v0, %v947_v43  ;;  %v744_v30 = vadd.f32 %v1737_v17, %v366_v13  ;;  %v731_v60 = vadd.f32 %v1739_v20, %v353_v14  ;;  %v747_v10 = vadd.f32 %v1741_v21, %v369_v18 }
 0x10f   : > { %v1378_v61 = vpack.c.bf16 %v979_v29, %v979_v29  ;;  %758 = vst.msk [vmem:[#allocation2 + $0x48] sm:$0xff] %vm305_vm0, %v725_v23  ;;  %774 = vst.msk [vmem:[#allocation2 + $0xc8] sm:$0xff] %vm305_vm0, %v741_v24  ;;  %v729_v11 = vadd.f32 %v1747_v26, %v351_v19  ;;  %v745_v16 = vadd.f32 %v1749_v27, %v367_v22  ;;  %v794_v31 = vld [vmem:[#allocation2 + $0x50] sm:$0xff] }
 0x110   : > { %763 = vst.msk [vmem:[#allocation2 + $0x70] sm:$0xff] %vm305_vm0, %v730_v25  ;;  %779 = vst.msk [vmem:[#allocation2 + $0xf0] sm:$0xff] %vm305_vm0, %v746_v28  ;;  %v810_v32 = vld [vmem:[#allocation2 + $0xd0] sm:$0xff]  ;;  %v833_v17 = vmul.f32 %v1658_v48, %v794_v31  ;;  %v792_v27 = vld [vmem:[#allocation2 + $0x40] sm:$0xff] }
 0x111   : > { %761 = vst.msk [vmem:[#allocation2 + $0x60] sm:$0xff] %vm305_vm0, %v728_v54  ;;  %777 = vst.msk [vmem:[#allocation2 + $0xe0] sm:$0xff] %vm305_vm0, %v744_v30  ;;  %v849_v20 = vmul.f32 %v1658_v48, %v810_v32  ;;  %v831_v37 = vmul.f32 %v1658_v48, %v792_v27 }
 0x112   : > { %764 = vst.msk [vmem:[#allocation2 + $0x78] sm:$0xff] %vm305_vm0, %v731_v60  ;;  %780 = vst.msk [vmem:[#allocation2 + $0xf8] sm:$0xff] %vm305_vm0, %v747_v10  ;;  %v872_v21 = vadd.f32 %v1663_v53, %v833_v17  ;;  %v808_v33 = vld [vmem:[#allocation2 + $0xc0] sm:$0xff] }
 0x113   : > { %1140 = vst.msk [vmem:[%s1690_s10 + $0x54] sm:$0xf] %vm1118_vm2, %v1378_v61  ;;  %v888_v26 = vadd.f32 %v1663_v53, %v849_v20  ;;  %v795_v36 = vld [vmem:[#allocation2 + $0x58] sm:$0xff]  ;;  %v847_v38 = vmul.f32 %v1658_v48, %v808_v33  ;;  %v870_v44 = vadd.f32 %v1663_v53, %v831_v37 }
 0x114   : > { %762 = vst.msk [vmem:[#allocation2 + $0x68] sm:$0xff] %vm305_vm0, %v729_v11  ;;  %778 = vst.msk [vmem:[#allocation2 + $0xe8] sm:$0xff] %vm305_vm0, %v745_v16  ;;  %v834_v39 = vmul.f32 %v1658_v48, %v795_v36  ;;  %vm904_vm5 = vcmp.ge.f32.partialorder %v872_v21, 0.0  ;;  %v936_v40 = vmul.f32 0.2, %v872_v21  ;;  %v811_v47 = vld [vmem:[#allocation2 + $0xd8] sm:$0xff] }
 0x115   : > { %vm920_vm6 = vcmp.ge.f32.partialorder %v888_v26, 0.0  ;;  %v952_v41 = vmul.f32 0.2, %v888_v26  ;;  %v886_v45 = vadd.f32 %v1663_v53, %v847_v38  ;;  %v850_v55 = vmul.f32 %v1658_v48, %v811_v47 }
 0x116   : > { %v873_v46 = vadd.f32 %v1663_v53, %v834_v39  ;;  %v793_v50 = vld [vmem:[#allocation2 + $0x48] sm:$0xff]  ;;  %v968_v51 = vsel %vm904_vm5, %v872_v21, %v936_v40  ;;  %vm902_vm0 = vcmp.ge.f32.partialorder %v870_v44, 0.0  ;;  %v934_v62 = vmul.f32 0.2, %v870_v44 }
 0x117   : > { %v984_v52 = vsel %vm920_vm6, %v888_v26, %v952_v41  ;;  %v832_v56 = vmul.f32 %v1658_v48, %v793_v50  ;;  %v809_v57 = vld [vmem:[#allocation2 + $0xc8] sm:$0xff]  ;;  %v1367_v58 = vpack.c.bf16 %v968_v51, %v968_v51  ;;  %v798_v63 = vld [vmem:[#allocation2 + $0x70] sm:$0xff]  ;;  %vm918_vm7 = vcmp.ge.f32.partialorder %v886_v45, 0.0 }
 0x118   : > { %v1383_v59 = vpack.c.bf16 %v984_v52, %v984_v52  ;;  %v950_v0 = vmul.f32 0.2, %v886_v45  ;;  %vm905_vm8 = vcmp.ge.f32.partialorder %v873_v46, 0.0  ;;  %v937_v34 = vmul.f32 0.2, %v873_v46  ;;  %v814_v8 = vld [vmem:[#allocation2 + $0xf0] sm:$0xff] }
 0x119   : > { %1129 = vst.msk [vmem:[%s1690_s10 + $0x28] sm:$0xf] %vm1118_vm2, %v1367_v58  ;;  %v966_v35 = vsel %vm902_vm0, %v870_v44, %v934_v62  ;;  %v889_v1 = vadd.f32 %v1663_v53, %v850_v55  ;;  %v871_v2 = vadd.f32 %v1663_v53, %v832_v56  ;;  %v848_v3 = vmul.f32 %v1658_v48, %v809_v57  ;;  %v796_v9 = vld [vmem:[#allocation2 + $0x60] sm:$0xff]  ;;  %v799_v24 = vld [vmem:[#allocation2 + $0x78] sm:$0xff] }
 0x11a   : > { %1145 = vst.msk [vmem:[%s1690_s10 + $0x68] sm:$0xf] %vm1118_vm2, %v1383_v59  ;;  %v1365_v4 = vpack.c.bf16 %v966_v35, %v966_v35  ;;  %v982_v5 = vsel %vm918_vm7, %v886_v45, %v950_v0  ;;  %v969_v6 = vsel %vm905_vm8, %v873_v46, %v937_v34  ;;  %v837_v7 = vmul.f32 %v1658_v48, %v798_v63  ;;  %v812_v12 = vld [vmem:[#allocation2 + $0xe0] sm:$0xff]  ;;  %v815_v31 = vld [vmem:[#allocation2 + $0xf8] sm:$0xff] }
 0x11b   : > { %v1381_v13 = vpack.c.bf16 %v982_v5, %v982_v5  ;;  %v1368_v14 = vpack.c.bf16 %v969_v6, %v969_v6  ;;  %vm921_vm9 = vcmp.ge.f32.partialorder %v889_v1, 0.0  ;;  %v953_v15 = vmul.f32 0.2, %v889_v1  ;;  %v797_v21 = vld [vmem:[#allocation2 + $0x68] sm:$0xff] }
 0x11c   : > { %1127 = vst.msk [vmem:[%s1690_s10 + $0x20] sm:$0xf] %vm1118_vm2, %v1365_v4  ;;  %vm903_vm10 = vcmp.ge.f32.partialorder %v871_v2, 0.0  ;;  %v935_v42 = vmul.f32 0.2, %v871_v2  ;;  %v887_v43 = vadd.f32 %v1663_v53, %v848_v3  ;;  %v876_v49 = vadd.f32 %v1663_v53, %v837_v7  ;;  %v813_v26 = vld [vmem:[#allocation2 + $0xe8] sm:$0xff] }
 0x11d   : > { %1143 = vst.msk [vmem:[%s1690_s10 + $0x60] sm:$0xf] %vm1118_vm2, %v1381_v13  ;;  %1130 = vst.msk [vmem:[%s1690_s10 + $0x2c] sm:$0xf] %vm1118_vm2, %v1368_v14  ;;  %v985_v18 = vsel %vm921_vm9, %v889_v1, %v953_v15  ;;  %v853_v19 = vmul.f32 %v1658_v48, %v814_v8  ;;  %v835_v22 = vmul.f32 %v1658_v48, %v796_v9 }
 0x11e   : > { %v851_v23 = vmul.f32 %v1658_v48, %v812_v12  ;;  %v1384_v25 = vpack.c.bf16 %v985_v18, %v985_v18  ;;  %v967_v28 = vsel %vm903_vm10, %v871_v2, %v935_v42  ;;  %vm919_vm11 = vcmp.ge.f32.partialorder %v887_v43, 0.0 }
 0x11f   : > { %v951_v29 = vmul.f32 0.2, %v887_v43  ;;  %v1366_v54 = vpack.c.bf16 %v967_v28, %v967_v28  ;;  %vm908_vm12 = vcmp.ge.f32.partialorder %v876_v49, 0.0  ;;  %v940_v30 = vmul.f32 0.2, %v876_v49 }
 0x120   : > { %v892_v60 = vadd.f32 %v1663_v53, %v853_v19  ;;  %1146 = vst.msk [vmem:[%s1690_s10 + $0x6c] sm:$0xf] %vm1118_vm2, %v1384_v25  ;;  %v874_v10 = vadd.f32 %v1663_v53, %v835_v22  ;;  %v890_v11 = vadd.f32 %v1663_v53, %v851_v23  ;;  %v838_v16 = vmul.f32 %v1658_v48, %v799_v24 }
 0x121   : > { %v983_v61 = vsel %vm919_vm11, %v887_v43, %v951_v29  ;;  %1128 = vst.msk [vmem:[%s1690_s10 + $0x24] sm:$0xf] %vm1118_vm2, %v1366_v54  ;;  %v972_v17 = vsel %vm908_vm12, %v876_v49, %v940_v30  ;;  %v854_v39 = vmul.f32 %v1658_v48, %v815_v31  ;;  %v836_v44 = vmul.f32 %v1658_v48, %v797_v21 }
 0x122   : > { %v1382_v32 = vpack.c.bf16 %v983_v61, %v983_v61  ;;  %vm924_vm13 = vcmp.ge.f32.partialorder %v892_v60, 0.0  ;;  %v956_v20 = vmul.f32 0.2, %v892_v60  ;;  %v1371_v27 = vpack.c.bf16 %v972_v17, %v972_v17 }
 0x123   : > { %vm906_vm14 = vcmp.ge.f32.partialorder %v874_v10, 0.0  ;;  %v938_v33 = vmul.f32 0.2, %v874_v10  ;;  %vm922_vm15 = vcmp.ge.f32.partialorder %v890_v11, 0.0  ;;  %v954_v37 = vmul.f32 0.2, %v890_v11 }
 0x124   : > { %1144 = vst.msk [vmem:[%s1690_s10 + $0x64] sm:$0xf] %vm1118_vm2, %v1382_v32  ;;  %v988_v36 = vsel %vm924_vm13, %v892_v60, %v956_v20  ;;  %v877_v38 = vadd.f32 %v1663_v53, %v838_v16  ;;  %1133 = vst.msk [vmem:[%s1690_s10 + $0x38] sm:$0xf] %vm1118_vm2, %v1371_v27  ;;  %v852_v45 = vmul.f32 %v1658_v48, %v813_v26 }
 0x125   : > { %v1387_v40 = vpack.c.bf16 %v988_v36, %v988_v36  ;;  %v970_v41 = vsel %vm906_vm14, %v874_v10, %v938_v33  ;;  %v986_v47 = vsel %vm922_vm15, %v890_v11, %v954_v37  ;;  %v893_v52 = vadd.f32 %v1663_v53, %v854_v39 }
 0x126   : > { %v1369_v46 = vpack.c.bf16 %v970_v41, %v970_v41  ;;  %vm909_vm1 = vcmp.ge.f32.partialorder %v877_v38, 0.0  ;;  %v941_v50 = vmul.f32 0.2, %v877_v38  ;;  %v1385_v51 = vpack.c.bf16 %v986_v47, %v986_v47 }
 0x127   : > { %1149 = vst.msk [vmem:[%s1690_s10 + $0x78] sm:$0xf] %vm1118_vm2, %v1387_v40  ;;  %v875_v55 = vadd.f32 %v1663_v53, %v836_v44  ;;  %v891_v56 = vadd.f32 %v1663_v53, %v852_v45  ;;  %vm925_vm3 = vcmp.ge.f32.partialorder %v893_v52, 0.0  ;;  %v957_v58 = vmul.f32 0.2, %v893_v52 }
 0x128   : > { %1131 = vst.msk [vmem:[%s1690_s10 + $0x30] sm:$0xf] %vm1118_vm2, %v1369_v46  ;;  %v973_v57 = vsel %vm909_vm1, %v877_v38, %v941_v50  ;;  %1147 = vst.msk [vmem:[%s1690_s10 + $0x70] sm:$0xf] %vm1118_vm2, %v1385_v51 }
 0x129   : > { %v1372_v48 = vpack.c.bf16 %v973_v57, %v973_v57  ;;  %vm907_vm4 = vcmp.ge.f32.partialorder %v875_v55, 0.0  ;;  %v939_v59 = vmul.f32 0.2, %v875_v55  ;;  %vm923_vm5 = vcmp.ge.f32.partialorder %v891_v56, 0.0 }
 0x12a   : > { %v955_v62 = vmul.f32 0.2, %v891_v56  ;;  %v989_v63 = vsel %vm925_vm3, %v893_v52, %v957_v58 }
 0x12b   : > { %1134 = vst.msk [vmem:[%s1690_s10 + $0x3c] sm:$0xf] %vm1118_vm2, %v1372_v48  ;;  %v1388_v0 = vpack.c.bf16 %v989_v63, %v989_v63  ;;  %v971_v53 = vsel %vm907_vm4, %v875_v55, %v939_v59 }
 0x12c   : > { %v987_v34 = vsel %vm923_vm5, %v891_v56, %v955_v62  ;;  %v1370_v35 = vpack.c.bf16 %v971_v53, %v971_v53 }
 0x12d   : > { %v1386_v1 = vpack.c.bf16 %v987_v34, %v987_v34  ;;  %1150 = vst.msk [vmem:[%s1690_s10 + $0x7c] sm:$0xf] %vm1118_vm2, %v1388_v0 }
 0x12e   : > { %1132 = vst.msk [vmem:[%s1690_s10 + $0x34] sm:$0xf] %vm1118_vm2, %v1370_v35 }
 0x12f   : > { %1148 = vst.msk [vmem:[%s1690_s10 + $0x74] sm:$0xf] %vm1118_vm2, %v1386_v1 }
 0x130 PF: > { %s14_s17 = sadd.s32 1, %s1518_s17   ;;  %s1890_s15 = smov %s1514_s16 }
 0x131   : > { %p11_p5 = scmp.ge.s32.totalorder %s14_s17, 4   ;;  %s1891_s16 = smov %s1893_s18 }
 0x133   :  { %13 = sbr.rel (!%p11_p5) target bundleno = 2 (0x2), region = 83 }

// kernel: _lambda_.9
= control target key start
LH: loop header
LB: loop body
LE: loop exit
PB: predicated region body
PF: predicated region fallthrough
CT: control target
= control target key end

     0   :  { %vm22_vm0 = vcmask 130048   ;;  %v642_v1 = vmov 0.0   ;;  %vm490_vm1 = vcmask 125952   ;;  %s854_s1 = inlined_call_operand.vmem [shape: bf16[128,16], index: 1, kind: input, shape index: {}]   ;;  %s855_s0 = inlined_call_operand.vmem [shape: bf16[128,128], index: 0, kind: input, shape index: {}]   ;;  %s856_s2 = inlined_call_operand.vmem [shape: f32[1,16], index: 2, kind: input, shape index: {}]   ;;  %s857_s3 = inlined_call_operand.vmem [shape: f32[1,16], index: 3, kind: input, shape index: {}]   ;;  %s858_s4 = inlined_call_operand.vmem [shape: bf16[128,16], index: 4, kind: output, shape index: {}]  }
   0x1   :  { %v626_v0 = vld [vmem:[%s854_s1] sm:$0xff]   ;;  %25 = vst.msk [vmem:[#allocation2 + $0x10] sm:$0xff] %vm22_vm0, %v642_v1  ;;  %23 = vst.msk [vmem:[#allocation2] sm:$0xff] %vm22_vm0, %v642_v1  ;;  %v627_v2 = vld [vmem:[%s854_s1 + $0x8] sm:$0xff]  }
   0x2   :  { %24 = vst.msk [vmem:[#allocation2 + $0x8] sm:$0xff] %vm22_vm0, %v642_v1  ;;  %26 = vst.msk [vmem:[#allocation2 + $0x18] sm:$0xff] %vm22_vm0, %v642_v1  ;;  %577 = vmatprep.subr.bf16.mxu0 %v626_v0  ;;  %609 = vmatprep.subr.bf16.mxu1 %v626_v0  ;;  %v628_v3 = vld [vmem:[%s854_s1 + $0x10] sm:$0xff]   ;;  %v629_v4 = vld [vmem:[%s854_s1 + $0x18] sm:$0xff]  }
   0x3   :  { %27 = vst.msk [vmem:[#allocation2 + $0x20] sm:$0xff] %vm22_vm0, %v642_v1  ;;  %28 = vst.msk [vmem:[#allocation2 + $0x28] sm:$0xff] %vm22_vm0, %v642_v1  ;;  %578 = vmatpush3.bf16.msra.mxu0 %v626_v0  ;;  %617 = vmatpush3.bf16.msra.mxu1 %v626_v0  ;;  %v634_v5 = vld [vmem:[%s855_s0] sm:$0xff]   ;;  %v631_v8 = vld [vmem:[%s854_s1 + $0x28] sm:$0xff]  }
   0x4   :  { %29 = vst.msk [vmem:[#allocation2 + $0x30] sm:$0xff] %vm22_vm0, %v642_v1  ;;  %30 = vst.msk [vmem:[#allocation2 + $0x38] sm:$0xff] %vm22_vm0, %v642_v1  ;;  %579 = vmatprep.subr.bf16.mxu0 %v627_v2  ;;  %610 = vmatprep.subr.bf16.mxu1 %v627_v2  ;;  %v635_v6 = vld [vmem:[%s855_s0 + $0x20] sm:$0xff]   ;;  %v632_v9 = vld [vmem:[%s854_s1 + $0x30] sm:$0xff]  }
   0x5   :  { %31 = vst.msk [vmem:[#allocation2 + $0x40] sm:$0xff] %vm22_vm0, %v642_v1  ;;  %32 = vst.msk [vmem:[#allocation2 + $0x48] sm:$0xff] %vm22_vm0, %v642_v1  ;;  %593 = vmatprep.mubr.bf16.mxu0 %v634_v5  ;;  %v630_v7 = vld [vmem:[%s854_s1 + $0x20] sm:$0xff]   ;;  %601 = vmatprep.mubr.bf16.mxu1 %v635_v6  ;;  %v633_v10 = vld [vmem:[%s854_s1 + $0x38] sm:$0xff]  }
   0x6   :  { %33 = vst.msk [vmem:[#allocation2 + $0x50] sm:$0xff] %vm22_vm0, %v642_v1  ;;  %34 = vst.msk [vmem:[#allocation2 + $0x58] sm:$0xff] %vm22_vm0, %v642_v1  ;;  %v636_v11 = vld [vmem:[%s855_s0 + $0x8] sm:$0xff]   ;;  %v638_v13 = vld [vmem:[%s855_s0 + $0x10] sm:$0xff]  }
   0x7   :  { %35 = vst.msk [vmem:[#allocation2 + $0x60] sm:$0xff] %vm22_vm0, %v642_v1  ;;  %36 = vst.msk [vmem:[#allocation2 + $0x68] sm:$0xff] %vm22_vm0, %v642_v1  ;;  %580 = vmatpush3.bf16.msra.mxu0 %v627_v2  ;;  %618 = vmatpush3.bf16.msra.mxu1 %v627_v2  ;;  %v637_v12 = vld [vmem:[%s855_s0 + $0x28] sm:$0xff]   ;;  %v639_v14 = vld [vmem:[%s855_s0 + $0x30] sm:$0xff]  }
   0x8   :  { %37 = vst.msk [vmem:[#allocation2 + $0x70] sm:$0xff] %vm22_vm0, %v642_v1  ;;  %38 = vst.msk [vmem:[#allocation2 + $0x78] sm:$0xff] %vm22_vm0, %v642_v1  ;;  %581 = vmatprep.subr.bf16.mxu0 %v628_v3  ;;  %611 = vmatprep.subr.bf16.mxu1 %v628_v3  ;;  %v640_v15 = vld [vmem:[%s855_s0 + $0x18] sm:$0xff]   ;;  %v41_v17 = vld [vmem:[#allocation2 + $0x10] sm:$0xff] }
   0x9   :  { %v641_v16 = vld [vmem:[%s855_s0 + $0x38] sm:$0xff]   ;;  %v39_v19 = vld [vmem:[#allocation2] sm:$0xff]  ;;  %v40_v29 = vld [vmem:[#allocation2 + $0x8] sm:$0xff] }
   0xa   :  { %v42_v23 = vld [vmem:[#allocation2 + $0x18] sm:$0xff]  ;;  %v43_v43 = vld [vmem:[#allocation2 + $0x20] sm:$0xff]  ;;  %v44_v55 = vld [vmem:[#allocation2 + $0x28] sm:$0xff] }
   0xb   :  { %582 = vmatpush3.bf16.msra.mxu0 %v628_v3  ;;  %619 = vmatpush3.bf16.msra.mxu1 %v628_v3  ;;  %v45_v41 = vld [vmem:[#allocation2 + $0x30] sm:$0xff]  ;;  %v743_v45 = vld [vmem:[%s856_s2] ss:$0 sm:$0xff]  ;;  %v46_v48 = vld [vmem:[#allocation2 + $0x38] sm:$0xff] }
   0xc   :  { %583 = vmatprep.subr.bf16.mxu0 %v629_v4  ;;  %612 = vmatprep.subr.bf16.mxu1 %v629_v4  ;;  %v47_v20 = vld [vmem:[#allocation2 + $0x40] sm:$0xff]  ;;  %v48_v30 = vld [vmem:[#allocation2 + $0x48] sm:$0xff] }
   0xd   :  { %v49_v18 = vld [vmem:[#allocation2 + $0x50] sm:$0xff]  ;;  %v50_v24 = vld [vmem:[#allocation2 + $0x58] sm:$0xff]  ;;  %v748_v50 = vld [vmem:[%s857_s3] ss:$0 sm:$0xff] }
   0xe   :  { %v51_v44 = vld [vmem:[#allocation2 + $0x60] sm:$0xff]  ;;  %v52_v56 = vld [vmem:[#allocation2 + $0x68] sm:$0xff] }
   0xf   :  { %584 = vmatpush3.bf16.msra.mxu0 %v629_v4  ;;  %620 = vmatpush3.bf16.msra.mxu1 %v629_v4  ;;  %v53_v42 = vld [vmem:[#allocation2 + $0x70] sm:$0xff]  ;;  %v54_v49 = vld [vmem:[#allocation2 + $0x78] sm:$0xff] }
  0x10   :  { %585 = vmatprep.subr.bf16.mxu0 %v630_v7  ;;  %613 = vmatprep.subr.bf16.mxu1 %v630_v7 }
  0x13   :  { %586 = vmatpush3.bf16.msra.mxu0 %v630_v7  ;;  %621 = vmatpush3.bf16.msra.mxu1 %v630_v7 }
  0x14   :  { %587 = vmatprep.subr.bf16.mxu0 %v631_v8  ;;  %614 = vmatprep.subr.bf16.mxu1 %v631_v8 }
  0x17   :  { %588 = vmatpush3.bf16.msra.mxu0 %v631_v8  ;;  %622 = vmatpush3.bf16.msra.mxu1 %v631_v8 }
  0x18   :  { %589 = vmatprep.subr.bf16.mxu0 %v632_v9  ;;  %615 = vmatprep.subr.bf16.mxu1 %v632_v9 }
  0x1b   :  { %590 = vmatpush3.bf16.msra.mxu0 %v632_v9  ;;  %623 = vmatpush3.bf16.msra.mxu1 %v632_v9 }
  0x1c   :  { %591 = vmatprep.subr.bf16.mxu0 %v633_v10  ;;  %616 = vmatprep.subr.bf16.mxu1 %v633_v10 }
  0x1f   :  { %592 = vmatpush3.bf16.msra.mxu0 %v633_v10  ;;  %624 = vmatpush3.bf16.msra.mxu1 %v633_v10 }
  0x22   :  { %594 = vmatmul.mubr.bf16.vlgmr.msra.gmra.mrb[0].mxu0 %v636_v11  ;;  %602 = vmatmul.mubr.bf16.vlgmr.msra.gmra.mrb[0].mxu1 %v637_v12 }
  0x23   :  { %597 = vmatprep.mubr.bf16.mxu0 %v638_v13  ;;  %605 = vmatprep.mubr.bf16.mxu1 %v639_v14 }
  0x2a   :  { %598 = vmatmul.mubr.bf16.gmra.mrb[4].mxu0 %v640_v15  ;;  %606 = vmatmul.mubr.bf16.gmra.mrb[4].mxu1 %v641_v16 }
  0xf5   :  { %v595_v21 = vpop.f32.mrb[0].mxu0  ;;  %v603_v22 = vpop.f32.mrb[0].mxu1 }
  0xf6   :  { %v282_v25 = vadd.f32 %v595_v21, %v41_v17  ;;  %v290_v26 = vadd.f32 %v603_v22, %v49_v18  ;;  %v217_v27 = vpop.f32.mrb[1].mxu0  ;;  %v249_v28 = vpop.f32.mrb[1].mxu1 }
  0xf7   :  { %v280_v31 = vadd.f32 %v217_v27, %v39_v19  ;;  %v288_v32 = vadd.f32 %v249_v28, %v47_v20  ;;  %v596_v33 = vpop.f32.mrb[2].mxu0  ;;  %v604_v34 = vpop.f32.mrb[2].mxu1 }
  0xf8   :  { %299 = vst.msk [vmem:[#allocation2 + $0x10] sm:$0xff] %vm22_vm0, %v282_v25  ;;  %307 = vst.msk [vmem:[#allocation2 + $0x50] sm:$0xff] %vm22_vm0, %v290_v26  ;;  %v283_v35 = vadd.f32 %v596_v33, %v42_v23  ;;  %v291_v36 = vadd.f32 %v604_v34, %v50_v24  ;;  %v220_v37 = vpop.f32.mrb[3].mxu0  ;;  %v252_v38 = vpop.f32.mrb[3].mxu1 }
  0xf9   :  { %297 = vst.msk [vmem:[#allocation2] sm:$0xff] %vm22_vm0, %v280_v31  ;;  %305 = vst.msk [vmem:[#allocation2 + $0x40] sm:$0xff] %vm22_vm0, %v288_v32  ;;  %v281_v39 = vadd.f32 %v220_v37, %v40_v29  ;;  %v289_v40 = vadd.f32 %v252_v38, %v48_v30 }
  0xfa   :  { %300 = vst.msk [vmem:[#allocation2 + $0x18] sm:$0xff] %vm22_vm0, %v283_v35  ;;  %308 = vst.msk [vmem:[#allocation2 + $0x58] sm:$0xff] %vm22_vm0, %v291_v36 }
  0xfb   :  { %298 = vst.msk [vmem:[#allocation2 + $0x8] sm:$0xff] %vm22_vm0, %v281_v39  ;;  %306 = vst.msk [vmem:[#allocation2 + $0x48] sm:$0xff] %vm22_vm0, %v289_v40 }
  0xfd   :  { %v599_v46 = vpop.f32.mrb[4].mxu0  ;;  %v607_v47 = vpop.f32.mrb[4].mxu1 }
  0xfe   :  { %v286_v51 = vadd.f32 %v599_v46, %v45_v41  ;;  %v294_v52 = vadd.f32 %v607_v47, %v53_v42  ;;  %v233_v53 = vpop.f32.mrb[5].mxu0  ;;  %v265_v54 = vpop.f32.mrb[5].mxu1 }
  0xff   :  { %v318_v57 = vld [vmem:[#allocation2 + $0x10] sm:$0xff]  ;;  %v284_v59 = vadd.f32 %v233_v53, %v43_v43  ;;  %v292_v60 = vadd.f32 %v265_v54, %v51_v44  ;;  %v600_v61 = vpop.f32.mrb[6].mxu0  ;;  %v608_v62 = vpop.f32.mrb[6].mxu1 }
 0x100   :  { %v326_v58 = vld [vmem:[#allocation2 + $0x50] sm:$0xff]  ;;  %v341_v63 = vmul.f32 %v743_v45, %v318_v57  ;;  %v316_v1 = vld [vmem:[#allocation2] sm:$0xff]  ;;  %303 = vst.msk [vmem:[#allocation2 + $0x30] sm:$0xff] %vm22_vm0, %v286_v51  ;;  %311 = vst.msk [vmem:[#allocation2 + $0x70] sm:$0xff] %vm22_vm0, %v294_v52  ;;  %v287_v3 = vadd.f32 %v600_v61, %v46_v48  ;;  %v295_v4 = vadd.f32 %v608_v62, %v54_v49  ;;  %v236_v5 = vpop.f32.mrb[7].mxu0  ;;  %v268_v6 = vpop.f32.mrb[7].mxu1 }
 0x101   :  { %v349_v0 = vmul.f32 %v743_v45, %v326_v58  ;;  %v324_v2 = vld [vmem:[#allocation2 + $0x40] sm:$0xff]  ;;  %v339_v7 = vmul.f32 %v743_v45, %v316_v1  ;;  %v319_v9 = vld [vmem:[#allocation2 + $0x18] sm:$0xff]  ;;  %301 = vst.msk [vmem:[#allocation2 + $0x20] sm:$0xff] %vm22_vm0, %v284_v59  ;;  %309 = vst.msk [vmem:[#allocation2 + $0x60] sm:$0xff] %vm22_vm0, %v292_v60  ;;  %v285_v11 = vadd.f32 %v236_v5, %v44_v55 }
 0x102   :  { %v347_v8 = vmul.f32 %v743_v45, %v324_v2  ;;  %v327_v10 = vld [vmem:[#allocation2 + $0x58] sm:$0xff]  ;;  %v293_v12 = vadd.f32 %v268_v6, %v52_v56  ;;  %v364_v13 = vadd.f32 %v748_v50, %v341_v63  ;;  %v342_v15 = vmul.f32 %v743_v45, %v319_v9  ;;  %v317_v17 = vld [vmem:[#allocation2 + $0x8] sm:$0xff]  ;;  %304 = vst.msk [vmem:[#allocation2 + $0x38] sm:$0xff] %vm22_vm0, %v287_v3 }
 0x103   :  { %v372_v14 = vadd.f32 %v748_v50, %v349_v0  ;;  %v350_v16 = vmul.f32 %v743_v45, %v327_v10  ;;  %v325_v18 = vld [vmem:[#allocation2 + $0x48] sm:$0xff]  ;;  %312 = vst.msk [vmem:[#allocation2 + $0x78] sm:$0xff] %vm22_vm0, %v295_v4  ;;  %v362_v19 = vadd.f32 %v748_v50, %v339_v7  ;;  %v340_v21 = vmul.f32 %v743_v45, %v317_v17 }
 0x104   :  { %v370_v20 = vadd.f32 %v748_v50, %v347_v8  ;;  %v348_v22 = vmul.f32 %v743_v45, %v325_v18  ;;  %302 = vst.msk [vmem:[#allocation2 + $0x28] sm:$0xff] %vm22_vm0, %v285_v11  ;;  %310 = vst.msk [vmem:[#allocation2 + $0x68] sm:$0xff] %vm22_vm0, %v293_v12  ;;  %vm380_vm2 = vcmp.ge.f32.partialorder %v364_v13, 0.0  ;;  %v396_v23 = vmul.f32 0.2, %v364_v13 }
 0x105   :  { %vm388_vm3 = vcmp.ge.f32.partialorder %v372_v14, 0.0  ;;  %v404_v24 = vmul.f32 0.2, %v372_v14  ;;  %vm378_vm4 = vcmp.ge.f32.partialorder %v362_v19, 0.0  ;;  %v394_v25 = vmul.f32 0.2, %v362_v19 }
 0x106   :  { %vm386_vm5 = vcmp.ge.f32.partialorder %v370_v20, 0.0  ;;  %v402_v26 = vmul.f32 0.2, %v370_v20  ;;  %v412_v27 = vsel %vm380_vm2, %v364_v13, %v396_v23  ;;  %v365_v29 = vadd.f32 %v748_v50, %v342_v15 }
 0x107   :  { %v420_v28 = vsel %vm388_vm3, %v372_v14, %v404_v24  ;;  %v373_v30 = vadd.f32 %v748_v50, %v350_v16  ;;  %v547_v31 = vpack.c.bf16 %v412_v27, %v412_v27  ;;  %v410_v33 = vsel %vm378_vm4, %v362_v19, %v394_v25  ;;  %v322_v35 = vld [vmem:[#allocation2 + $0x30] sm:$0xff] }
 0x108   :  { %v555_v32 = vpack.c.bf16 %v420_v28, %v420_v28  ;;  %v418_v34 = vsel %vm386_vm5, %v370_v20, %v402_v26  ;;  %v330_v36 = vld [vmem:[#allocation2 + $0x70] sm:$0xff]  ;;  %v545_v37 = vpack.c.bf16 %v410_v33, %v410_v33  ;;  %vm381_vm6 = vcmp.ge.f32.partialorder %v365_v29, 0.0  ;;  %v320_v40 = vld [vmem:[#allocation2 + $0x20] sm:$0xff] }
 0x109   :  { %v553_v38 = vpack.c.bf16 %v418_v34, %v418_v34  ;;  %v397_v39 = vmul.f32 0.2, %v365_v29  ;;  %493 = vst.msk [vmem:[%s858_s4 + $0x8] sm:$0xf] %vm490_vm1, %v547_v31  ;;  %vm389_vm7 = vcmp.ge.f32.partialorder %v373_v30, 0.0  ;;  %v363_v42 = vadd.f32 %v748_v50, %v340_v21  ;;  %v328_v49 = vld [vmem:[#allocation2 + $0x60] sm:$0xff] }
 0x10a   :  { %501 = vst.msk [vmem:[%s858_s4 + $0x28] sm:$0xf] %vm490_vm1, %v555_v32  ;;  %v405_v41 = vmul.f32 0.2, %v373_v30  ;;  %v371_v43 = vadd.f32 %v748_v50, %v348_v22  ;;  %491 = vst.msk [vmem:[%s858_s4] sm:$0xf] %vm490_vm1, %v545_v37  ;;  %v345_v46 = vmul.f32 %v743_v45, %v322_v35  ;;  %v353_v47 = vmul.f32 %v743_v45, %v330_v36 }
 0x10b   :  { %499 = vst.msk [vmem:[%s858_s4 + $0x20] sm:$0xf] %vm490_vm1, %v553_v38  ;;  %v413_v44 = vsel %vm381_vm6, %v365_v29, %v397_v39  ;;  %v343_v48 = vmul.f32 %v743_v45, %v320_v40  ;;  %vm379_vm8 = vcmp.ge.f32.partialorder %v363_v42, 0.0  ;;  %v395_v53 = vmul.f32 0.2, %v363_v42  ;;  %v323_v61 = vld [vmem:[#allocation2 + $0x38] sm:$0xff] }
 0x10c   :  { %v548_v51 = vpack.c.bf16 %v413_v44, %v413_v44  ;;  %v421_v52 = vsel %vm389_vm7, %v373_v30, %v405_v41  ;;  %vm387_vm9 = vcmp.ge.f32.partialorder %v371_v43, 0.0  ;;  %v403_v55 = vmul.f32 0.2, %v371_v43  ;;  %v331_v1 = vld [vmem:[#allocation2 + $0x78] sm:$0xff]  ;;  %v321_v2 = vld [vmem:[#allocation2 + $0x28] sm:$0xff] }
 0x10d   :  { %v556_v54 = vpack.c.bf16 %v421_v52, %v421_v52  ;;  %v368_v56 = vadd.f32 %v748_v50, %v345_v46  ;;  %v411_v57 = vsel %vm379_vm8, %v363_v42, %v395_v53  ;;  %v376_v58 = vadd.f32 %v748_v50, %v353_v47  ;;  %v329_v13 = vld [vmem:[#allocation2 + $0x68] sm:$0xff] }
 0x10e   :  { %494 = vst.msk [vmem:[%s858_s4 + $0xc] sm:$0xf] %vm490_vm1, %v548_v51  ;;  %v366_v59 = vadd.f32 %v748_v50, %v343_v48  ;;  %v351_v60 = vmul.f32 %v743_v45, %v328_v49  ;;  %v546_v62 = vpack.c.bf16 %v411_v57, %v411_v57  ;;  %v419_v63 = vsel %vm387_vm9, %v371_v43, %v403_v55 }
 0x10f   :  { %502 = vst.msk [vmem:[%s858_s4 + $0x2c] sm:$0xf] %vm490_vm1, %v556_v54  ;;  %vm384_vm10 = vcmp.ge.f32.partialorder %v368_v56, 0.0  ;;  %v400_v0 = vmul.f32 0.2, %v368_v56  ;;  %v554_v3 = vpack.c.bf16 %v419_v63, %v419_v63  ;;  %vm392_vm11 = vcmp.ge.f32.partialorder %v376_v58, 0.0 }
 0x110   :  { %v408_v4 = vmul.f32 0.2, %v376_v58  ;;  %vm382_vm12 = vcmp.ge.f32.partialorder %v366_v59, 0.0  ;;  %492 = vst.msk [vmem:[%s858_s4 + $0x4] sm:$0xf] %vm490_vm1, %v546_v62  ;;  %v374_v7 = vadd.f32 %v748_v50, %v351_v60  ;;  %v346_v8 = vmul.f32 %v743_v45, %v323_v61 }
 0x111   :  { %v416_v5 = vsel %vm384_vm10, %v368_v56, %v400_v0  ;;  %v398_v6 = vmul.f32 0.2, %v366_v59  ;;  %500 = vst.msk [vmem:[%s858_s4 + $0x24] sm:$0xf] %vm490_vm1, %v554_v3  ;;  %v354_v11 = vmul.f32 %v743_v45, %v331_v1  ;;  %v344_v12 = vmul.f32 %v743_v45, %v321_v2 }
 0x112   :  { %v551_v9 = vpack.c.bf16 %v416_v5, %v416_v5  ;;  %v424_v10 = vsel %vm392_vm11, %v376_v58, %v408_v4  ;;  %vm390_vm13 = vcmp.ge.f32.partialorder %v374_v7, 0.0  ;;  %v406_v16 = vmul.f32 0.2, %v374_v7 }
 0x113   :  { %v559_v14 = vpack.c.bf16 %v424_v10, %v424_v10  ;;  %v414_v15 = vsel %vm382_vm12, %v366_v59, %v398_v6  ;;  %v369_v18 = vadd.f32 %v748_v50, %v346_v8  ;;  %v377_v19 = vadd.f32 %v748_v50, %v354_v11 }
 0x114   :  { %497 = vst.msk [vmem:[%s858_s4 + $0x18] sm:$0xf] %vm490_vm1, %v551_v9  ;;  %v549_v17 = vpack.c.bf16 %v414_v15, %v414_v15  ;;  %v367_v20 = vadd.f32 %v748_v50, %v344_v12  ;;  %v422_v21 = vsel %vm390_vm13, %v374_v7, %v406_v16  ;;  %v352_v22 = vmul.f32 %v743_v45, %v329_v13 }
 0x115   :  { %505 = vst.msk [vmem:[%s858_s4 + $0x38] sm:$0xf] %vm490_vm1, %v559_v14  ;;  %v557_v23 = vpack.c.bf16 %v422_v21, %v422_v21  ;;  %vm385_vm14 = vcmp.ge.f32.partialorder %v369_v18, 0.0  ;;  %v401_v24 = vmul.f32 0.2, %v369_v18  ;;  %vm393_vm15 = vcmp.ge.f32.partialorder %v377_v19, 0.0 }
 0x116   :  { %495 = vst.msk [vmem:[%s858_s4 + $0x10] sm:$0xf] %vm490_vm1, %v549_v17  ;;  %v409_v25 = vmul.f32 0.2, %v377_v19  ;;  %vm383_vm0 = vcmp.ge.f32.partialorder %v367_v20, 0.0  ;;  %v375_v27 = vadd.f32 %v748_v50, %v352_v22 }
 0x117   :  { %v399_v26 = vmul.f32 0.2, %v367_v20  ;;  %503 = vst.msk [vmem:[%s858_s4 + $0x30] sm:$0xf] %vm490_vm1, %v557_v23  ;;  %v417_v45 = vsel %vm385_vm14, %v369_v18, %v401_v24 }
 0x118   :  { %v552_v28 = vpack.c.bf16 %v417_v45, %v417_v45  ;;  %v425_v29 = vsel %vm393_vm15, %v377_v19, %v409_v25  ;;  %vm391_vm2 = vcmp.ge.f32.partialorder %v375_v27, 0.0  ;;  %v407_v33 = vmul.f32 0.2, %v375_v27 }
 0x119   :  { %v415_v30 = vsel %vm383_vm0, %v367_v20, %v399_v26  ;;  %v560_v31 = vpack.c.bf16 %v425_v29, %v425_v29 }
 0x11a   :  { %v550_v32 = vpack.c.bf16 %v415_v30, %v415_v30  ;;  %498 = vst.msk [vmem:[%s858_s4 + $0x1c] sm:$0xf] %vm490_vm1, %v552_v28  ;;  %v423_v50 = vsel %vm391_vm2, %v375_v27, %v407_v33 }
 0x11b   :  { %506 = vst.msk [vmem:[%s858_s4 + $0x3c] sm:$0xf] %vm490_vm1, %v560_v31  ;;  %v558_v34 = vpack.c.bf16 %v423_v50, %v423_v50 }
 0x11c   :  { %496 = vst.msk [vmem:[%s858_s4 + $0x14] sm:$0xf] %vm490_vm1, %v550_v32 }
 0x11d   :  { %504 = vst.msk [vmem:[%s858_s4 + $0x34] sm:$0xf] %vm490_vm1, %v558_v34 }

// kernel: _lambda_.10
= control target key start
LH: loop header
LB: loop body
LE: loop exit
PB: predicated region body
PF: predicated region fallthrough
CT: control target
= control target key end

     0   :  { %vm22_vm0 = vcmask 261120   ;;  %v404_v20 = vmov 0.0   ;;  %vm298_vm3 = vcmask 257024   ;;  %s516_s1 = inlined_call_operand.vmem [shape: bf16[256,32], index: 1, kind: input, shape index: {}]   ;;  %s517_s0 = inlined_call_operand.vmem [shape: bf16[32,256], index: 0, kind: input, shape index: {}]   ;;  %s518_s2 = inlined_call_operand.vmem [shape: f32[1,32], index: 2, kind: input, shape index: {}]   ;;  %s519_s3 = inlined_call_operand.vmem [shape: f32[1,32], index: 3, kind: input, shape index: {}]   ;;  %s520_s4 = inlined_call_operand.vmem [shape: bf16[32,32], index: 4, kind: output, shape index: {}]  }
   0x1   :  { %v382_v0 = vld [vmem:[%s516_s1 + $0x40] sm:$0xff]   ;;  %v384_v2 = vld [vmem:[%s516_s1 + $0x48] sm:$0xff]   ;;  %v386_v4 = vld [vmem:[%s516_s1 + $0x50] sm:$0xff]   ;;  %23 = vst.msk [vmem:[#allocation2] sm:$0xff] %vm22_vm0, %v404_v20 }
   0x2   :  { %v383_v1 = vld [vmem:[%s516_s1] sm:$0xff]   ;;  %337 = vmatprep.subr.bf16.mxu0 %v382_v0  ;;  %365 = vmatprep.subr.bf16.mxu1 %v382_v0  ;;  %v385_v3 = vld [vmem:[%s516_s1 + $0x8] sm:$0xff]   ;;  %v387_v5 = vld [vmem:[%s516_s1 + $0x10] sm:$0xff]   ;;  %24 = vst.msk [vmem:[#allocation2 + $0x8] sm:$0xff] %vm22_vm0, %v404_v20 }
   0x3   :  { %338 = vmatpush3.bf16.msra.mxu0 %v383_v1  ;;  %373 = vmatpush3.bf16.msra.mxu1 %v383_v1  ;;  %v388_v6 = vld [vmem:[%s516_s1 + $0x58] sm:$0xff]   ;;  %v390_v8 = vld [vmem:[%s516_s1 + $0x60] sm:$0xff]   ;;  %v392_v10 = vld [vmem:[%s516_s1 + $0x68] sm:$0xff]   ;;  %25 = vst.msk [vmem:[#allocation2 + $0x10] sm:$0xff] %vm22_vm0, %v404_v20 }
   0x4   :  { %339 = vmatprep.subr.bf16.mxu0 %v384_v2  ;;  %366 = vmatprep.subr.bf16.mxu1 %v384_v2  ;;  %v389_v7 = vld [vmem:[%s516_s1 + $0x18] sm:$0xff]   ;;  %v391_v9 = vld [vmem:[%s516_s1 + $0x20] sm:$0xff]   ;;  %v393_v13 = vld [vmem:[%s516_s1 + $0x28] sm:$0xff]   ;;  %26 = vst.msk [vmem:[#allocation2 + $0x18] sm:$0xff] %vm22_vm0, %v404_v20 }
   0x5   :  { %v400_v11 = vld [vmem:[%s517_s0 + $0x4] ss:$8 sps:$4 sm:$0xff]   ;;  %v403_v12 = vld [vmem:[%s517_s0 + $0x14] ss:$8 sps:$4 sm:$0xff]   ;;  %v398_v18 = vld [vmem:[%s517_s0] ss:$8 sps:$4 sm:$0xff]  }
   0x6   :  { %v394_v14 = vld [vmem:[%s516_s1 + $0x70] sm:$0xff]   ;;  %215 = vmatprep.mubr.bf16.mxu0 %v400_v11  ;;  %223 = vmatprep.mubr.bf16.mxu1 %v403_v12  ;;  %v396_v16 = vld [vmem:[%s516_s1 + $0x78] sm:$0xff]   ;;  %v327_v41 = vld [vmem:[%s518_s2] ss:$0 sm:$0xff] }
   0x7   :  { %340 = vmatpush3.bf16.msra.mxu0 %v385_v3  ;;  %374 = vmatpush3.bf16.msra.mxu1 %v385_v3  ;;  %v395_v15 = vld [vmem:[%s516_s1 + $0x30] sm:$0xff]   ;;  %v397_v17 = vld [vmem:[%s516_s1 + $0x38] sm:$0xff]   ;;  %v328_v43 = vld [vmem:[%s519_s3] ss:$0 sm:$0xff] }
   0x8   :  { %341 = vmatprep.subr.bf16.mxu0 %v386_v4  ;;  %367 = vmatprep.subr.bf16.mxu1 %v386_v4  ;;  %v401_v19 = vld [vmem:[%s517_s0 + $0x10] ss:$8 sps:$4 sm:$0xff]   ;;  %v27_v23 = vld [vmem:[#allocation2] sm:$0xff] }
   0x9   :  { %v28_v31 = vld [vmem:[#allocation2 + $0x8] sm:$0xff] }
   0xa   :  { %v29_v25 = vld [vmem:[#allocation2 + $0x10] sm:$0xff] }
   0xb   :  { %342 = vmatpush3.bf16.msra.mxu0 %v387_v5  ;;  %375 = vmatpush3.bf16.msra.mxu1 %v387_v5  ;;  %v30_v33 = vld [vmem:[#allocation2 + $0x18] sm:$0xff] }
   0xc   :  { %343 = vmatprep.subr.bf16.mxu0 %v388_v6  ;;  %368 = vmatprep.subr.bf16.mxu1 %v388_v6 }
   0xf   :  { %344 = vmatpush3.bf16.msra.mxu0 %v389_v7  ;;  %376 = vmatpush3.bf16.msra.mxu1 %v389_v7 }
  0x10   :  { %345 = vmatprep.subr.bf16.mxu0 %v390_v8  ;;  %369 = vmatprep.subr.bf16.mxu1 %v390_v8 }
  0x13   :  { %346 = vmatpush3.bf16.msra.mxu0 %v391_v9  ;;  %377 = vmatpush3.bf16.msra.mxu1 %v391_v9 }
  0x14   :  { %347 = vmatprep.subr.bf16.mxu0 %v392_v10  ;;  %370 = vmatprep.subr.bf16.mxu1 %v392_v10 }
  0x17   :  { %348 = vmatpush3.bf16.msra.mxu0 %v393_v13  ;;  %378 = vmatpush3.bf16.msra.mxu1 %v393_v13 }
  0x18   :  { %349 = vmatprep.subr.bf16.mxu0 %v394_v14  ;;  %371 = vmatprep.subr.bf16.mxu1 %v394_v14 }
  0x1b   :  { %350 = vmatpush3.bf16.msra.mxu0 %v395_v15  ;;  %379 = vmatpush3.bf16.msra.mxu1 %v395_v15 }
  0x1c   :  { %351 = vmatprep.subr.bf16.mxu0 %v396_v16  ;;  %372 = vmatprep.subr.bf16.mxu1 %v396_v16 }
  0x1f   :  { %352 = vmatpush3.bf16.msra.mxu0 %v397_v17  ;;  %380 = vmatpush3.bf16.msra.mxu1 %v397_v17 }
  0x22   :  { %216 = vmatmul.mubr.bf16.vlgmr.msra.gmra.mrb[0].mxu0 %v398_v18  ;;  %224 = vmatmul.mubr.bf16.vlgmr.msra.gmra.mrb[0].mxu1 %v401_v19 }
  0xf5   :  { %v353_v21 = vpop.f32.mrb[0].mxu0  ;;  %v359_v22 = vpop.f32.mrb[0].mxu1 }
  0xf6   :  { %v354_v24 = vpop.f32.mrb[1].mxu0  ;;  %v360_v26 = vpop.f32.mrb[1].mxu1 }
  0xf7   :  { %v355_v27 = vadd.f32 %v354_v24, %v353_v21  ;;  %v361_v28 = vadd.f32 %v360_v26, %v359_v22  ;;  %v356_v29 = vpop.f32.mrb[2].mxu0  ;;  %v362_v30 = vpop.f32.mrb[2].mxu1 }
  0xf8   :  { %v357_v32 = vpop.f32.mrb[3].mxu0  ;;  %v363_v34 = vpop.f32.mrb[3].mxu1 }
  0xf9   :  { %v232_v35 = vadd.f32 %v355_v27, %v27_v23  ;;  %v234_v36 = vadd.f32 %v361_v28, %v29_v25  ;;  %v358_v37 = vadd.f32 %v357_v32, %v356_v29  ;;  %v364_v38 = vadd.f32 %v363_v34, %v362_v30 }
  0xfb   :  { %237 = vst.msk [vmem:[#allocation2] sm:$0xff] %vm22_vm0, %v232_v35  ;;  %239 = vst.msk [vmem:[#allocation2 + $0x10] sm:$0xff] %vm22_vm0, %v234_v36  ;;  %v233_v39 = vadd.f32 %v358_v37, %v28_v31  ;;  %v235_v40 = vadd.f32 %v364_v38, %v30_v33 }
  0xfd   :  { %238 = vst.msk [vmem:[#allocation2 + $0x8] sm:$0xff] %vm22_vm0, %v233_v39  ;;  %240 = vst.msk [vmem:[#allocation2 + $0x18] sm:$0xff] %vm22_vm0, %v235_v40 }
 0x102   :  { %v244_v42 = vld [vmem:[#allocation2] sm:$0xff]  ;;  %v246_v44 = vld [vmem:[#allocation2 + $0x10] sm:$0xff] }
 0x103   :  { %v255_v45 = vmul.f32 %v327_v41, %v244_v42  ;;  %v257_v46 = vmul.f32 %v327_v41, %v246_v44 }
 0x104   :  { %v245_v47 = vld [vmem:[#allocation2 + $0x8] sm:$0xff]  ;;  %v247_v48 = vld [vmem:[#allocation2 + $0x18] sm:$0xff] }
 0x105   :  { %v266_v49 = vadd.f32 %v328_v43, %v255_v45  ;;  %v268_v50 = vadd.f32 %v328_v43, %v257_v46  ;;  %v256_v51 = vmul.f32 %v327_v41, %v245_v47  ;;  %v258_v52 = vmul.f32 %v327_v41, %v247_v48 }
 0x107   :  { %vm270_vm1 = vcmp.ge.f32.partialorder %v266_v49, 0.0  ;;  %v274_v53 = vmul.f32 0.2, %v266_v49  ;;  %vm272_vm2 = vcmp.ge.f32.partialorder %v268_v50, 0.0  ;;  %v276_v54 = vmul.f32 0.2, %v268_v50 }
 0x108   :  { %v267_v55 = vadd.f32 %v328_v43, %v256_v51  ;;  %v269_v56 = vadd.f32 %v328_v43, %v258_v52 }
 0x109   :  { %v278_v57 = vsel %vm270_vm1, %v266_v49, %v274_v53  ;;  %v280_v58 = vsel %vm272_vm2, %v268_v50, %v276_v54 }
 0x10a   :  { %v333_v59 = vpack.c.bf16 %v278_v57, %v278_v57  ;;  %v335_v60 = vpack.c.bf16 %v280_v58, %v280_v58  ;;  %vm271_vm4 = vcmp.ge.f32.partialorder %v267_v55, 0.0  ;;  %v275_v61 = vmul.f32 0.2, %v267_v55 }
 0x10b   :  { %vm273_vm5 = vcmp.ge.f32.partialorder %v269_v56, 0.0  ;;  %v277_v62 = vmul.f32 0.2, %v269_v56 }
 0x10c   :  { %299 = vst.msk [vmem:[%s520_s4] sm:$0xf] %vm298_vm3, %v333_v59  ;;  %301 = vst.msk [vmem:[%s520_s4 + $0x8] sm:$0xf] %vm298_vm3, %v335_v60  ;;  %v279_v63 = vsel %vm271_vm4, %v267_v55, %v275_v61 }
 0x10d   :  { %v334_v0 = vpack.c.bf16 %v279_v63, %v279_v63  ;;  %v281_v1 = vsel %vm273_vm5, %v269_v56, %v277_v62 }
 0x10e   :  { %v336_v2 = vpack.c.bf16 %v281_v1, %v281_v1 }
 0x10f   :  { %300 = vst.msk [vmem:[%s520_s4 + $0x4] sm:$0xf] %vm298_vm3, %v334_v0 }
 0x110   :  { %302 = vst.msk [vmem:[%s520_s4 + $0xc] sm:$0xf] %vm298_vm3, %v336_v2 }

// kernel: tile.26
= control target key start
LH: loop header
LB: loop body
LE: loop exit
PB: predicated region body
PF: predicated region fallthrough
CT: control target
= control target key end

     0   :  { %s22_s0 = inlined_call_operand.vmem [shape: f32[32], index: 0, kind: input, shape index: {}]   ;;  %s23_s1 = inlined_call_operand.vmem [shape: f32[4,32], index: 1, kind: output, shape index: {}]  }
   0x1   :  { %v4_v0 = vld [vmem:[%s22_s0] ss:$0 sm:$0xff] }
   0x2   :  { %5 = vst [vmem:[%s23_s1] sm:$0xf] %v4_v0 }

// kernel: tile.30
= control target key start
LH: loop header
LB: loop body
LE: loop exit
PB: predicated region body
PF: predicated region fallthrough
CT: control target
= control target key end

     0   :  { %vm7_vm0 = vcmask 261120   ;;  %s37_s8 = smov 32   ;;  %s38_s9 = smov 64   ;;  %vm13_vm1 = vcmask 1048320   ;;  %vm19_vm2 = vcmask 785920   ;;  %vm25_vm3 = vcmask 523520   ;;  %s55_s0 = inlined_call_operand.vmem [shape: f32[4,32], index: 0, kind: input, shape index: {}]   ;;  %s56_s1 = inlined_call_operand.vmem [shape: f32[1,128], index: 1, kind: output, shape index: {}]  }
   0x1   :  { %v4_v0 = vld [vmem:[%s55_s0] sm:$0xf]  ;;  %s36_s0 = smov 96  }
   0x2   :  { %5 = vst [vmem:[#allocation1] sm:$0xf] %v4_v0 }
   0x9   :  { %v10_v1 = vld [vmem:[#allocation1 + $0x3] sm:$0x1]   ;;  %v22_v2 = vld [vmem:[#allocation1 + $0x1] sm:$0x1]   ;;  %v6_v3 = vld [vmem:[#allocation1] sm:$0x1]  }
   0xa   :  { %11 = vrot.lane.b32.xlu0 %v10_v1, %s36_s0  ;;  %23 = vrot.lane.b32.xlu1 %v22_v2, %s37_s8  ;;  %v16_v4 = vld [vmem:[#allocation1 + $0x2] sm:$0x1]   ;;  %8 = vst.msk [vmem:[#allocation0] sm:$0x1] %vm7_vm0, %v6_v3  }
   0xe   :  { %17 = vrot.lane.b32.xlu0 %v16_v4, %s38_s9 }
  0x7c   :  { %v12_v5 = vpop.permute.xlu0 %11   ;;  %v24_v6 = vpop.permute.xlu1 %23  }
  0x7d   :  { %14 = vst.msk [vmem:[#allocation0] sm:$0x1] %vm13_vm1, %v12_v5  }
  0x80   :  { %v18_v7 = vpop.permute.xlu0 %17  }
  0x81   :  { %20 = vst.msk [vmem:[#allocation0] sm:$0x1] %vm19_vm2, %v18_v7  }
  0x82   :  { %26 = vst.msk [vmem:[#allocation0] sm:$0x1] %vm25_vm3, %v24_v6  }
  0x89   :  { %v30_v8 = vld [vmem:[#allocation0] sm:$0x1] }
  0x8a   :  { %32 = vst [vmem:[%s56_s1] sm:$0x1] %v30_v8 }

// kernel: _lambda_.12
= control target key start
LH: loop header
LB: loop body
LE: loop exit
PB: predicated region body
PF: predicated region fallthrough
CT: control target
= control target key end

     0   :  { %v384_v21 = vmov 0.0   ;;  %s479_s1 = inlined_call_operand.vmem [shape: bf16[256,128], index: 1, kind: input, shape index: {}]   ;;  %s480_s0 = inlined_call_operand.vmem [shape: bf16[18,256], index: 0, kind: input, shape index: {}]   ;;  %s481_s2 = inlined_call_operand.vmem [shape: f32[1,128], index: 2, kind: input, shape index: {}]   ;;  %s482_s3 = inlined_call_operand.vmem [shape: f32[1,128], index: 3, kind: input, shape index: {}]   ;;  %s483_s4 = inlined_call_operand.vmem [shape: bf16[18,128], index: 4, kind: output, shape index: {}]  }
   0x1   :  { %v363_v0 = vld [vmem:[%s479_s1 + $0x40] sm:$0xff]   ;;  %v365_v2 = vld [vmem:[%s479_s1 + $0x48] sm:$0xff]   ;;  %v367_v4 = vld [vmem:[%s479_s1 + $0x50] sm:$0xff]   ;;  %24 = vst [vmem:[#allocation2 + $0x10] sm:$0x3] %v384_v21 }
   0x2   :  { %v364_v1 = vld [vmem:[%s479_s1] sm:$0xff]   ;;  %318 = vmatprep.subr.bf16.mxu0 %v363_v0  ;;  %346 = vmatprep.subr.bf16.mxu1 %v363_v0  ;;  %v366_v3 = vld [vmem:[%s479_s1 + $0x8] sm:$0xff]   ;;  %v368_v5 = vld [vmem:[%s479_s1 + $0x10] sm:$0xff]  }
   0x3   :  { %319 = vmatpush3.bf16.msra.mxu0 %v364_v1  ;;  %354 = vmatpush3.bf16.msra.mxu1 %v364_v1  ;;  %v369_v6 = vld [vmem:[%s479_s1 + $0x58] sm:$0xff]   ;;  %v371_v8 = vld [vmem:[%s479_s1 + $0x60] sm:$0xff]   ;;  %v373_v10 = vld [vmem:[%s479_s1 + $0x68] sm:$0xff]  }
   0x4   :  { %320 = vmatprep.subr.bf16.mxu0 %v365_v2  ;;  %347 = vmatprep.subr.bf16.mxu1 %v365_v2  ;;  %v370_v7 = vld [vmem:[%s479_s1 + $0x18] sm:$0xff]   ;;  %v372_v9 = vld [vmem:[%s479_s1 + $0x20] sm:$0xff]   ;;  %v30_v12 = vld [vmem:[%s480_s0 + $0x10] sm:$0x11] }
   0x5   :  { %v381_v11 = vld [vmem:[%s480_s0 + $0x4] ss:$8 sps:$4 sm:$0xff]   ;;  %v288_v13 = vcombine.high %v30_v12, %v30_v12  ;;  %v375_v15 = vld [vmem:[%s479_s1 + $0x70] sm:$0xff]   ;;  %v377_v17 = vld [vmem:[%s479_s1 + $0x78] sm:$0xff]   ;;  %v287_v20 = vcombine.low %v30_v12, %v30_v12 }
   0x6   :  { %v374_v14 = vld [vmem:[%s479_s1 + $0x28] sm:$0xff]   ;;  %208 = vmatprep.mubr.bf16.mxu0 %v381_v11  ;;  %v376_v16 = vld [vmem:[%s479_s1 + $0x30] sm:$0xff]   ;;  %v378_v18 = vld [vmem:[%s479_s1 + $0x38] sm:$0xff]  }
   0x7   :  { %321 = vmatpush3.bf16.msra.mxu0 %v366_v3  ;;  %355 = vmatpush3.bf16.msra.mxu1 %v366_v3  ;;  %v379_v19 = vld [vmem:[%s480_s0] ss:$8 sps:$4 sm:$0xff]  }
   0x8   :  { %322 = vmatprep.subr.bf16.mxu0 %v367_v4  ;;  %348 = vmatprep.subr.bf16.mxu1 %v367_v4  ;;  %v27_v25 = vld [vmem:[#allocation2 + $0x10] sm:$0x3]  ;;  %v305_v31 = vld [vmem:[%s481_s2] ss:$0 sm:$0xff] }
   0x9   :  { %216 = vmatprep.mubr.bf16.mxu1 %v288_v13  ;;  %v306_v36 = vld [vmem:[%s482_s3] ss:$0 sm:$0xff] }
   0xb   :  { %323 = vmatpush3.bf16.msra.mxu0 %v368_v5  ;;  %356 = vmatpush3.bf16.msra.mxu1 %v368_v5 }
   0xc   :  { %324 = vmatprep.subr.bf16.mxu0 %v369_v6  ;;  %349 = vmatprep.subr.bf16.mxu1 %v369_v6 }
   0xf   :  { %325 = vmatpush3.bf16.msra.mxu0 %v370_v7  ;;  %357 = vmatpush3.bf16.msra.mxu1 %v370_v7 }
  0x10   :  { %326 = vmatprep.subr.bf16.mxu0 %v371_v8  ;;  %350 = vmatprep.subr.bf16.mxu1 %v371_v8 }
  0x13   :  { %327 = vmatpush3.bf16.msra.mxu0 %v372_v9  ;;  %358 = vmatpush3.bf16.msra.mxu1 %v372_v9 }
  0x14   :  { %328 = vmatprep.subr.bf16.mxu0 %v373_v10  ;;  %351 = vmatprep.subr.bf16.mxu1 %v373_v10 }
  0x17   :  { %329 = vmatpush3.bf16.msra.mxu0 %v374_v14  ;;  %359 = vmatpush3.bf16.msra.mxu1 %v374_v14 }
  0x18   :  { %330 = vmatprep.subr.bf16.mxu0 %v375_v15  ;;  %352 = vmatprep.subr.bf16.mxu1 %v375_v15 }
  0x1b   :  { %331 = vmatpush3.bf16.msra.mxu0 %v376_v16  ;;  %360 = vmatpush3.bf16.msra.mxu1 %v376_v16 }
  0x1c   :  { %332 = vmatprep.subr.bf16.mxu0 %v377_v17  ;;  %353 = vmatprep.subr.bf16.mxu1 %v377_v17 }
  0x1f   :  { %333 = vmatpush3.bf16.msra.mxu0 %v378_v18  ;;  %361 = vmatpush3.bf16.msra.mxu1 %v378_v18 }
  0x22   :  { %209 = vmatmul.mubr.bf16.vlgmr.msra.gmra.mrb[0].mxu0 %v379_v19  ;;  %217 = vmatmul.mubr.bf16.vlgmr.msra.gmra.mrb[0].mxu1 %v287_v20 }
  0xf5   :  { %v334_v22 = vpop.f32.mrb[0].mxu0  ;;  %v340_v23 = vpop.f32.mrb[0].mxu1 }
  0xf6   :  { %v335_v24 = vpop.f32.mrb[1].mxu0  ;;  %v341_v26 = vpop.f32.mrb[1].mxu1 }
  0xf7   :  { %v336_v27 = vadd.f32 %v335_v24, %v334_v22  ;;  %v342_v28 = vadd.f32 %v341_v26, %v340_v23  ;;  %v337_v29 = vpop.f32.mrb[2].mxu0  ;;  %v343_v30 = vpop.f32.mrb[2].mxu1 }
  0xf8   :  { %v338_v32 = vpop.f32.mrb[3].mxu0  ;;  %v344_v33 = vpop.f32.mrb[3].mxu1 }
  0xf9   :  { %v226_v34 = vadd.f32 %v342_v28, %v27_v25  ;;  %v339_v35 = vadd.f32 %v338_v32, %v337_v29  ;;  %v243_v37 = vmul.f32 %v336_v27, %v305_v31 }
  0xfb   :  { %229 = vst [vmem:[#allocation2 + $0x10] sm:$0x3] %v226_v34  ;;  %v253_v38 = vadd.f32 %v306_v36, %v243_v37  ;;  %v244_v39 = vmul.f32 %v339_v35, %v305_v31 }
  0xfd   :  { %vm256_vm0 = vcmp.ge.f32.partialorder %v253_v38, 0.0  ;;  %v259_v40 = vmul.f32 0.2, %v253_v38  ;;  %v254_v41 = vadd.f32 %v306_v36, %v244_v39 }
  0xff   :  { %v262_v42 = vsel %vm256_vm0, %v253_v38, %v259_v40  ;;  %vm257_vm1 = vcmp.ge.f32.partialorder %v254_v41, 0.0  ;;  %v260_v43 = vmul.f32 0.2, %v254_v41 }
 0x101   :  { %v263_v46 = vsel %vm257_vm1, %v254_v41, %v260_v43 }
 0x102   :  { %v235_v44 = vld [vmem:[#allocation2 + $0x10] sm:$0x3]  ;;  %v316_v47 = vpack.c.bf16 %v263_v46, %v262_v42 }
 0x103   :  { %v245_v45 = vmul.f32 %v305_v31, %v235_v44 }
 0x104   :  { %317 = vst [vmem:[%s483_s4] sm:$0xff] %v316_v47  }
 0x105   :  { %v255_v48 = vadd.f32 %v306_v36, %v245_v45 }
 0x107   :  { %vm258_vm2 = vcmp.ge.f32.partialorder %v255_v48, 0.0  ;;  %v261_v49 = vmul.f32 0.2, %v255_v48 }
 0x109   :  { %v264_v50 = vsel %vm258_vm2, %v255_v48, %v261_v49 }
 0x10a   :  { %v312_v51 = vpack.c.bf16 %v264_v50, %v264_v50 }
 0x10c   :  { %280 = vst [vmem:[%s483_s4 + $0x8] sm:$0x1] %v312_v51 }

// kernel: _lambda_.11
= control target key start
LH: loop header
LB: loop body
LE: loop exit
PB: predicated region body
PF: predicated region fallthrough
CT: control target
= control target key end

     0   :  { %vm22_vm0 = vcmask 523264   ;;  %v529_v38 = vmov 0.0   ;;  %vm404_vm2 = vcmask 519168   ;;  %s668_s1 = inlined_call_operand.vmem [shape: bf16[512,64], index: 1, kind: input, shape index: {}]   ;;  %s669_s0 = inlined_call_operand.vmem [shape: bf16[8,512], index: 0, kind: input, shape index: {}]   ;;  %s670_s2 = inlined_call_operand.vmem [shape: f32[1,64], index: 2, kind: input, shape index: {}]   ;;  %s671_s3 = inlined_call_operand.vmem [shape: f32[1,64], index: 3, kind: input, shape index: {}]   ;;  %s672_s4 = inlined_call_operand.vmem [shape: bf16[8,64], index: 4, kind: output, shape index: {}]  }
   0x1   :  { %v493_v0 = vld [vmem:[%s668_s1 + $0x40] sm:$0xff]   ;;  %v497_v4 = vld [vmem:[%s668_s1 + $0x48] sm:$0xff]   ;;  %v501_v8 = vld [vmem:[%s668_s1 + $0x50] sm:$0xff]   ;;  %23 = vst.msk [vmem:[#allocation2] sm:$0xff] %vm22_vm0, %v529_v38 }
   0x2   :  { %v494_v1 = vld [vmem:[%s668_s1 + $0xc0] sm:$0xff]   ;;  %448 = vmatprep.subr.bf16.mxu0 %v493_v0  ;;  %v498_v5 = vld [vmem:[%s668_s1 + $0xc8] sm:$0xff]   ;;  %v502_v9 = vld [vmem:[%s668_s1 + $0xd0] sm:$0xff]  }
   0x3   :  { %v495_v2 = vld [vmem:[%s668_s1] sm:$0xff]   ;;  %470 = vmatprep.subr.bf16.mxu1 %v494_v1  ;;  %v499_v6 = vld [vmem:[%s668_s1 + $0x8] sm:$0xff]   ;;  %v503_v10 = vld [vmem:[%s668_s1 + $0x10] sm:$0xff]  }
   0x4   :  { %v496_v3 = vld [vmem:[%s668_s1 + $0x80] sm:$0xff]   ;;  %449 = vmatpush3.bf16.msra.mxu0 %v495_v2  ;;  %v500_v7 = vld [vmem:[%s668_s1 + $0x88] sm:$0xff]   ;;  %v504_v11 = vld [vmem:[%s668_s1 + $0x90] sm:$0xff]  }
   0x5   :  { %471 = vmatpush3.bf16.msra.mxu1 %v496_v3  ;;  %450 = vmatprep.subr.bf16.mxu0 %v497_v4  ;;  %v505_v12 = vld [vmem:[%s668_s1 + $0x58] sm:$0xff]   ;;  %v509_v16 = vld [vmem:[%s668_s1 + $0x60] sm:$0xff]   ;;  %v513_v20 = vld [vmem:[%s668_s1 + $0x68] sm:$0xff]  }
   0x6   :  { %472 = vmatprep.subr.bf16.mxu1 %v498_v5  ;;  %v506_v13 = vld [vmem:[%s668_s1 + $0xd8] sm:$0xff]   ;;  %v510_v17 = vld [vmem:[%s668_s1 + $0xe0] sm:$0xff]   ;;  %v514_v21 = vld [vmem:[%s668_s1 + $0xe8] sm:$0xff]  }
   0x7   :  { %v507_v14 = vld [vmem:[%s668_s1 + $0x18] sm:$0xff]   ;;  %v511_v18 = vld [vmem:[%s668_s1 + $0x20] sm:$0xff]   ;;  %v515_v22 = vld [vmem:[%s668_s1 + $0x28] sm:$0xff]  }
   0x8   :  { %451 = vmatpush3.bf16.msra.mxu0 %v499_v6  ;;  %v508_v15 = vld [vmem:[%s668_s1 + $0x98] sm:$0xff]   ;;  %v512_v19 = vld [vmem:[%s668_s1 + $0xa0] sm:$0xff]   ;;  %v516_v23 = vld [vmem:[%s668_s1 + $0xa8] sm:$0xff]  }
   0x9   :  { %473 = vmatpush3.bf16.msra.mxu1 %v500_v7  ;;  %452 = vmatprep.subr.bf16.mxu0 %v501_v8  ;;  %v517_v24 = vld [vmem:[%s668_s1 + $0x70] sm:$0xff]   ;;  %v521_v28 = vld [vmem:[%s668_s1 + $0x78] sm:$0xff]   ;;  %v25_v32 = vld [vmem:[%s669_s0] sm:$0xff] }
   0xa   :  { %474 = vmatprep.subr.bf16.mxu1 %v502_v9  ;;  %v518_v25 = vld [vmem:[%s668_s1 + $0xf0] sm:$0xff]   ;;  %v522_v29 = vld [vmem:[%s668_s1 + $0xf8] sm:$0xff]   ;;  %v26_v33 = vld [vmem:[%s669_s0 + $0x8] sm:$0xff]  ;;  %v410_v34 = vcombine.low %v25_v32, %v25_v32  ;;  %v411_v35 = vcombine.high %v25_v32, %v25_v32 }
   0xb   :  { %v519_v26 = vld [vmem:[%s668_s1 + $0x30] sm:$0xff]   ;;  %v523_v30 = vld [vmem:[%s668_s1 + $0x38] sm:$0xff]   ;;  %v412_v36 = vcombine.low %v26_v33, %v26_v33  ;;  %v413_v37 = vcombine.high %v26_v33, %v26_v33  ;;  %v24_v47 = vld [vmem:[#allocation2] sm:$0xff] }
   0xc   :  { %453 = vmatpush3.bf16.msra.mxu0 %v503_v10  ;;  %v520_v27 = vld [vmem:[%s668_s1 + $0xb0] sm:$0xff]   ;;  %v524_v31 = vld [vmem:[%s668_s1 + $0xb8] sm:$0xff]   ;;  %329 = vmatprep.mubr.bf16.mxu0 %v411_v35  ;;  %v446_v52 = vld [vmem:[%s670_s2] ss:$0 sm:$0xff] }
   0xd   :  { %475 = vmatpush3.bf16.msra.mxu1 %v504_v11  ;;  %454 = vmatprep.subr.bf16.mxu0 %v505_v12  ;;  %v447_v54 = vld [vmem:[%s671_s3] ss:$0 sm:$0xff] }
   0xe   :  { %476 = vmatprep.subr.bf16.mxu1 %v506_v13  ;;  %369 = vmatprep.mubr.bf16.mxu1 %v413_v37 }
  0x10   :  { %455 = vmatpush3.bf16.msra.mxu0 %v507_v14 }
  0x11   :  { %477 = vmatpush3.bf16.msra.mxu1 %v508_v15  ;;  %456 = vmatprep.subr.bf16.mxu0 %v509_v16 }
  0x12   :  { %478 = vmatprep.subr.bf16.mxu1 %v510_v17 }
  0x14   :  { %457 = vmatpush3.bf16.msra.mxu0 %v511_v18 }
  0x15   :  { %479 = vmatpush3.bf16.msra.mxu1 %v512_v19  ;;  %458 = vmatprep.subr.bf16.mxu0 %v513_v20 }
  0x16   :  { %480 = vmatprep.subr.bf16.mxu1 %v514_v21 }
  0x18   :  { %459 = vmatpush3.bf16.msra.mxu0 %v515_v22 }
  0x19   :  { %481 = vmatpush3.bf16.msra.mxu1 %v516_v23  ;;  %460 = vmatprep.subr.bf16.mxu0 %v517_v24 }
  0x1a   :  { %482 = vmatprep.subr.bf16.mxu1 %v518_v25 }
  0x1c   :  { %461 = vmatpush3.bf16.msra.mxu0 %v519_v26 }
  0x1d   :  { %483 = vmatpush3.bf16.msra.mxu1 %v520_v27  ;;  %462 = vmatprep.subr.bf16.mxu0 %v521_v28 }
  0x1e   :  { %484 = vmatprep.subr.bf16.mxu1 %v522_v29 }
  0x20   :  { %463 = vmatpush3.bf16.msra.mxu0 %v523_v30 }
  0x21   :  { %485 = vmatpush3.bf16.msra.mxu1 %v524_v31 }
  0x23   :  { %330 = vmatmul.mubr.bf16.vlgmr.msra.gmra.mrb[0].mxu0 %v410_v34 }
  0x24   :  { %370 = vmatmul.mubr.bf16.vlgmr.msra.gmra.mrb[0].mxu1 %v412_v36 }
  0xf6   :  { %v464_v39 = vpop.f32.mrb[0].mxu0 }
  0xf7   :  { %v486_v40 = vpop.f32.mrb[0].mxu1  ;;  %v465_v41 = vpop.f32.mrb[1].mxu0 }
  0xf8   :  { %v487_v42 = vpop.f32.mrb[1].mxu1  ;;  %v466_v43 = vadd.f32 %v465_v41, %v464_v39  ;;  %v467_v45 = vpop.f32.mrb[2].mxu0 }
  0xf9   :  { %v488_v44 = vadd.f32 %v487_v42, %v486_v40  ;;  %v489_v46 = vpop.f32.mrb[2].mxu1  ;;  %v468_v48 = vpop.f32.mrb[3].mxu0 }
  0xfa   :  { %v490_v49 = vpop.f32.mrb[3].mxu1 }
  0xfb   :  { %v372_v50 = vadd.f32 %v488_v44, %v466_v43 }
  0xfd   :  { %v377_v51 = vadd.f32 %v372_v50, %v24_v47 }
  0xff   :  { %379 = vst.msk [vmem:[#allocation2] sm:$0xff] %vm22_vm0, %v377_v51 }
 0x106   :  { %v383_v53 = vld [vmem:[#allocation2] sm:$0xff] }
 0x107   :  { %v391_v55 = vmul.f32 %v446_v52, %v383_v53 }
 0x109   :  { %v399_v56 = vadd.f32 %v447_v54, %v391_v55 }
 0x10b   :  { %vm400_vm1 = vcmp.ge.f32.partialorder %v399_v56, 0.0  ;;  %v401_v57 = vmul.f32 0.2, %v399_v56 }
 0x10d   :  { %v402_v58 = vsel %vm400_vm1, %v399_v56, %v401_v57 }
 0x10e   :  { %v403_v59 = vpack.c.bf16 %v402_v58, %v402_v58 }
 0x110   :  { %405 = vst.msk [vmem:[%s672_s4] sm:$0xf] %vm404_vm2, %v403_v59 }

// kernel: tile.34
= control target key start
LH: loop header
LB: loop body
LE: loop exit
PB: predicated region body
PF: predicated region fallthrough
CT: control target
= control target key end

     0   :  { %s22_s0 = inlined_call_operand.vmem [shape: f32[16], index: 0, kind: input, shape index: {}]   ;;  %s23_s1 = inlined_call_operand.vmem [shape: f32[4,16], index: 1, kind: output, shape index: {}]  }
   0x1   :  { %v4_v0 = vld [vmem:[%s22_s0] ss:$0 sm:$0xff] }
   0x2   :  { %5 = vst [vmem:[%s23_s1] sm:$0xf] %v4_v0 }

// kernel: tile.38
= control target key start
LH: loop header
LB: loop body
LE: loop exit
PB: predicated region body
PF: predicated region fallthrough
CT: control target
= control target key end

     0   :  { %vm7_vm0 = vcmask 130048   ;;  %s37_s8 = smov 16   ;;  %s38_s9 = smov 32   ;;  %vm13_vm1 = vcmask 523648   ;;  %vm19_vm2 = vcmask 392448   ;;  %vm25_vm3 = vcmask 261248   ;;  %s55_s0 = inlined_call_operand.vmem [shape: f32[4,16], index: 0, kind: input, shape index: {}]   ;;  %s56_s1 = inlined_call_operand.vmem [shape: f32[1,64], index: 1, kind: output, shape index: {}]  }
   0x1   :  { %v4_v0 = vld [vmem:[%s55_s0] sm:$0xf]  ;;  %s36_s0 = smov 48  }
   0x2   :  { %5 = vst [vmem:[#allocation1] sm:$0xf] %v4_v0 }
   0x9   :  { %v10_v1 = vld [vmem:[#allocation1 + $0x3] sm:$0x1]   ;;  %v22_v2 = vld [vmem:[#allocation1 + $0x1] sm:$0x1]   ;;  %v6_v3 = vld [vmem:[#allocation1] sm:$0x1]  }
   0xa   :  { %11 = vrot.lane.b32.xlu0 %v10_v1, %s36_s0  ;;  %23 = vrot.lane.b32.xlu1 %v22_v2, %s37_s8  ;;  %v16_v4 = vld [vmem:[#allocation1 + $0x2] sm:$0x1]   ;;  %8 = vst.msk [vmem:[#allocation0] sm:$0x1] %vm7_vm0, %v6_v3  }
   0xe   :  { %17 = vrot.lane.b32.xlu0 %v16_v4, %s38_s9 }
  0x7c   :  { %v12_v5 = vpop.permute.xlu0 %11   ;;  %v24_v6 = vpop.permute.xlu1 %23  }
  0x7d   :  { %14 = vst.msk [vmem:[#allocation0] sm:$0x1] %vm13_vm1, %v12_v5  }
  0x80   :  { %v18_v7 = vpop.permute.xlu0 %17  }
  0x81   :  { %20 = vst.msk [vmem:[#allocation0] sm:$0x1] %vm19_vm2, %v18_v7  }
  0x82   :  { %26 = vst.msk [vmem:[#allocation0] sm:$0x1] %vm25_vm3, %v24_v6  }
  0x89   :  { %v30_v8 = vld [vmem:[#allocation0] sm:$0x1] }
  0x8a   :  { %32 = vst [vmem:[%s56_s1] sm:$0x1] %v30_v8 }

// kernel: _lambda_.13
= control target key start
LH: loop header
LB: loop body
LE: loop exit
PB: predicated region body
PF: predicated region fallthrough
CT: control target
= control target key end

     0   :  { %vm22_vm0 = vcmask 523264   ;;  %v405_v1 = vmov 0.0   ;;  %vm29_vm1 = vcmask 517120   ;;  %vm299_vm2 = vcmask 519168   ;;  %s515_s1 = inlined_call_operand.vmem [shape: bf16[128,64], index: 1, kind: input, shape index: {}]   ;;  %s516_s0 = inlined_call_operand.vmem [shape: bf16[50,128], index: 0, kind: input, shape index: {}]   ;;  %s517_s2 = inlined_call_operand.vmem [shape: f32[1,64], index: 2, kind: input, shape index: {}]   ;;  %s518_s3 = inlined_call_operand.vmem [shape: f32[1,64], index: 3, kind: input, shape index: {}]   ;;  %s519_s4 = inlined_call_operand.vmem [shape: bf16[50,64], index: 4, kind: output, shape index: {}]  }
   0x1   :  { %v393_v0 = vld [vmem:[%s515_s1] sm:$0xff]   ;;  %25 = vst.msk [vmem:[#allocation2 + $0x10] sm:$0xff] %vm22_vm0, %v405_v1  ;;  %23 = vst.msk [vmem:[#allocation2] sm:$0xff] %vm22_vm0, %v405_v1  ;;  %v394_v2 = vld [vmem:[%s515_s1 + $0x8] sm:$0xff]   ;;  %vm306_vm3 = vcmask 516096  }
   0x2   :  { %24 = vst.msk [vmem:[#allocation2 + $0x8] sm:$0xff] %vm22_vm0, %v405_v1  ;;  %26 = vst.msk [vmem:[#allocation2 + $0x18] sm:$0xff] %vm22_vm0, %v405_v1  ;;  %352 = vmatprep.subr.bf16.mxu0 %v393_v0  ;;  %376 = vmatprep.subr.bf16.mxu1 %v393_v0  ;;  %v395_v3 = vld [vmem:[%s515_s1 + $0x10] sm:$0xff]   ;;  %v396_v4 = vld [vmem:[%s515_s1 + $0x18] sm:$0xff]  }
   0x3   :  { %27 = vst.msk [vmem:[#allocation2 + $0x20] sm:$0xff] %vm22_vm0, %v405_v1  ;;  %28 = vst.msk [vmem:[#allocation2 + $0x28] sm:$0xff] %vm22_vm0, %v405_v1  ;;  %353 = vmatpush3.bf16.msra.mxu0 %v393_v0  ;;  %384 = vmatpush3.bf16.msra.mxu1 %v393_v0  ;;  %v401_v5 = vld [vmem:[%s516_s0] sm:$0xff]   ;;  %v402_v6 = vld [vmem:[%s516_s0 + $0x10] sm:$0xff]  }
   0x4   :  { %354 = vmatprep.subr.bf16.mxu0 %v394_v2  ;;  %377 = vmatprep.subr.bf16.mxu1 %v394_v2  ;;  %v397_v7 = vld [vmem:[%s515_s1 + $0x20] sm:$0xff]   ;;  %v398_v8 = vld [vmem:[%s515_s1 + $0x28] sm:$0xff]   ;;  %v399_v9 = vld [vmem:[%s515_s1 + $0x30] sm:$0xff]   ;;  %30 = vst.msk [vmem:[#allocation2 + $0x30] sm:$0x3] %vm29_vm1, %v405_v1 }
   0x5   :  { %368 = vmatprep.mubr.bf16.mxu0 %v401_v5  ;;  %372 = vmatprep.mubr.bf16.mxu1 %v402_v6  ;;  %v400_v10 = vld [vmem:[%s515_s1 + $0x38] sm:$0xff]   ;;  %v403_v11 = vld [vmem:[%s516_s0 + $0x8] sm:$0xff]   ;;  %v324_v35 = vld [vmem:[%s517_s2] ss:$0 sm:$0xff] }
   0x6   :  { %v404_v12 = vld [vmem:[%s516_s0 + $0x18] ss:$0 sps:$4 sm:$0x11]   ;;  %v325_v37 = vld [vmem:[%s518_s3] ss:$0 sm:$0xff] }
   0x7   :  { %355 = vmatpush3.bf16.msra.mxu0 %v394_v2  ;;  %385 = vmatpush3.bf16.msra.mxu1 %v394_v2 }
   0x8   :  { %356 = vmatprep.subr.bf16.mxu0 %v395_v3  ;;  %378 = vmatprep.subr.bf16.mxu1 %v395_v3  ;;  %v33_v13 = vld [vmem:[#allocation2 + $0x10] sm:$0xff]  ;;  %v31_v15 = vld [vmem:[#allocation2] sm:$0xff] }
   0x9   :  { %v34_v19 = vld [vmem:[#allocation2 + $0x18] sm:$0xff]  ;;  %v32_v24 = vld [vmem:[#allocation2 + $0x8] sm:$0xff] }
   0xa   :  { %v35_v16 = vld [vmem:[#allocation2 + $0x20] sm:$0xff]  ;;  %v36_v25 = vld [vmem:[#allocation2 + $0x28] sm:$0xff] }
   0xb   :  { %357 = vmatpush3.bf16.msra.mxu0 %v395_v3  ;;  %386 = vmatpush3.bf16.msra.mxu1 %v395_v3  ;;  %v37_v14 = vld [vmem:[#allocation2 + $0x30] sm:$0x3] }
   0xc   :  { %358 = vmatprep.subr.bf16.mxu0 %v396_v4  ;;  %379 = vmatprep.subr.bf16.mxu1 %v396_v4 }
   0xf   :  { %359 = vmatpush3.bf16.msra.mxu0 %v396_v4  ;;  %387 = vmatpush3.bf16.msra.mxu1 %v396_v4 }
  0x10   :  { %360 = vmatprep.subr.bf16.mxu0 %v397_v7  ;;  %380 = vmatprep.subr.bf16.mxu1 %v397_v7 }
  0x13   :  { %361 = vmatpush3.bf16.msra.mxu0 %v397_v7  ;;  %388 = vmatpush3.bf16.msra.mxu1 %v397_v7 }
  0x14   :  { %362 = vmatprep.subr.bf16.mxu0 %v398_v8  ;;  %381 = vmatprep.subr.bf16.mxu1 %v398_v8 }
  0x17   :  { %363 = vmatpush3.bf16.msra.mxu0 %v398_v8  ;;  %389 = vmatpush3.bf16.msra.mxu1 %v398_v8 }
  0x18   :  { %364 = vmatprep.subr.bf16.mxu0 %v399_v9  ;;  %382 = vmatprep.subr.bf16.mxu1 %v399_v9 }
  0x1b   :  { %365 = vmatpush3.bf16.msra.mxu0 %v399_v9  ;;  %390 = vmatpush3.bf16.msra.mxu1 %v399_v9 }
  0x1c   :  { %366 = vmatprep.subr.bf16.mxu0 %v400_v10  ;;  %383 = vmatprep.subr.bf16.mxu1 %v400_v10 }
  0x1f   :  { %367 = vmatpush3.bf16.msra.mxu0 %v400_v10  ;;  %391 = vmatpush3.bf16.msra.mxu1 %v400_v10 }
  0x22   :  { %369 = vmatmul.mubr.bf16.vlgmr.msra.gmra.mrb[0].mxu0 %v403_v11  ;;  %373 = vmatmul.mubr.bf16.vlgmr.msra.gmra.mrb[0].mxu1 %v404_v12 }
  0xf5   :  { %v370_v17 = vpop.f32.mrb[0].mxu0  ;;  %v374_v18 = vpop.f32.mrb[0].mxu1 }
  0xf6   :  { %v197_v20 = vadd.f32 %v370_v17, %v33_v13  ;;  %v201_v21 = vadd.f32 %v374_v18, %v37_v14  ;;  %v165_v22 = vpop.f32.mrb[1].mxu0  ;;  %v181_v23 = vpop.f32.mrb[1].mxu1 }
  0xf7   :  { %v195_v26 = vadd.f32 %v165_v22, %v31_v15  ;;  %v199_v27 = vadd.f32 %v181_v23, %v35_v16  ;;  %v371_v28 = vpop.f32.mrb[2].mxu0  ;;  %v375_v29 = vpop.f32.mrb[2].mxu1 }
  0xf8   :  { %205 = vst.msk [vmem:[#allocation2 + $0x10] sm:$0xff] %vm22_vm0, %v197_v20  ;;  %v198_v30 = vadd.f32 %v371_v28, %v34_v19  ;;  %v168_v31 = vpop.f32.mrb[3].mxu0  ;;  %v184_v32 = vpop.f32.mrb[3].mxu1 }
  0xf9   :  { %210 = vst.msk [vmem:[#allocation2 + $0x30] sm:$0x3] %vm29_vm1, %v201_v21  ;;  %v196_v33 = vadd.f32 %v168_v31, %v32_v24  ;;  %v200_v34 = vadd.f32 %v184_v32, %v36_v25 }
  0xfa   :  { %203 = vst.msk [vmem:[#allocation2] sm:$0xff] %vm22_vm0, %v195_v26  ;;  %207 = vst.msk [vmem:[#allocation2 + $0x20] sm:$0xff] %vm22_vm0, %v199_v27 }
  0xfb   :  { %206 = vst.msk [vmem:[#allocation2 + $0x18] sm:$0xff] %vm22_vm0, %v198_v30  ;;  %204 = vst.msk [vmem:[#allocation2 + $0x8] sm:$0xff] %vm22_vm0, %v196_v33 }
  0xfc   :  { %208 = vst.msk [vmem:[#allocation2 + $0x28] sm:$0xff] %vm22_vm0, %v200_v34 }
  0xff   :  { %v216_v36 = vld [vmem:[#allocation2 + $0x10] sm:$0xff] }
 0x100   :  { %v220_v38 = vld [vmem:[#allocation2 + $0x30] sm:$0x3]  ;;  %v230_v39 = vmul.f32 %v324_v35, %v216_v36 }
 0x101   :  { %v234_v40 = vmul.f32 %v324_v35, %v220_v38  ;;  %v214_v41 = vld [vmem:[#allocation2] sm:$0xff] }
 0x102   :  { %v218_v42 = vld [vmem:[#allocation2 + $0x20] sm:$0xff]  ;;  %v228_v43 = vmul.f32 %v324_v35, %v214_v41  ;;  %v217_v45 = vld [vmem:[#allocation2 + $0x18] sm:$0xff]  ;;  %v244_v46 = vadd.f32 %v325_v37, %v230_v39  ;;  %v215_v49 = vld [vmem:[#allocation2 + $0x8] sm:$0xff] }
 0x103   :  { %v232_v44 = vmul.f32 %v324_v35, %v218_v42  ;;  %v248_v47 = vadd.f32 %v325_v37, %v234_v40  ;;  %v231_v48 = vmul.f32 %v324_v35, %v217_v45  ;;  %v219_v50 = vld [vmem:[#allocation2 + $0x28] sm:$0xff]  ;;  %v229_v53 = vmul.f32 %v324_v35, %v215_v49 }
 0x104   :  { %v242_v51 = vadd.f32 %v325_v37, %v228_v43  ;;  %v233_v54 = vmul.f32 %v324_v35, %v219_v50  ;;  %vm251_vm4 = vcmp.ge.f32.partialorder %v244_v46, 0.0  ;;  %v258_v55 = vmul.f32 0.2, %v244_v46 }
 0x105   :  { %v246_v52 = vadd.f32 %v325_v37, %v232_v44  ;;  %vm255_vm5 = vcmp.ge.f32.partialorder %v248_v47, 0.0  ;;  %v262_v56 = vmul.f32 0.2, %v248_v47  ;;  %v245_v61 = vadd.f32 %v325_v37, %v231_v48 }
 0x106   :  { %vm249_vm6 = vcmp.ge.f32.partialorder %v242_v51, 0.0  ;;  %v256_v57 = vmul.f32 0.2, %v242_v51  ;;  %v265_v59 = vsel %vm251_vm4, %v244_v46, %v258_v55  ;;  %v243_v62 = vadd.f32 %v325_v37, %v229_v53 }
 0x107   :  { %vm253_vm7 = vcmp.ge.f32.partialorder %v246_v52, 0.0  ;;  %v260_v58 = vmul.f32 0.2, %v246_v52  ;;  %v269_v60 = vsel %vm255_vm5, %v248_v47, %v262_v56  ;;  %v335_v63 = vpack.c.bf16 %v265_v59, %v265_v59 }
 0x108   :  { %v339_v0 = vpack.c.bf16 %v269_v60, %v269_v60  ;;  %v263_v1 = vsel %vm249_vm6, %v242_v51, %v256_v57  ;;  %vm252_vm8 = vcmp.ge.f32.partialorder %v245_v61, 0.0  ;;  %v259_v5 = vmul.f32 0.2, %v245_v61 }
 0x109   :  { %v267_v2 = vsel %vm253_vm7, %v246_v52, %v260_v58  ;;  %v333_v3 = vpack.c.bf16 %v263_v1, %v263_v1  ;;  %302 = vst.msk [vmem:[%s519_s4 + $0x8] sm:$0xf] %vm299_vm2, %v335_v63  ;;  %vm250_vm9 = vcmp.ge.f32.partialorder %v243_v62, 0.0  ;;  %v257_v6 = vmul.f32 0.2, %v243_v62 }
 0x10a   :  { %v337_v4 = vpack.c.bf16 %v267_v2, %v267_v2  ;;  %307 = vst.msk [vmem:[%s519_s4 + $0x18] sm:$0x1] %vm306_vm3, %v339_v0  ;;  %v247_v7 = vadd.f32 %v325_v37, %v233_v54  ;;  %v266_v8 = vsel %vm252_vm8, %v245_v61, %v259_v5 }
 0x10b   :  { %300 = vst.msk [vmem:[%s519_s4] sm:$0xf] %vm299_vm2, %v333_v3  ;;  %v336_v9 = vpack.c.bf16 %v266_v8, %v266_v8  ;;  %v264_v10 = vsel %vm250_vm9, %v243_v62, %v257_v6 }
 0x10c   :  { %304 = vst.msk [vmem:[%s519_s4 + $0x10] sm:$0xf] %vm299_vm2, %v337_v4  ;;  %vm254_vm10 = vcmp.ge.f32.partialorder %v247_v7, 0.0  ;;  %v261_v11 = vmul.f32 0.2, %v247_v7  ;;  %v334_v12 = vpack.c.bf16 %v264_v10, %v264_v10 }
 0x10d   :  { %303 = vst.msk [vmem:[%s519_s4 + $0xc] sm:$0xf] %vm299_vm2, %v336_v9 }
 0x10e   :  { %v268_v13 = vsel %vm254_vm10, %v247_v7, %v261_v11  ;;  %301 = vst.msk [vmem:[%s519_s4 + $0x4] sm:$0xf] %vm299_vm2, %v334_v12 }
 0x10f   :  { %v338_v14 = vpack.c.bf16 %v268_v13, %v268_v13 }
 0x111   :  { %305 = vst.msk [vmem:[%s519_s4 + $0x14] sm:$0xf] %vm299_vm2, %v338_v14 }

// kernel: tile.42
= control target key start
LH: loop header
LB: loop body
LE: loop exit
PB: predicated region body
PF: predicated region fallthrough
CT: control target
= control target key end

     0   :  { %s22_s0 = inlined_call_operand.vmem [shape: f32[8], index: 0, kind: input, shape index: {}]   ;;  %s23_s1 = inlined_call_operand.vmem [shape: f32[4,8], index: 1, kind: output, shape index: {}]  }
   0x1   :  { %v4_v0 = vld [vmem:[%s22_s0] ss:$0 sm:$0xff] }
   0x2   :  { %5 = vst [vmem:[%s23_s1] sm:$0xf] %v4_v0 }

// kernel: tile.46
= control target key start
LH: loop header
LB: loop body
LE: loop exit
PB: predicated region body
PF: predicated region fallthrough
CT: control target
= control target key end

     0   :  { %vm7_vm0 = vcmask 64512   ;;  %s37_s8 = smov 8   ;;  %s38_s9 = smov 16   ;;  %vm13_vm1 = vcmask 261312   ;;  %vm19_vm2 = vcmask 195712   ;;  %vm25_vm3 = vcmask 130112   ;;  %s55_s0 = inlined_call_operand.vmem [shape: f32[4,8], index: 0, kind: input, shape index: {}]   ;;  %s56_s1 = inlined_call_operand.vmem [shape: f32[1,32], index: 1, kind: output, shape index: {}]  }
   0x1   :  { %v4_v0 = vld [vmem:[%s55_s0] sm:$0xf]  ;;  %s36_s0 = smov 24  }
   0x2   :  { %5 = vst [vmem:[#allocation1] sm:$0xf] %v4_v0 }
   0x9   :  { %v10_v1 = vld [vmem:[#allocation1 + $0x3] sm:$0x1]   ;;  %v22_v2 = vld [vmem:[#allocation1 + $0x1] sm:$0x1]   ;;  %v6_v3 = vld [vmem:[#allocation1] sm:$0x1]  }
   0xa   :  { %11 = vrot.lane.b32.xlu0 %v10_v1, %s36_s0  ;;  %23 = vrot.lane.b32.xlu1 %v22_v2, %s37_s8  ;;  %v16_v4 = vld [vmem:[#allocation1 + $0x2] sm:$0x1]   ;;  %8 = vst.msk [vmem:[#allocation0] sm:$0x1] %vm7_vm0, %v6_v3  }
   0xe   :  { %17 = vrot.lane.b32.xlu0 %v16_v4, %s38_s9 }
  0x7c   :  { %v12_v5 = vpop.permute.xlu0 %11   ;;  %v24_v6 = vpop.permute.xlu1 %23  }
  0x7d   :  { %14 = vst.msk [vmem:[#allocation0] sm:$0x1] %vm13_vm1, %v12_v5  }
  0x80   :  { %v18_v7 = vpop.permute.xlu0 %17  }
  0x81   :  { %20 = vst.msk [vmem:[#allocation0] sm:$0x1] %vm19_vm2, %v18_v7  }
  0x82   :  { %26 = vst.msk [vmem:[#allocation0] sm:$0x1] %vm25_vm3, %v24_v6  }
  0x89   :  { %v30_v8 = vld [vmem:[#allocation0] sm:$0x1] }
  0x8a   :  { %32 = vst [vmem:[%s56_s1] sm:$0x1] %v30_v8 }

// kernel: _lambda_.14
= control target key start
LH: loop header
LB: loop body
LE: loop exit
PB: predicated region body
PF: predicated region fallthrough
CT: control target
= control target key end

     0   :  { %vm22_vm0 = vcmask 261120   ;;  %v787_v0 = vmov 0.0   ;;  %vm788_vm1 = vmmov 0   ;;  %vm172_vm2 = vcmask 523264   ;;  %s1102_s1 = inlined_call_operand.vmem [shape: bf16[64,32], index: 1, kind: input, shape index: {}]   ;;  %s1103_s0 = inlined_call_operand.vmem [shape: bf16[162,64], index: 0, kind: input, shape index: {}]   ;;  %s1104_s2 = inlined_call_operand.vmem [shape: f32[1,32], index: 2, kind: input, shape index: {}]   ;;  %s1105_s3 = inlined_call_operand.vmem [shape: f32[1,32], index: 3, kind: input, shape index: {}]   ;;  %s1106_s4 = inlined_call_operand.vmem [shape: bf16[162,32], index: 4, kind: output, shape index: {}]  }
   0x1   :  { %710 = vmatprep.subr.bf16.mxu0 %v787_v0  ;;  %v772_v1 = vld [vmem:[%s1102_s1] sm:$0xff]   ;;  %762 = vmatprep.subr.bf16.mxu1 %v787_v0  ;;  %23 = vst.msk [vmem:[#allocation2] sm:$0xff] %vm22_vm0, %v787_v0  ;;  %24 = vst.msk [vmem:[#allocation2 + $0x8] sm:$0xff] %vm22_vm0, %v787_v0  ;;  %v773_v2 = vld [vmem:[%s1102_s1 + $0x8] sm:$0xff]   ;;  %vm43_vm3 = vcmask 254976   ;;  %vm598_vm6 = vcmask 257024  }
   0x2   :  { %25 = vst.msk [vmem:[#allocation2 + $0x10] sm:$0xff] %vm22_vm0, %v787_v0  ;;  %26 = vst.msk [vmem:[#allocation2 + $0x18] sm:$0xff] %vm22_vm0, %v787_v0  ;;  %718 = vmatprep.mubr.msk.bf16.mxu0 %vm788_vm1, %v787_v0  ;;  %742 = vmatprep.mubr.msk.bf16.mxu1 %vm788_vm1, %v787_v0  ;;  %v774_v3 = vld [vmem:[%s1102_s1 + $0x10] sm:$0xff]   ;;  %v775_v4 = vld [vmem:[%s1102_s1 + $0x18] sm:$0xff]  }
   0x3   :  { %27 = vst.msk [vmem:[#allocation2 + $0x20] sm:$0xff] %vm22_vm0, %v787_v0  ;;  %28 = vst.msk [vmem:[#allocation2 + $0x28] sm:$0xff] %vm22_vm0, %v787_v0  ;;  %711 = vmatpush3.bf16.msra.mxu0 %v772_v1  ;;  %766 = vmatpush3.bf16.msra.mxu1 %v772_v1  ;;  %v776_v5 = vld [vmem:[%s1103_s0] sm:$0xff]   ;;  %v777_v6 = vld [vmem:[%s1103_s0 + $0x30] sm:$0xff]  }
   0x4   :  { %29 = vst.msk [vmem:[#allocation2 + $0x30] sm:$0xff] %vm22_vm0, %v787_v0  ;;  %30 = vst.msk [vmem:[#allocation2 + $0x38] sm:$0xff] %vm22_vm0, %v787_v0  ;;  %712 = vmatprep.subr.bf16.mxu0 %v787_v0  ;;  %763 = vmatprep.subr.bf16.mxu1 %v787_v0  ;;  %v778_v7 = vld [vmem:[%s1103_s0 + $0x8] sm:$0xff]   ;;  %v779_v8 = vld [vmem:[%s1103_s0 + $0x38] sm:$0xff]  }
   0x5   :  { %31 = vst.msk [vmem:[#allocation2 + $0x40] sm:$0xff] %vm22_vm0, %v787_v0  ;;  %32 = vst.msk [vmem:[#allocation2 + $0x48] sm:$0xff] %vm22_vm0, %v787_v0  ;;  %v780_v9 = vld [vmem:[%s1103_s0 + $0x10] sm:$0xff]   ;;  %v781_v10 = vld [vmem:[%s1103_s0 + $0x40] sm:$0xff]  }
   0x6   :  { %33 = vst.msk [vmem:[#allocation2 + $0x50] sm:$0xff] %vm22_vm0, %v787_v0  ;;  %34 = vst.msk [vmem:[#allocation2 + $0x58] sm:$0xff] %vm22_vm0, %v787_v0  ;;  %v782_v11 = vld [vmem:[%s1103_s0 + $0x18] sm:$0xff]   ;;  %v783_v12 = vld [vmem:[%s1103_s0 + $0x48] sm:$0xff]  }
   0x7   :  { %35 = vst.msk [vmem:[#allocation2 + $0x60] sm:$0xff] %vm22_vm0, %v787_v0  ;;  %36 = vst.msk [vmem:[#allocation2 + $0x68] sm:$0xff] %vm22_vm0, %v787_v0  ;;  %713 = vmatpush3.bf16.msra.mxu0 %v773_v2  ;;  %767 = vmatpush3.bf16.msra.mxu1 %v773_v2  ;;  %v784_v13 = vld [vmem:[%s1103_s0 + $0x20] sm:$0xff]   ;;  %v785_v14 = vld [vmem:[%s1103_s0 + $0x50] ss:$0 sps:$4 sm:$0x11]  }
   0x8   :  { %37 = vst.msk [vmem:[#allocation2 + $0x70] sm:$0xff] %vm22_vm0, %v787_v0  ;;  %38 = vst.msk [vmem:[#allocation2 + $0x78] sm:$0xff] %vm22_vm0, %v787_v0  ;;  %714 = vmatprep.subr.bf16.mxu0 %v787_v0  ;;  %764 = vmatprep.subr.bf16.mxu1 %v787_v0  ;;  %v786_v15 = vld [vmem:[%s1103_s0 + $0x28] sm:$0xff]   ;;  %v45_v16 = vld [vmem:[#allocation2] sm:$0xff] }
   0x9   :  { %39 = vst.msk [vmem:[#allocation2 + $0x80] sm:$0xff] %vm22_vm0, %v787_v0  ;;  %40 = vst.msk [vmem:[#allocation2 + $0x88] sm:$0xff] %vm22_vm0, %v787_v0  ;;  %v46_v19 = vld [vmem:[#allocation2 + $0x8] sm:$0xff]  ;;  %v47_v32 = vld [vmem:[#allocation2 + $0x10] sm:$0xff] }
   0xa   :  { %41 = vst.msk [vmem:[#allocation2 + $0x90] sm:$0xff] %vm22_vm0, %v787_v0  ;;  %42 = vst.msk [vmem:[#allocation2 + $0x98] sm:$0xff] %vm22_vm0, %v787_v0  ;;  %v949_v34 = vld [vmem:[%s1104_s2] ss:$0 sm:$0xff]  ;;  %v48_v36 = vld [vmem:[#allocation2 + $0x18] sm:$0xff] }
   0xb   :  { %715 = vmatpush3.bf16.msra.mxu0 %v774_v3  ;;  %768 = vmatpush3.bf16.msra.mxu1 %v774_v3  ;;  %44 = vst.msk [vmem:[#allocation2 + $0xa0] sm:$0x3] %vm43_vm3, %v787_v0  ;;  %v954_v44 = vld [vmem:[%s1105_s3] ss:$0 sm:$0xff]  ;;  %v50_v2 = vld [vmem:[#allocation2 + $0x28] sm:$0xff] }
   0xc   :  { %716 = vmatprep.subr.bf16.mxu0 %v787_v0  ;;  %765 = vmatprep.subr.bf16.mxu1 %v787_v0  ;;  %v49_v60 = vld [vmem:[#allocation2 + $0x20] sm:$0xff] }
   0xe   :  { %v57_v17 = vld [vmem:[#allocation2 + $0x60] sm:$0xff]  ;;  %v58_v21 = vld [vmem:[#allocation2 + $0x68] sm:$0xff] }
   0xf   :  { %717 = vmatpush3.bf16.msra.mxu0 %v775_v4  ;;  %769 = vmatpush3.bf16.msra.mxu1 %v775_v4  ;;  %v59_v33 = vld [vmem:[#allocation2 + $0x70] sm:$0xff]  ;;  %v60_v38 = vld [vmem:[#allocation2 + $0x78] sm:$0xff] }
  0x12   :  { %719 = vmatmul.mubr.msk.bf16.vlgmr.msra.gmra.mrb[0].mxu0 %vm172_vm2, %v776_v5  ;;  %743 = vmatmul.mubr.msk.bf16.vlgmr.msra.gmra.mrb[0].mxu1 %vm172_vm2, %v777_v6 }
  0x13   :  { %722 = vmatprep.mubr.msk.bf16.mxu0 %vm788_vm1, %v787_v0  ;;  %746 = vmatprep.mubr.msk.bf16.mxu1 %vm788_vm1, %v787_v0 }
  0x1a   :  { %723 = vmatmul.mubr.msk.bf16.gmra.mrb[4].mxu0 %vm172_vm2, %v778_v7  ;;  %747 = vmatmul.mubr.msk.bf16.gmra.mrb[4].mxu1 %vm172_vm2, %v779_v8  ;;  %v61_v8 = vld [vmem:[#allocation2 + $0x80] sm:$0xff] }
  0x1b   :  { %726 = vmatprep.mubr.msk.bf16.mxu0 %vm788_vm1, %v787_v0  ;;  %750 = vmatprep.mubr.msk.bf16.mxu1 %vm788_vm1, %v787_v0 }
  0x22   :  { %727 = vmatmul.mubr.msk.bf16.gmra.mrb[8].mxu0 %vm172_vm2, %v780_v9  ;;  %751 = vmatmul.mubr.msk.bf16.gmra.mrb[8].mxu1 %vm172_vm2, %v781_v10 }
  0x23   :  { %730 = vmatprep.mubr.msk.bf16.mxu0 %vm788_vm1, %v787_v0  ;;  %754 = vmatprep.mubr.msk.bf16.mxu1 %vm788_vm1, %v787_v0 }
  0x2a   :  { %731 = vmatmul.mubr.msk.bf16.gmra.mrb[12].mxu0 %vm172_vm2, %v782_v11  ;;  %755 = vmatmul.mubr.msk.bf16.gmra.mrb[12].mxu1 %vm172_vm2, %v783_v12 }
  0x2b   :  { %734 = vmatprep.mubr.msk.bf16.mxu0 %vm788_vm1, %v787_v0  ;;  %758 = vmatprep.mubr.msk.bf16.mxu1 %vm788_vm1, %v787_v0 }
  0x32   :  { %735 = vmatmul.mubr.msk.bf16.gmra.mrb[16].mxu0 %vm172_vm2, %v784_v13  ;;  %759 = vmatmul.mubr.msk.bf16.gmra.mrb[16].mxu1 %vm172_vm2, %v785_v14 }
  0x33   :  { %738 = vmatprep.mubr.msk.bf16.mxu0 %vm788_vm1, %v787_v0 }
  0x3a   :  { %739 = vmatmul.mubr.msk.bf16.gmra.mrb[20].mxu0 %vm172_vm2, %v786_v15 }
  0xe5   :  { %v240_v18 = vpop.f32.mrb[0].mxu0  ;;  %v288_v20 = vpop.f32.mrb[0].mxu1 }
  0xe6   :  { %v326_v22 = vadd.f32 %v240_v18, %v45_v16  ;;  %v720_v23 = vpop.f32.mrb[1].mxu0  ;;  %v338_v24 = vadd.f32 %v288_v20, %v57_v17  ;;  %v744_v25 = vpop.f32.mrb[1].mxu1 }
  0xe7   :  { %v243_v26 = vpop.f32.mrb[2].mxu0  ;;  %v291_v27 = vpop.f32.mrb[2].mxu1 }
  0xe8   :  { %348 = vst.msk [vmem:[#allocation2] sm:$0xff] %vm22_vm0, %v326_v22  ;;  %v327_v28 = vadd.f32 %v243_v26, %v46_v19  ;;  %v721_v29 = vpop.f32.mrb[3].mxu0  ;;  %360 = vst.msk [vmem:[#allocation2 + $0x60] sm:$0xff] %vm22_vm0, %v338_v24  ;;  %v339_v30 = vadd.f32 %v291_v27, %v58_v21  ;;  %v745_v31 = vpop.f32.mrb[3].mxu1  ;;  %v62_v21 = vld [vmem:[#allocation2 + $0x88] sm:$0xff] }
  0xea   :  { %349 = vst.msk [vmem:[#allocation2 + $0x8] sm:$0xff] %vm22_vm0, %v327_v28  ;;  %361 = vst.msk [vmem:[#allocation2 + $0x68] sm:$0xff] %vm22_vm0, %v339_v30 }
  0xed   :  { %v248_v35 = vpop.f32.mrb[4].mxu0  ;;  %v296_v37 = vpop.f32.mrb[4].mxu1 }
  0xee   :  { %v328_v39 = vadd.f32 %v248_v35, %v47_v32  ;;  %v724_v40 = vpop.f32.mrb[5].mxu0  ;;  %v340_v41 = vadd.f32 %v296_v37, %v59_v33  ;;  %v748_v42 = vpop.f32.mrb[5].mxu1 }
  0xef   :  { %v373_v43 = vld [vmem:[#allocation2] sm:$0xff]  ;;  %v251_v46 = vpop.f32.mrb[6].mxu0  ;;  %v299_v47 = vpop.f32.mrb[6].mxu1 }
  0xf0   :  { %v385_v45 = vld [vmem:[#allocation2 + $0x60] sm:$0xff]  ;;  %v401_v48 = vmul.f32 %v949_v34, %v373_v43  ;;  %350 = vst.msk [vmem:[#allocation2 + $0x10] sm:$0xff] %vm22_vm0, %v328_v39  ;;  %v329_v50 = vadd.f32 %v251_v46, %v48_v36  ;;  %v725_v51 = vpop.f32.mrb[7].mxu0  ;;  %362 = vst.msk [vmem:[#allocation2 + $0x70] sm:$0xff] %vm22_vm0, %v340_v41  ;;  %v341_v52 = vadd.f32 %v299_v47, %v60_v38  ;;  %v749_v53 = vpop.f32.mrb[7].mxu1  ;;  %v51_v36 = vld [vmem:[#allocation2 + $0x30] sm:$0xff] }
  0xf1   :  { %v413_v49 = vmul.f32 %v949_v34, %v385_v45  ;;  %v374_v54 = vld [vmem:[#allocation2 + $0x8] sm:$0xff]  ;;  %v52_v43 = vld [vmem:[#allocation2 + $0x38] sm:$0xff]  ;;  %v63_v45 = vld [vmem:[#allocation2 + $0x90] sm:$0xff] }
  0xf2   :  { %v386_v55 = vld [vmem:[#allocation2 + $0x68] sm:$0xff]  ;;  %v429_v56 = vadd.f32 %v954_v44, %v401_v48  ;;  %v402_v57 = vmul.f32 %v949_v34, %v374_v54  ;;  %351 = vst.msk [vmem:[#allocation2 + $0x18] sm:$0xff] %vm22_vm0, %v329_v50  ;;  %363 = vst.msk [vmem:[#allocation2 + $0x78] sm:$0xff] %vm22_vm0, %v341_v52  ;;  %v64_v52 = vld [vmem:[#allocation2 + $0x98] sm:$0xff] }
  0xf3   :  { %v441_v58 = vadd.f32 %v954_v44, %v413_v49  ;;  %v414_v59 = vmul.f32 %v949_v34, %v386_v55 }
  0xf4   :  { %vm450_vm4 = vcmp.ge.f32.partialorder %v429_v56, 0.0  ;;  %v471_v61 = vmul.f32 0.2, %v429_v56  ;;  %v430_v62 = vadd.f32 %v954_v44, %v402_v57 }
  0xf5   :  { %vm462_vm5 = vcmp.ge.f32.partialorder %v441_v58, 0.0  ;;  %v483_v63 = vmul.f32 0.2, %v441_v58  ;;  %v442_v0 = vadd.f32 %v954_v44, %v414_v59  ;;  %v256_v1 = vpop.f32.mrb[8].mxu0  ;;  %v304_v3 = vpop.f32.mrb[8].mxu1 }
  0xf6   :  { %v492_v4 = vsel %vm450_vm4, %v429_v56, %v471_v61  ;;  %vm451_vm7 = vcmp.ge.f32.partialorder %v430_v62, 0.0  ;;  %v472_v5 = vmul.f32 0.2, %v430_v62  ;;  %v330_v6 = vadd.f32 %v256_v1, %v49_v60  ;;  %v728_v7 = vpop.f32.mrb[9].mxu0  ;;  %v752_v9 = vpop.f32.mrb[9].mxu1 }
  0xf7   :  { %v674_v10 = vpack.c.bf16 %v492_v4, %v492_v4  ;;  %v504_v11 = vsel %vm462_vm5, %v441_v58, %v483_v63  ;;  %v375_v12 = vld [vmem:[#allocation2 + $0x10] sm:$0xff]  ;;  %vm463_vm8 = vcmp.ge.f32.partialorder %v442_v0, 0.0  ;;  %v484_v13 = vmul.f32 0.2, %v442_v0  ;;  %v259_v15 = vpop.f32.mrb[10].mxu0  ;;  %v307_v22 = vpop.f32.mrb[10].mxu1 }
  0xf8   :  { %v387_v14 = vld [vmem:[#allocation2 + $0x70] sm:$0xff]  ;;  %v493_v16 = vsel %vm451_vm7, %v430_v62, %v472_v5  ;;  %v686_v17 = vpack.c.bf16 %v504_v11, %v504_v11  ;;  %v403_v18 = vmul.f32 %v949_v34, %v375_v12  ;;  %352 = vst.msk [vmem:[#allocation2 + $0x20] sm:$0xff] %vm22_vm0, %v330_v6  ;;  %v729_v20 = vpop.f32.mrb[11].mxu0  ;;  %v331_v27 = vadd.f32 %v259_v15, %v50_v2  ;;  %v753_v29 = vpop.f32.mrb[11].mxu1  ;;  %v53_v11 = vld [vmem:[#allocation2 + $0x40] sm:$0xff] }
  0xf9   :  { %v415_v19 = vmul.f32 %v949_v34, %v387_v14  ;;  %599 = vst.msk [vmem:[%s1106_s4] sm:$0xf] %vm598_vm6, %v674_v10  ;;  %v675_v23 = vpack.c.bf16 %v493_v16, %v493_v16  ;;  %v505_v24 = vsel %vm463_vm8, %v442_v0, %v484_v13  ;;  %v376_v25 = vld [vmem:[#allocation2 + $0x18] sm:$0xff]  ;;  %v342_v28 = vadd.f32 %v304_v3, %v61_v8  ;;  %v65_v12 = vld [vmem:[#allocation2 + $0xa0] sm:$0x3] }
  0xfa   :  { %v388_v26 = vld [vmem:[#allocation2 + $0x78] sm:$0xff]  ;;  %611 = vst.msk [vmem:[%s1106_s4 + $0x30] sm:$0xf] %vm598_vm6, %v686_v17  ;;  %v431_v30 = vadd.f32 %v954_v44, %v403_v18  ;;  %v687_v31 = vpack.c.bf16 %v505_v24, %v505_v24  ;;  %v404_v32 = vmul.f32 %v949_v34, %v376_v25  ;;  %v343_v37 = vadd.f32 %v307_v22, %v62_v21 }
  0xfb   :  { %v443_v33 = vadd.f32 %v954_v44, %v415_v19  ;;  %600 = vst.msk [vmem:[%s1106_s4 + $0x4] sm:$0xf] %vm598_vm6, %v675_v23  ;;  %v416_v35 = vmul.f32 %v949_v34, %v388_v26  ;;  %v54_v19 = vld [vmem:[#allocation2 + $0x48] sm:$0xff] }
  0xfc   :  { %353 = vst.msk [vmem:[#allocation2 + $0x28] sm:$0xff] %vm22_vm0, %v331_v27  ;;  %364 = vst.msk [vmem:[#allocation2 + $0x80] sm:$0xff] %vm22_vm0, %v342_v28  ;;  %vm452_vm9 = vcmp.ge.f32.partialorder %v431_v30, 0.0  ;;  %v473_v38 = vmul.f32 0.2, %v431_v30  ;;  %v432_v39 = vadd.f32 %v954_v44, %v404_v32 }
  0xfd   :  { %612 = vst.msk [vmem:[%s1106_s4 + $0x34] sm:$0xf] %vm598_vm6, %v687_v31  ;;  %vm464_vm10 = vcmp.ge.f32.partialorder %v443_v33, 0.0  ;;  %v485_v40 = vmul.f32 0.2, %v443_v33  ;;  %v444_v41 = vadd.f32 %v954_v44, %v416_v35  ;;  %v264_v42 = vpop.f32.mrb[12].mxu0 }
  0xfe   :  { %365 = vst.msk [vmem:[#allocation2 + $0x88] sm:$0xff] %vm22_vm0, %v343_v37  ;;  %v312_v46 = vpop.f32.mrb[12].mxu1  ;;  %v494_v47 = vsel %vm452_vm9, %v431_v30, %v473_v38  ;;  %vm453_vm11 = vcmp.ge.f32.partialorder %v432_v39, 0.0  ;;  %v474_v48 = vmul.f32 0.2, %v432_v39  ;;  %v332_v49 = vadd.f32 %v264_v42, %v51_v36  ;;  %v732_v50 = vpop.f32.mrb[13].mxu0 }
  0xff   :  { %v756_v51 = vpop.f32.mrb[13].mxu1  ;;  %v676_v53 = vpack.c.bf16 %v494_v47, %v494_v47  ;;  %v506_v54 = vsel %vm464_vm10, %v443_v33, %v485_v40  ;;  %v377_v55 = vld [vmem:[#allocation2 + $0x20] sm:$0xff]  ;;  %vm465_vm12 = vcmp.ge.f32.partialorder %v444_v41, 0.0  ;;  %v486_v56 = vmul.f32 0.2, %v444_v41  ;;  %v267_v57 = vpop.f32.mrb[14].mxu0 }
 0x100   :  { %v315_v58 = vpop.f32.mrb[14].mxu1  ;;  %v495_v59 = vsel %vm453_vm11, %v432_v39, %v474_v48  ;;  %v688_v60 = vpack.c.bf16 %v506_v54, %v506_v54  ;;  %v405_v61 = vmul.f32 %v949_v34, %v377_v55  ;;  %354 = vst.msk [vmem:[#allocation2 + $0x30] sm:$0xff] %vm22_vm0, %v332_v49  ;;  %v333_v62 = vadd.f32 %v267_v57, %v52_v43  ;;  %v733_v63 = vpop.f32.mrb[15].mxu0  ;;  %v55_v50 = vld [vmem:[#allocation2 + $0x50] sm:$0xff] }
 0x101   :  { %v757_v0 = vpop.f32.mrb[15].mxu1  ;;  %601 = vst.msk [vmem:[%s1106_s4 + $0x8] sm:$0xf] %vm598_vm6, %v676_v53  ;;  %v677_v1 = vpack.c.bf16 %v495_v59, %v495_v59  ;;  %v507_v2 = vsel %vm465_vm12, %v444_v41, %v486_v56  ;;  %v344_v3 = vadd.f32 %v312_v46, %v63_v45  ;;  %v345_v4 = vadd.f32 %v315_v58, %v64_v52 }
 0x102   :  { %613 = vst.msk [vmem:[%s1106_s4 + $0x38] sm:$0xf] %vm598_vm6, %v688_v60  ;;  %v433_v5 = vadd.f32 %v954_v44, %v405_v61  ;;  %v689_v6 = vpack.c.bf16 %v507_v2, %v507_v2  ;;  %vm619_vm9 = vcmask 253952  }
 0x103   :  { %v378_v7 = vld [vmem:[#allocation2 + $0x28] sm:$0xff]  ;;  %v389_v8 = vld [vmem:[#allocation2 + $0x80] sm:$0xff]  ;;  %355 = vst.msk [vmem:[#allocation2 + $0x38] sm:$0xff] %vm22_vm0, %v333_v62  ;;  %366 = vst.msk [vmem:[#allocation2 + $0x90] sm:$0xff] %vm22_vm0, %v344_v3 }
 0x104   :  { %602 = vst.msk [vmem:[%s1106_s4 + $0xc] sm:$0xf] %vm598_vm6, %v677_v1  ;;  %v406_v9 = vmul.f32 %v949_v34, %v378_v7  ;;  %v417_v10 = vmul.f32 %v949_v34, %v389_v8  ;;  %vm454_vm13 = vcmp.ge.f32.partialorder %v433_v5, 0.0  ;;  %v475_v13 = vmul.f32 0.2, %v433_v5  ;;  %v56_v62 = vld [vmem:[#allocation2 + $0x58] sm:$0xff] }
 0x105   :  { %367 = vst.msk [vmem:[#allocation2 + $0x98] sm:$0xff] %vm22_vm0, %v345_v4  ;;  %v390_v14 = vld [vmem:[#allocation2 + $0x88] sm:$0xff]  ;;  %v272_v18 = vpop.f32.mrb[16].mxu0  ;;  %v320_v20 = vpop.f32.mrb[16].mxu1 }
 0x106   :  { %614 = vst.msk [vmem:[%s1106_s4 + $0x3c] sm:$0xf] %vm598_vm6, %v689_v6  ;;  %v434_v15 = vadd.f32 %v954_v44, %v406_v9  ;;  %v445_v16 = vadd.f32 %v954_v44, %v417_v10  ;;  %v418_v17 = vmul.f32 %v949_v34, %v390_v14  ;;  %v496_v21 = vsel %vm454_vm13, %v433_v5, %v475_v13  ;;  %v736_v23 = vpop.f32.mrb[17].mxu0  ;;  %v760_v25 = vpop.f32.mrb[17].mxu1 }
 0x107   :  { %v334_v22 = vadd.f32 %v272_v18, %v53_v11  ;;  %v346_v24 = vadd.f32 %v320_v20, %v65_v12  ;;  %v678_v26 = vpack.c.bf16 %v496_v21, %v496_v21  ;;  %v379_v28 = vld [vmem:[#allocation2 + $0x30] sm:$0xff]  ;;  %v275_v29 = vpop.f32.mrb[18].mxu0  ;;  %v323_v36 = vpop.f32.mrb[18].mxu1 }
 0x108   :  { %vm455_vm14 = vcmp.ge.f32.partialorder %v434_v15, 0.0  ;;  %v476_v27 = vmul.f32 0.2, %v434_v15  ;;  %vm466_vm15 = vcmp.ge.f32.partialorder %v445_v16, 0.0  ;;  %v487_v30 = vmul.f32 0.2, %v445_v16 }
 0x109   :  { %v407_v31 = vmul.f32 %v949_v34, %v379_v28  ;;  %v446_v32 = vadd.f32 %v954_v44, %v418_v17  ;;  %356 = vst.msk [vmem:[#allocation2 + $0x40] sm:$0xff] %vm22_vm0, %v334_v22  ;;  %v335_v33 = vadd.f32 %v275_v29, %v54_v19  ;;  %v737_v35 = vpop.f32.mrb[19].mxu0  ;;  %v761_v39 = vpop.f32.mrb[19].mxu1 }
 0x10a   :  { %369 = vst.msk [vmem:[#allocation2 + $0xa0] sm:$0x3] %vm43_vm3, %v346_v24  ;;  %v497_v37 = vsel %vm455_vm14, %v434_v15, %v476_v27  ;;  %v380_v38 = vld [vmem:[#allocation2 + $0x38] sm:$0xff]  ;;  %v508_v41 = vsel %vm466_vm15, %v445_v16, %v487_v30  ;;  %v391_v43 = vld [vmem:[#allocation2 + $0x90] sm:$0xff] }
 0x10b   :  { %603 = vst.msk [vmem:[%s1106_s4 + $0x10] sm:$0xf] %vm598_vm6, %v678_v26  ;;  %v679_v40 = vpack.c.bf16 %v497_v37, %v497_v37  ;;  %v435_v42 = vadd.f32 %v954_v44, %v407_v31  ;;  %vm467_vm1 = vcmp.ge.f32.partialorder %v446_v32, 0.0  ;;  %v690_v46 = vpack.c.bf16 %v508_v41, %v508_v41 }
 0x10c   :  { %v392_v45 = vld [vmem:[#allocation2 + $0x98] sm:$0xff]  ;;  %357 = vst.msk [vmem:[#allocation2 + $0x48] sm:$0xff] %vm22_vm0, %v335_v33  ;;  %v488_v47 = vmul.f32 0.2, %v446_v32  ;;  %v408_v48 = vmul.f32 %v949_v34, %v380_v38  ;;  %v419_v49 = vmul.f32 %v949_v34, %v391_v43 }
 0x10d   :  { %604 = vst.msk [vmem:[%s1106_s4 + $0x14] sm:$0xf] %vm598_vm6, %v679_v40  ;;  %vm456_vm2 = vcmp.ge.f32.partialorder %v435_v42, 0.0  ;;  %v477_v51 = vmul.f32 0.2, %v435_v42  ;;  %v420_v52 = vmul.f32 %v949_v34, %v392_v45  ;;  %v280_v56 = vpop.f32.mrb[20].mxu0 }
 0x10e   :  { %615 = vst.msk [vmem:[%s1106_s4 + $0x40] sm:$0xf] %vm598_vm6, %v690_v46  ;;  %v509_v53 = vsel %vm467_vm1, %v446_v32, %v488_v47  ;;  %v436_v54 = vadd.f32 %v954_v44, %v408_v48  ;;  %v447_v55 = vadd.f32 %v954_v44, %v419_v49  ;;  %v336_v60 = vadd.f32 %v280_v56, %v55_v50  ;;  %v740_v61 = vpop.f32.mrb[21].mxu0 }
 0x10f   :  { %v498_v57 = vsel %vm456_vm2, %v435_v42, %v477_v51  ;;  %v691_v58 = vpack.c.bf16 %v509_v53, %v509_v53  ;;  %v448_v59 = vadd.f32 %v954_v44, %v420_v52  ;;  %v283_v2 = vpop.f32.mrb[22].mxu0 }
 0x110   :  { %v680_v63 = vpack.c.bf16 %v498_v57, %v498_v57  ;;  %vm457_vm3 = vcmp.ge.f32.partialorder %v436_v54, 0.0  ;;  %v478_v0 = vmul.f32 0.2, %v436_v54  ;;  %vm468_vm4 = vcmp.ge.f32.partialorder %v447_v55, 0.0  ;;  %v381_v1 = vld [vmem:[#allocation2 + $0x40] sm:$0xff]  ;;  %358 = vst.msk [vmem:[#allocation2 + $0x50] sm:$0xff] %vm22_vm0, %v336_v60 }
 0x111   :  { %616 = vst.msk [vmem:[%s1106_s4 + $0x44] sm:$0xf] %vm598_vm6, %v691_v58  ;;  %v489_v3 = vmul.f32 0.2, %v447_v55  ;;  %v409_v4 = vmul.f32 %v949_v34, %v381_v1  ;;  %vm469_vm5 = vcmp.ge.f32.partialorder %v448_v59, 0.0  ;;  %v741_v6 = vpop.f32.mrb[23].mxu0  ;;  %v337_v10 = vadd.f32 %v283_v2, %v56_v62 }
 0x112   :  { %v490_v5 = vmul.f32 0.2, %v448_v59  ;;  %605 = vst.msk [vmem:[%s1106_s4 + $0x18] sm:$0xf] %vm598_vm6, %v680_v63  ;;  %v499_v7 = vsel %vm457_vm3, %v436_v54, %v478_v0  ;;  %v393_v9 = vld [vmem:[#allocation2 + $0xa0] sm:$0x3] }
 0x113   :  { %v382_v8 = vld [vmem:[#allocation2 + $0x48] sm:$0xff]  ;;  %v681_v11 = vpack.c.bf16 %v499_v7, %v499_v7  ;;  %v510_v12 = vsel %vm468_vm4, %v447_v55, %v489_v3  ;;  %v437_v13 = vadd.f32 %v954_v44, %v409_v4  ;;  %v421_v18 = vmul.f32 %v949_v34, %v393_v9  ;;  %359 = vst.msk [vmem:[#allocation2 + $0x58] sm:$0xff] %vm22_vm0, %v337_v10 }
 0x114   :  { %v511_v14 = vsel %vm469_vm5, %v448_v59, %v490_v5  ;;  %v692_v15 = vpack.c.bf16 %v510_v12, %v510_v12  ;;  %v410_v17 = vmul.f32 %v949_v34, %v382_v8 }
 0x115   :  { %v693_v16 = vpack.c.bf16 %v511_v14, %v511_v14  ;;  %606 = vst.msk [vmem:[%s1106_s4 + $0x1c] sm:$0xf] %vm598_vm6, %v681_v11  ;;  %vm458_vm7 = vcmp.ge.f32.partialorder %v437_v13, 0.0  ;;  %v479_v19 = vmul.f32 0.2, %v437_v13  ;;  %v449_v21 = vadd.f32 %v954_v44, %v421_v18 }
 0x116   :  { %617 = vst.msk [vmem:[%s1106_s4 + $0x48] sm:$0xf] %vm598_vm6, %v692_v15  ;;  %v438_v20 = vadd.f32 %v954_v44, %v410_v17 }
 0x117   :  { %618 = vst.msk [vmem:[%s1106_s4 + $0x4c] sm:$0xf] %vm598_vm6, %v693_v16  ;;  %v500_v22 = vsel %vm458_vm7, %v437_v13, %v479_v19  ;;  %vm470_vm8 = vcmp.ge.f32.partialorder %v449_v21, 0.0  ;;  %v383_v25 = vld [vmem:[#allocation2 + $0x50] sm:$0xff]  ;;  %v491_v26 = vmul.f32 0.2, %v449_v21 }
 0x118   :  { %v682_v23 = vpack.c.bf16 %v500_v22, %v500_v22  ;;  %vm459_vm0 = vcmp.ge.f32.partialorder %v438_v20, 0.0  ;;  %v480_v24 = vmul.f32 0.2, %v438_v20  ;;  %v411_v27 = vmul.f32 %v949_v34, %v383_v25 }
 0x119   :  { %v512_v30 = vsel %vm470_vm8, %v449_v21, %v491_v26 }
 0x11a   :  { %607 = vst.msk [vmem:[%s1106_s4 + $0x20] sm:$0xf] %vm598_vm6, %v682_v23  ;;  %v501_v28 = vsel %vm459_vm0, %v438_v20, %v480_v24  ;;  %v439_v31 = vadd.f32 %v954_v44, %v411_v27  ;;  %v384_v32 = vld [vmem:[#allocation2 + $0x58] sm:$0xff]  ;;  %v694_v33 = vpack.c.bf16 %v512_v30, %v512_v30 }
 0x11b   :  { %v683_v29 = vpack.c.bf16 %v501_v28, %v501_v28  ;;  %v412_v35 = vmul.f32 %v949_v34, %v384_v32 }
 0x11c   :  { %vm460_vm10 = vcmp.ge.f32.partialorder %v439_v31, 0.0  ;;  %v481_v36 = vmul.f32 0.2, %v439_v31  ;;  %620 = vst.msk [vmem:[%s1106_s4 + $0x50] sm:$0x1] %vm619_vm9, %v694_v33 }
 0x11d   :  { %608 = vst.msk [vmem:[%s1106_s4 + $0x24] sm:$0xf] %vm598_vm6, %v683_v29  ;;  %v440_v37 = vadd.f32 %v954_v44, %v412_v35 }
 0x11e   :  { %v502_v38 = vsel %vm460_vm10, %v439_v31, %v481_v36 }
 0x11f   :  { %v684_v39 = vpack.c.bf16 %v502_v38, %v502_v38  ;;  %vm461_vm11 = vcmp.ge.f32.partialorder %v440_v37, 0.0  ;;  %v482_v40 = vmul.f32 0.2, %v440_v37 }
 0x121   :  { %609 = vst.msk [vmem:[%s1106_s4 + $0x28] sm:$0xf] %vm598_vm6, %v684_v39  ;;  %v503_v34 = vsel %vm461_vm11, %v440_v37, %v482_v40 }
 0x122   :  { %v685_v41 = vpack.c.bf16 %v503_v34, %v503_v34 }
 0x124   :  { %610 = vst.msk [vmem:[%s1106_s4 + $0x2c] sm:$0xf] %vm598_vm6, %v685_v41 }

// kernel: _lambda_.15
= control target key start
LH: loop header
LB: loop body
LE: loop exit
PB: predicated region body
PF: predicated region fallthrough
CT: control target
= control target key end

     0   :  { %v1878_v0 = vmov 0.0   ;;  %vm1879_vm0 = vmmov 0   ;;  %vm442_vm1 = vcmask 261120   ;;  %vm22_vm2 = vcmask 97280   ;;  %s2814_s1 = inlined_call_operand.vmem [shape: bf16[32,12], index: 1, kind: input, shape index: {}]   ;;  %s2815_s0 = inlined_call_operand.vmem [shape: bf16[578,32], index: 0, kind: input, shape index: {}]   ;;  %s2816_s2 = inlined_call_operand.vmem [shape: f32[1,12], index: 2, kind: input, shape index: {}]   ;;  %s2817_s3 = inlined_call_operand.vmem [shape: f32[1,12], index: 3, kind: input, shape index: {}]   ;;  %s2818_s4 = inlined_call_operand.vmem [shape: f32[578,12], index: 4, kind: output, shape index: {}]  }
   0x1   :  { %1533 = vmatprep.subr.bf16.mxu0 %v1878_v0  ;;  %v1691_v1 = vld [vmem:[%s2814_s1] sm:$0xff]   ;;  %1685 = vmatprep.subr.bf16.mxu1 %v1878_v0  ;;  %v1692_v2 = vld [vmem:[%s2814_s1 + $0x8] sm:$0xff]   ;;  %v1694_v4 = vld [vmem:[%s2815_s0 + $0x98] sm:$0xff]   ;;  %23 = vst.msk [vmem:[#allocation2] sm:$0xff] %vm22_vm2, %v1878_v0  ;;  %vm95_vm3 = vcmask 91136  }
   0x2   :  { %1537 = vmatprep.mubr.msk.bf16.mxu0 %vm1879_vm0, %v1878_v0  ;;  %1613 = vmatprep.mubr.msk.bf16.mxu1 %vm1879_vm0, %v1878_v0  ;;  %v1693_v3 = vld [vmem:[%s2815_s0] sm:$0xff]   ;;  %v1695_v5 = vld [vmem:[%s2815_s0 + $0x8] sm:$0xff]   ;;  %v1697_v7 = vld [vmem:[%s2815_s0 + $0x10] sm:$0xff]   ;;  %24 = vst.msk [vmem:[#allocation2 + $0x8] sm:$0xff] %vm22_vm2, %v1878_v0 }
   0x3   :  { %1534 = vmatpush3.bf16.msra.mxu0 %v1691_v1  ;;  %1687 = vmatpush3.bf16.msra.mxu1 %v1691_v1  ;;  %v1696_v6 = vld [vmem:[%s2815_s0 + $0xa0] sm:$0xff]   ;;  %v1698_v8 = vld [vmem:[%s2815_s0 + $0xa8] sm:$0xff]   ;;  %25 = vst.msk [vmem:[#allocation2 + $0x10] sm:$0xff] %vm22_vm2, %v1878_v0  ;;  %26 = vst.msk [vmem:[#allocation2 + $0x18] sm:$0xff] %vm22_vm2, %v1878_v0 }
   0x4   :  { %1535 = vmatprep.subr.bf16.mxu0 %v1878_v0  ;;  %1686 = vmatprep.subr.bf16.mxu1 %v1878_v0  ;;  %27 = vst.msk [vmem:[#allocation2 + $0x20] sm:$0xff] %vm22_vm2, %v1878_v0  ;;  %28 = vst.msk [vmem:[#allocation2 + $0x28] sm:$0xff] %vm22_vm2, %v1878_v0  ;;  %v1699_v9 = vld [vmem:[%s2815_s0 + $0x18] sm:$0xff]   ;;  %v1700_v10 = vld [vmem:[%s2815_s0 + $0xb0] sm:$0xff]  }
   0x5   :  { %29 = vst.msk [vmem:[#allocation2 + $0x30] sm:$0xff] %vm22_vm2, %v1878_v0  ;;  %30 = vst.msk [vmem:[#allocation2 + $0x38] sm:$0xff] %vm22_vm2, %v1878_v0  ;;  %v1701_v11 = vld [vmem:[%s2815_s0 + $0x20] sm:$0xff]   ;;  %v1702_v12 = vld [vmem:[%s2815_s0 + $0xb8] sm:$0xff]  }
   0x6   :  { %31 = vst.msk [vmem:[#allocation2 + $0x40] sm:$0xff] %vm22_vm2, %v1878_v0  ;;  %32 = vst.msk [vmem:[#allocation2 + $0x48] sm:$0xff] %vm22_vm2, %v1878_v0  ;;  %v1703_v13 = vld [vmem:[%s2815_s0 + $0x28] sm:$0xff]   ;;  %v1704_v14 = vld [vmem:[%s2815_s0 + $0xc0] sm:$0xff]  }
   0x7   :  { %1536 = vmatpush3.bf16.msra.mxu0 %v1692_v2  ;;  %1688 = vmatpush3.bf16.msra.mxu1 %v1692_v2  ;;  %33 = vst.msk [vmem:[#allocation2 + $0x50] sm:$0xff] %vm22_vm2, %v1878_v0  ;;  %34 = vst.msk [vmem:[#allocation2 + $0x58] sm:$0xff] %vm22_vm2, %v1878_v0  ;;  %v1705_v15 = vld [vmem:[%s2815_s0 + $0x30] sm:$0xff]   ;;  %v1706_v16 = vld [vmem:[%s2815_s0 + $0xc8] sm:$0xff]  }
   0x8   :  { %35 = vst.msk [vmem:[#allocation2 + $0x60] sm:$0xff] %vm22_vm2, %v1878_v0  ;;  %36 = vst.msk [vmem:[#allocation2 + $0x68] sm:$0xff] %vm22_vm2, %v1878_v0  ;;  %v1707_v17 = vld [vmem:[%s2815_s0 + $0x38] sm:$0xff]   ;;  %v1708_v18 = vld [vmem:[%s2815_s0 + $0xd0] sm:$0xff]  }
   0x9   :  { %37 = vst.msk [vmem:[#allocation2 + $0x70] sm:$0xff] %vm22_vm2, %v1878_v0  ;;  %38 = vst.msk [vmem:[#allocation2 + $0x78] sm:$0xff] %vm22_vm2, %v1878_v0  ;;  %v1709_v19 = vld [vmem:[%s2815_s0 + $0x40] sm:$0xff]   ;;  %v1710_v20 = vld [vmem:[%s2815_s0 + $0xd8] sm:$0xff]  }
   0xa   :  { %1538 = vmatmul.mubr.msk.bf16.vlgmr.msra.gmra.mrb[0].mxu0 %vm442_vm1, %v1693_v3  ;;  %1614 = vmatmul.mubr.msk.bf16.vlgmr.msra.gmra.mrb[0].mxu1 %vm442_vm1, %v1694_v4  ;;  %39 = vst.msk [vmem:[#allocation2 + $0x80] sm:$0xff] %vm22_vm2, %v1878_v0  ;;  %40 = vst.msk [vmem:[#allocation2 + $0x88] sm:$0xff] %vm22_vm2, %v1878_v0  ;;  %v1711_v21 = vld [vmem:[%s2815_s0 + $0x48] sm:$0xff]   ;;  %v1712_v22 = vld [vmem:[%s2815_s0 + $0xe0] sm:$0xff]  }
   0xb   :  { %1541 = vmatprep.mubr.msk.bf16.mxu0 %vm1879_vm0, %v1878_v0  ;;  %1617 = vmatprep.mubr.msk.bf16.mxu1 %vm1879_vm0, %v1878_v0  ;;  %41 = vst.msk [vmem:[#allocation2 + $0x90] sm:$0xff] %vm22_vm2, %v1878_v0  ;;  %42 = vst.msk [vmem:[#allocation2 + $0x98] sm:$0xff] %vm22_vm2, %v1878_v0  ;;  %v1713_v23 = vld [vmem:[%s2815_s0 + $0x50] sm:$0xff]   ;;  %v1714_v24 = vld [vmem:[%s2815_s0 + $0xe8] sm:$0xff]  }
   0xc   :  { %43 = vst.msk [vmem:[#allocation2 + $0xa0] sm:$0xff] %vm22_vm2, %v1878_v0  ;;  %44 = vst.msk [vmem:[#allocation2 + $0xa8] sm:$0xff] %vm22_vm2, %v1878_v0  ;;  %v1715_v25 = vld [vmem:[%s2815_s0 + $0x58] sm:$0xff]   ;;  %v1716_v26 = vld [vmem:[%s2815_s0 + $0xf0] sm:$0xff]  }
   0xd   :  { %45 = vst.msk [vmem:[#allocation2 + $0xb0] sm:$0xff] %vm22_vm2, %v1878_v0  ;;  %46 = vst.msk [vmem:[#allocation2 + $0xb8] sm:$0xff] %vm22_vm2, %v1878_v0  ;;  %v1717_v27 = vld [vmem:[%s2815_s0 + $0x60] sm:$0xff]   ;;  %v1718_v28 = vld [vmem:[%s2815_s0 + $0xf8] sm:$0xff]  }
   0xe   :  { %47 = vst.msk [vmem:[#allocation2 + $0xc0] sm:$0xff] %vm22_vm2, %v1878_v0  ;;  %48 = vst.msk [vmem:[#allocation2 + $0xc8] sm:$0xff] %vm22_vm2, %v1878_v0  ;;  %v1719_v29 = vld [vmem:[%s2815_s0 + $0x68] sm:$0xff]   ;;  %v1720_v30 = vld [vmem:[%s2815_s0 + $0x100] sm:$0xff]  }
   0xf   :  { %49 = vst.msk [vmem:[#allocation2 + $0xd0] sm:$0xff] %vm22_vm2, %v1878_v0  ;;  %50 = vst.msk [vmem:[#allocation2 + $0xd8] sm:$0xff] %vm22_vm2, %v1878_v0  ;;  %v1721_v31 = vld [vmem:[%s2815_s0 + $0x70] sm:$0xff]   ;;  %v1722_v32 = vld [vmem:[%s2815_s0 + $0x108] sm:$0xff]  }
  0x10   :  { %51 = vst.msk [vmem:[#allocation2 + $0xe0] sm:$0xff] %vm22_vm2, %v1878_v0  ;;  %52 = vst.msk [vmem:[#allocation2 + $0xe8] sm:$0xff] %vm22_vm2, %v1878_v0  ;;  %v1723_v33 = vld [vmem:[%s2815_s0 + $0x78] sm:$0xff]   ;;  %v1724_v34 = vld [vmem:[%s2815_s0 + $0x110] sm:$0xff]  }
  0x11   :  { %53 = vst.msk [vmem:[#allocation2 + $0xf0] sm:$0xff] %vm22_vm2, %v1878_v0  ;;  %54 = vst.msk [vmem:[#allocation2 + $0xf8] sm:$0xff] %vm22_vm2, %v1878_v0  ;;  %v1725_v35 = vld [vmem:[%s2815_s0 + $0x80] sm:$0xff]   ;;  %v1726_v36 = vld [vmem:[%s2815_s0 + $0x118] sm:$0xff]  }
  0x12   :  { %1542 = vmatmul.mubr.msk.bf16.gmra.mrb[4].mxu0 %vm442_vm1, %v1695_v5  ;;  %1618 = vmatmul.mubr.msk.bf16.gmra.mrb[4].mxu1 %vm442_vm1, %v1696_v6  ;;  %55 = vst.msk [vmem:[#allocation2 + $0x100] sm:$0xff] %vm22_vm2, %v1878_v0  ;;  %56 = vst.msk [vmem:[#allocation2 + $0x108] sm:$0xff] %vm22_vm2, %v1878_v0  ;;  %v1727_v37 = vld [vmem:[%s2815_s0 + $0x88] sm:$0xff]   ;;  %v1728_v38 = vld [vmem:[%s2815_s0 + $0x120] ss:$0 sps:$4 sm:$0x11]  }
  0x13   :  { %1545 = vmatprep.mubr.msk.bf16.mxu0 %vm1879_vm0, %v1878_v0  ;;  %1621 = vmatprep.mubr.msk.bf16.mxu1 %vm1879_vm0, %v1878_v0  ;;  %57 = vst.msk [vmem:[#allocation2 + $0x110] sm:$0xff] %vm22_vm2, %v1878_v0  ;;  %58 = vst.msk [vmem:[#allocation2 + $0x118] sm:$0xff] %vm22_vm2, %v1878_v0  ;;  %v1729_v39 = vld [vmem:[%s2815_s0 + $0x90] sm:$0xff]   ;;  %v97_v40 = vld [vmem:[#allocation2] sm:$0xff] }
  0x14   :  { %59 = vst.msk [vmem:[#allocation2 + $0x120] sm:$0xff] %vm22_vm2, %v1878_v0  ;;  %60 = vst.msk [vmem:[#allocation2 + $0x128] sm:$0xff] %vm22_vm2, %v1878_v0  ;;  %v98_v43 = vld [vmem:[#allocation2 + $0x8] sm:$0xff]  ;;  %v99_v56 = vld [vmem:[#allocation2 + $0x10] sm:$0xff] }
  0x15   :  { %61 = vst.msk [vmem:[#allocation2 + $0x130] sm:$0xff] %vm22_vm2, %v1878_v0  ;;  %62 = vst.msk [vmem:[#allocation2 + $0x138] sm:$0xff] %vm22_vm2, %v1878_v0  ;;  %v2288_v58 = vld [vmem:[%s2816_s2] ss:$0 sm:$0xff]  ;;  %v100_v60 = vld [vmem:[#allocation2 + $0x18] sm:$0xff] }
  0x16   :  { %63 = vst.msk [vmem:[#allocation2 + $0x140] sm:$0xff] %vm22_vm2, %v1878_v0  ;;  %64 = vst.msk [vmem:[#allocation2 + $0x148] sm:$0xff] %vm22_vm2, %v1878_v0  ;;  %v2293_v63 = vld [vmem:[%s2817_s3] ss:$0 sm:$0xff] }
  0x17   :  { %65 = vst.msk [vmem:[#allocation2 + $0x150] sm:$0xff] %vm22_vm2, %v1878_v0  ;;  %66 = vst.msk [vmem:[#allocation2 + $0x158] sm:$0xff] %vm22_vm2, %v1878_v0 }
  0x18   :  { %67 = vst.msk [vmem:[#allocation2 + $0x160] sm:$0xff] %vm22_vm2, %v1878_v0  ;;  %68 = vst.msk [vmem:[#allocation2 + $0x168] sm:$0xff] %vm22_vm2, %v1878_v0 }
  0x19   :  { %69 = vst.msk [vmem:[#allocation2 + $0x170] sm:$0xff] %vm22_vm2, %v1878_v0  ;;  %70 = vst.msk [vmem:[#allocation2 + $0x178] sm:$0xff] %vm22_vm2, %v1878_v0 }
  0x1a   :  { %1546 = vmatmul.mubr.msk.bf16.gmra.mrb[8].mxu0 %vm442_vm1, %v1697_v7  ;;  %1622 = vmatmul.mubr.msk.bf16.gmra.mrb[8].mxu1 %vm442_vm1, %v1698_v8  ;;  %71 = vst.msk [vmem:[#allocation2 + $0x180] sm:$0xff] %vm22_vm2, %v1878_v0  ;;  %72 = vst.msk [vmem:[#allocation2 + $0x188] sm:$0xff] %vm22_vm2, %v1878_v0 }
  0x1b   :  { %1549 = vmatprep.mubr.msk.bf16.mxu0 %vm1879_vm0, %v1878_v0  ;;  %1625 = vmatprep.mubr.msk.bf16.mxu1 %vm1879_vm0, %v1878_v0  ;;  %73 = vst.msk [vmem:[#allocation2 + $0x190] sm:$0xff] %vm22_vm2, %v1878_v0  ;;  %74 = vst.msk [vmem:[#allocation2 + $0x198] sm:$0xff] %vm22_vm2, %v1878_v0 }
  0x1c   :  { %75 = vst.msk [vmem:[#allocation2 + $0x1a0] sm:$0xff] %vm22_vm2, %v1878_v0  ;;  %76 = vst.msk [vmem:[#allocation2 + $0x1a8] sm:$0xff] %vm22_vm2, %v1878_v0  ;;  %v135_v41 = vld [vmem:[#allocation2 + $0x130] sm:$0xff]  ;;  %v136_v45 = vld [vmem:[#allocation2 + $0x138] sm:$0xff] }
  0x1d   :  { %77 = vst.msk [vmem:[#allocation2 + $0x1b0] sm:$0xff] %vm22_vm2, %v1878_v0  ;;  %78 = vst.msk [vmem:[#allocation2 + $0x1b8] sm:$0xff] %vm22_vm2, %v1878_v0  ;;  %v137_v57 = vld [vmem:[#allocation2 + $0x140] sm:$0xff]  ;;  %v138_v62 = vld [vmem:[#allocation2 + $0x148] sm:$0xff] }
  0x1e   :  { %79 = vst.msk [vmem:[#allocation2 + $0x1c0] sm:$0xff] %vm22_vm2, %v1878_v0  ;;  %80 = vst.msk [vmem:[#allocation2 + $0x1c8] sm:$0xff] %vm22_vm2, %v1878_v0 }
  0x1f   :  { %81 = vst.msk [vmem:[#allocation2 + $0x1d0] sm:$0xff] %vm22_vm2, %v1878_v0  ;;  %82 = vst.msk [vmem:[#allocation2 + $0x1d8] sm:$0xff] %vm22_vm2, %v1878_v0 }
  0x20   :  { %83 = vst.msk [vmem:[#allocation2 + $0x1e0] sm:$0xff] %vm22_vm2, %v1878_v0  ;;  %84 = vst.msk [vmem:[#allocation2 + $0x1e8] sm:$0xff] %vm22_vm2, %v1878_v0 }
  0x21   :  { %85 = vst.msk [vmem:[#allocation2 + $0x1f0] sm:$0xff] %vm22_vm2, %v1878_v0  ;;  %86 = vst.msk [vmem:[#allocation2 + $0x1f8] sm:$0xff] %vm22_vm2, %v1878_v0 }
  0x22   :  { %87 = vst.msk [vmem:[#allocation2 + $0x200] sm:$0xff] %vm22_vm2, %v1878_v0  ;;  %88 = vst.msk [vmem:[#allocation2 + $0x208] sm:$0xff] %vm22_vm2, %v1878_v0  ;;  %1550 = vmatmul.mubr.msk.bf16.gmra.mrb[12].mxu0 %vm442_vm1, %v1699_v9  ;;  %1626 = vmatmul.mubr.msk.bf16.gmra.mrb[12].mxu1 %vm442_vm1, %v1700_v10 }
  0x23   :  { %89 = vst.msk [vmem:[#allocation2 + $0x210] sm:$0xff] %vm22_vm2, %v1878_v0  ;;  %90 = vst.msk [vmem:[#allocation2 + $0x218] sm:$0xff] %vm22_vm2, %v1878_v0  ;;  %1553 = vmatprep.mubr.msk.bf16.mxu0 %vm1879_vm0, %v1878_v0  ;;  %1629 = vmatprep.mubr.msk.bf16.mxu1 %vm1879_vm0, %v1878_v0 }
  0x24   :  { %91 = vst.msk [vmem:[#allocation2 + $0x220] sm:$0xff] %vm22_vm2, %v1878_v0  ;;  %92 = vst.msk [vmem:[#allocation2 + $0x228] sm:$0xff] %vm22_vm2, %v1878_v0 }
  0x25   :  { %93 = vst.msk [vmem:[#allocation2 + $0x230] sm:$0xff] %vm22_vm2, %v1878_v0  ;;  %94 = vst.msk [vmem:[#allocation2 + $0x238] sm:$0xff] %vm22_vm2, %v1878_v0 }
  0x26   :  { %96 = vst.msk [vmem:[#allocation2 + $0x240] sm:$0x3] %vm95_vm3, %v1878_v0 }
  0x2a   :  { %1554 = vmatmul.mubr.msk.bf16.gmra.mrb[16].mxu0 %vm442_vm1, %v1701_v11  ;;  %1630 = vmatmul.mubr.msk.bf16.gmra.mrb[16].mxu1 %vm442_vm1, %v1702_v12 }
  0x2b   :  { %1557 = vmatprep.mubr.msk.bf16.mxu0 %vm1879_vm0, %v1878_v0  ;;  %1633 = vmatprep.mubr.msk.bf16.mxu1 %vm1879_vm0, %v1878_v0 }
  0x32   :  { %1558 = vmatmul.mubr.msk.bf16.gmra.mrb[20].mxu0 %vm442_vm1, %v1703_v13  ;;  %1634 = vmatmul.mubr.msk.bf16.gmra.mrb[20].mxu1 %vm442_vm1, %v1704_v14 }
  0x33   :  { %1561 = vmatprep.mubr.msk.bf16.mxu0 %vm1879_vm0, %v1878_v0  ;;  %1637 = vmatprep.mubr.msk.bf16.mxu1 %vm1879_vm0, %v1878_v0 }
  0x3a   :  { %1562 = vmatmul.mubr.msk.bf16.gmra.mrb[24].mxu0 %vm442_vm1, %v1705_v15  ;;  %1638 = vmatmul.mubr.msk.bf16.gmra.mrb[24].mxu1 %vm442_vm1, %v1706_v16 }
  0x3b   :  { %1565 = vmatprep.mubr.msk.bf16.mxu0 %vm1879_vm0, %v1878_v0  ;;  %1641 = vmatprep.mubr.msk.bf16.mxu1 %vm1879_vm0, %v1878_v0 }
  0x42   :  { %1566 = vmatmul.mubr.msk.bf16.gmra.mrb[28].mxu0 %vm442_vm1, %v1707_v17  ;;  %1642 = vmatmul.mubr.msk.bf16.gmra.mrb[28].mxu1 %vm442_vm1, %v1708_v18 }
  0x43   :  { %1569 = vmatprep.mubr.msk.bf16.mxu0 %vm1879_vm0, %v1878_v0  ;;  %1645 = vmatprep.mubr.msk.bf16.mxu1 %vm1879_vm0, %v1878_v0 }
  0x4a   :  { %1570 = vmatmul.mubr.msk.bf16.gmra.mrb[32].mxu0 %vm442_vm1, %v1709_v19  ;;  %1646 = vmatmul.mubr.msk.bf16.gmra.mrb[32].mxu1 %vm442_vm1, %v1710_v20 }
  0x4b   :  { %1573 = vmatprep.mubr.msk.bf16.mxu0 %vm1879_vm0, %v1878_v0  ;;  %1649 = vmatprep.mubr.msk.bf16.mxu1 %vm1879_vm0, %v1878_v0 }
  0x52   :  { %1574 = vmatmul.mubr.msk.bf16.gmra.mrb[36].mxu0 %vm442_vm1, %v1711_v21  ;;  %1650 = vmatmul.mubr.msk.bf16.gmra.mrb[36].mxu1 %vm442_vm1, %v1712_v22  ;;  %v101_v21 = vld [vmem:[#allocation2 + $0x20] sm:$0xff]  ;;  %v139_v22 = vld [vmem:[#allocation2 + $0x150] sm:$0xff] }
  0x53   :  { %1577 = vmatprep.mubr.msk.bf16.mxu0 %vm1879_vm0, %v1878_v0  ;;  %1653 = vmatprep.mubr.msk.bf16.mxu1 %vm1879_vm0, %v1878_v0 }
  0x5a   :  { %1578 = vmatmul.mubr.msk.bf16.gmra.mrb[40].mxu0 %vm442_vm1, %v1713_v23  ;;  %1654 = vmatmul.mubr.msk.bf16.gmra.mrb[40].mxu1 %vm442_vm1, %v1714_v24 }
  0x5b   :  { %1581 = vmatprep.mubr.msk.bf16.mxu0 %vm1879_vm0, %v1878_v0  ;;  %1657 = vmatprep.mubr.msk.bf16.mxu1 %vm1879_vm0, %v1878_v0 }
  0x62   :  { %1582 = vmatmul.mubr.msk.bf16.gmra.mrb[44].mxu0 %vm442_vm1, %v1715_v25  ;;  %1658 = vmatmul.mubr.msk.bf16.gmra.mrb[44].mxu1 %vm442_vm1, %v1716_v26  ;;  %v102_v25 = vld [vmem:[#allocation2 + $0x28] sm:$0xff] }
  0x63   :  { %1585 = vmatprep.mubr.msk.bf16.mxu0 %vm1879_vm0, %v1878_v0  ;;  %1661 = vmatprep.mubr.msk.bf16.mxu1 %vm1879_vm0, %v1878_v0 }
  0x6a   :  { %1586 = vmatmul.mubr.msk.bf16.gmra.mrb[48].mxu0 %vm442_vm1, %v1717_v27  ;;  %1662 = vmatmul.mubr.msk.bf16.gmra.mrb[48].mxu1 %vm442_vm1, %v1718_v28  ;;  %v140_v27 = vld [vmem:[#allocation2 + $0x158] sm:$0xff] }
  0x6b   :  { %1589 = vmatprep.mubr.msk.bf16.mxu0 %vm1879_vm0, %v1878_v0  ;;  %1665 = vmatprep.mubr.msk.bf16.mxu1 %vm1879_vm0, %v1878_v0 }
  0x72   :  { %1590 = vmatmul.mubr.msk.bf16.gmra.mrb[52].mxu0 %vm442_vm1, %v1719_v29  ;;  %1666 = vmatmul.mubr.msk.bf16.gmra.mrb[52].mxu1 %vm442_vm1, %v1720_v30 }
  0x73   :  { %1593 = vmatprep.mubr.msk.bf16.mxu0 %vm1879_vm0, %v1878_v0  ;;  %1669 = vmatprep.mubr.msk.bf16.mxu1 %vm1879_vm0, %v1878_v0 }
  0x7a   :  { %1594 = vmatmul.mubr.msk.bf16.gmra.mrb[56].mxu0 %vm442_vm1, %v1721_v31  ;;  %1670 = vmatmul.mubr.msk.bf16.gmra.mrb[56].mxu1 %vm442_vm1, %v1722_v32 }
  0x7b   :  { %1597 = vmatprep.mubr.msk.bf16.mxu0 %vm1879_vm0, %v1878_v0  ;;  %1673 = vmatprep.mubr.msk.bf16.mxu1 %vm1879_vm0, %v1878_v0 }
  0x82   :  { %1598 = vmatmul.mubr.msk.bf16.gmra.mrb[60].mxu0 %vm442_vm1, %v1723_v33  ;;  %1674 = vmatmul.mubr.msk.bf16.gmra.mrb[60].mxu1 %vm442_vm1, %v1724_v34 }
  0x83   :  { %1601 = vmatprep.mubr.msk.bf16.mxu0 %vm1879_vm0, %v1878_v0  ;;  %1677 = vmatprep.mubr.msk.bf16.mxu1 %vm1879_vm0, %v1878_v0 }
  0x8a   :  { %1602 = vmatmul.mubr.msk.bf16.gmra.mrb[64].mxu0 %vm442_vm1, %v1725_v35  ;;  %1678 = vmatmul.mubr.msk.bf16.gmra.mrb[64].mxu1 %vm442_vm1, %v1726_v36 }
  0x8b   :  { %1605 = vmatprep.mubr.msk.bf16.mxu0 %vm1879_vm0, %v1878_v0  ;;  %1681 = vmatprep.mubr.msk.bf16.mxu1 %vm1879_vm0, %v1878_v0 }
  0x92   :  { %1606 = vmatmul.mubr.msk.bf16.gmra.mrb[68].mxu0 %vm442_vm1, %v1727_v37  ;;  %1682 = vmatmul.mubr.msk.bf16.gmra.mrb[68].mxu1 %vm442_vm1, %v1728_v38 }
  0x93   :  { %1609 = vmatprep.mubr.msk.bf16.mxu0 %vm1879_vm0, %v1878_v0 }
  0x9a   :  { %1610 = vmatmul.mubr.msk.bf16.gmra.mrb[72].mxu0 %vm442_vm1, %v1729_v39 }
  0xdd   :  { %v588_v42 = vpop.f32.mrb[0].mxu0  ;;  %v740_v44 = vpop.f32.mrb[0].mxu1 }
  0xde   :  { %v882_v46 = vadd.f32 %v588_v42, %v97_v40  ;;  %v1539_v47 = vpop.f32.mrb[1].mxu0  ;;  %v920_v48 = vadd.f32 %v740_v44, %v135_v41  ;;  %v1615_v49 = vpop.f32.mrb[1].mxu1 }
  0xdf   :  { %v591_v50 = vpop.f32.mrb[2].mxu0  ;;  %v743_v51 = vpop.f32.mrb[2].mxu1  ;;  %v141_v49 = vld [vmem:[#allocation2 + $0x160] sm:$0xff] }
  0xe0   :  { %956 = vst.msk [vmem:[#allocation2] sm:$0xff] %vm22_vm2, %v882_v46  ;;  %v883_v52 = vadd.f32 %v591_v50, %v98_v43  ;;  %v1540_v53 = vpop.f32.mrb[3].mxu0  ;;  %994 = vst.msk [vmem:[#allocation2 + $0x130] sm:$0xff] %vm22_vm2, %v920_v48  ;;  %v921_v54 = vadd.f32 %v743_v51, %v136_v45  ;;  %v1616_v55 = vpop.f32.mrb[3].mxu1  ;;  %v103_v48 = vld [vmem:[#allocation2 + $0x30] sm:$0xff] }
  0xe1   :  { %v104_v53 = vld [vmem:[#allocation2 + $0x38] sm:$0xff]  ;;  %v142_v55 = vld [vmem:[#allocation2 + $0x168] sm:$0xff] }
  0xe2   :  { %957 = vst.msk [vmem:[#allocation2 + $0x8] sm:$0xff] %vm22_vm2, %v883_v52  ;;  %995 = vst.msk [vmem:[#allocation2 + $0x138] sm:$0xff] %vm22_vm2, %v921_v54 }
  0xe5   :  { %v596_v59 = vpop.f32.mrb[4].mxu0  ;;  %v748_v61 = vpop.f32.mrb[4].mxu1 }
  0xe6   :  { %v884_v1 = vadd.f32 %v596_v59, %v99_v56  ;;  %v1543_v2 = vpop.f32.mrb[5].mxu0  ;;  %v922_v3 = vadd.f32 %v748_v61, %v137_v57  ;;  %v1619_v4 = vpop.f32.mrb[5].mxu1 }
  0xe7   :  { %v1033_v5 = vld [vmem:[#allocation2] sm:$0xff]  ;;  %v1071_v6 = vld [vmem:[#allocation2 + $0x130] sm:$0xff]  ;;  %v599_v7 = vpop.f32.mrb[6].mxu0  ;;  %v751_v8 = vpop.f32.mrb[6].mxu1 }
  0xe8   :  { %v1113_v9 = vmul.f32 %v2288_v58, %v1033_v5  ;;  %v1151_v10 = vmul.f32 %v2288_v58, %v1071_v6  ;;  %958 = vst.msk [vmem:[#allocation2 + $0x10] sm:$0xff] %vm22_vm2, %v884_v1  ;;  %v885_v11 = vadd.f32 %v599_v7, %v100_v60  ;;  %v1544_v12 = vpop.f32.mrb[7].mxu0  ;;  %996 = vst.msk [vmem:[#allocation2 + $0x140] sm:$0xff] %vm22_vm2, %v922_v3  ;;  %v1620_v14 = vpop.f32.mrb[7].mxu1 }
  0xe9   :  { %v923_v13 = vadd.f32 %v751_v8, %v138_v62  ;;  %v1034_v15 = vld [vmem:[#allocation2 + $0x8] sm:$0xff]  ;;  %v1072_v16 = vld [vmem:[#allocation2 + $0x138] sm:$0xff] }
  0xea   :  { %v1193_v17 = vadd.f32 %v2293_v63, %v1113_v9  ;;  %v1114_v18 = vmul.f32 %v2288_v58, %v1034_v15  ;;  %v1231_v19 = vadd.f32 %v2293_v63, %v1151_v10  ;;  %v1152_v20 = vmul.f32 %v2288_v58, %v1072_v16  ;;  %959 = vst.msk [vmem:[#allocation2 + $0x18] sm:$0xff] %vm22_vm2, %v885_v11 }
  0xeb   :  { %997 = vst.msk [vmem:[#allocation2 + $0x148] sm:$0xff] %vm22_vm2, %v923_v13 }
  0xec   :  { %1730 = vtanh.f32 %v1193_v17  ;;  %v1194_v23 = vadd.f32 %v2293_v63, %v1114_v18  ;;  %v1232_v0 = vadd.f32 %v2293_v63, %v1152_v20  ;;  %v143_v20 = vld [vmem:[#allocation2 + $0x170] sm:$0xff] }
  0xed   :  { %1732 = vtanh.f32 %v1231_v19  ;;  %v604_v24 = vpop.f32.mrb[8].mxu0  ;;  %v756_v26 = vpop.f32.mrb[8].mxu1  ;;  %v105_v19 = vld [vmem:[#allocation2 + $0x40] sm:$0xff] }
  0xee   :  { %1734 = vtanh.f32 %v1194_v23  ;;  %v886_v28 = vadd.f32 %v604_v24, %v101_v21  ;;  %v1547_v29 = vpop.f32.mrb[9].mxu0  ;;  %v924_v30 = vadd.f32 %v756_v26, %v139_v22  ;;  %v1623_v31 = vpop.f32.mrb[9].mxu1 }
  0xef   :  { %v1035_v32 = vld [vmem:[#allocation2 + $0x10] sm:$0xff]  ;;  %1736 = vtanh.f32 %v1232_v0  ;;  %v1073_v33 = vld [vmem:[#allocation2 + $0x140] sm:$0xff]  ;;  %v607_v34 = vpop.f32.mrb[10].mxu0  ;;  %v759_v35 = vpop.f32.mrb[10].mxu1  ;;  %v106_v0 = vld [vmem:[#allocation2 + $0x48] sm:$0xff] }
  0xf0   :  { %v1115_v36 = vmul.f32 %v2288_v58, %v1035_v32  ;;  %v1153_v37 = vmul.f32 %v2288_v58, %v1073_v33  ;;  %960 = vst.msk [vmem:[#allocation2 + $0x20] sm:$0xff] %vm22_vm2, %v886_v28  ;;  %v887_v38 = vadd.f32 %v607_v34, %v102_v25  ;;  %v1548_v39 = vpop.f32.mrb[11].mxu0  ;;  %998 = vst.msk [vmem:[#allocation2 + $0x150] sm:$0xff] %vm22_vm2, %v924_v30  ;;  %v1624_v41 = vpop.f32.mrb[11].mxu1  ;;  %v144_v25 = vld [vmem:[#allocation2 + $0x178] sm:$0xff] }
  0xf1   :  { %v925_v40 = vadd.f32 %v759_v35, %v140_v27  ;;  %v1036_v42 = vld [vmem:[#allocation2 + $0x18] sm:$0xff] }
  0xf2   :  { %v1074_v43 = vld [vmem:[#allocation2 + $0x148] sm:$0xff]  ;;  %v1195_v44 = vadd.f32 %v2293_v63, %v1115_v36  ;;  %v1116_v45 = vmul.f32 %v2288_v58, %v1036_v42  ;;  %v1233_v46 = vadd.f32 %v2293_v63, %v1153_v37  ;;  %961 = vst.msk [vmem:[#allocation2 + $0x28] sm:$0xff] %vm22_vm2, %v887_v38 }
  0xf3   :  { %v1154_v47 = vmul.f32 %v2288_v58, %v1074_v43  ;;  %999 = vst.msk [vmem:[#allocation2 + $0x158] sm:$0xff] %vm22_vm2, %v925_v40 }
  0xf4   :  { %1738 = vtanh.f32 %v1195_v44  ;;  %v1196_v50 = vadd.f32 %v2293_v63, %v1116_v45 }
  0xf5   :  { %v1234_v51 = vadd.f32 %v2293_v63, %v1154_v47  ;;  %1740 = vtanh.f32 %v1233_v46  ;;  %v612_v52 = vpop.f32.mrb[12].mxu0  ;;  %v764_v54 = vpop.f32.mrb[12].mxu1 }
  0xf6   :  { %v1731_v56 = vpop.eup %1730  ;;  %1742 = vtanh.f32 %v1196_v50  ;;  %v888_v57 = vadd.f32 %v612_v52, %v103_v48  ;;  %v1551_v59 = vpop.f32.mrb[13].mxu0  ;;  %v926_v60 = vadd.f32 %v764_v54, %v141_v49  ;;  %v107_v50 = vld [vmem:[#allocation2 + $0x50] sm:$0xff] }
  0xf7   :  { %v1627_v61 = vpop.f32.mrb[13].mxu1  ;;  %v1733_v62 = vpop.eup %1732  ;;  %1339 = vst.msk [vmem:[%s2818_s4] sm:$0xff] %vm22_vm2, %v1731_v56  ;;  %v1037_v1 = vld [vmem:[#allocation2 + $0x20] sm:$0xff]  ;;  %1744 = vtanh.f32 %v1234_v51  ;;  %v1075_v2 = vld [vmem:[#allocation2 + $0x150] sm:$0xff] }
  0xf8   :  { %v615_v3 = vpop.f32.mrb[14].mxu0  ;;  %v767_v4 = vpop.f32.mrb[14].mxu1  ;;  %1377 = vst.msk [vmem:[%s2818_s4 + $0x130] sm:$0xff] %vm22_vm2, %v1733_v62  ;;  %v1117_v6 = vmul.f32 %v2288_v58, %v1037_v1  ;;  %v1155_v7 = vmul.f32 %v2288_v58, %v1075_v2  ;;  %962 = vst.msk [vmem:[#allocation2 + $0x30] sm:$0xff] %vm22_vm2, %v888_v57  ;;  %v145_v51 = vld [vmem:[#allocation2 + $0x180] sm:$0xff]  ;;  %v146_v57 = vld [vmem:[#allocation2 + $0x188] sm:$0xff] }
  0xf9   :  { %v1735_v5 = vpop.eup %1734  ;;  %v889_v8 = vadd.f32 %v615_v3, %v104_v53  ;;  %v1552_v9 = vpop.f32.mrb[15].mxu0  ;;  %1000 = vst.msk [vmem:[#allocation2 + $0x160] sm:$0xff] %vm22_vm2, %v926_v60  ;;  %v927_v10 = vadd.f32 %v767_v4, %v142_v55  ;;  %v1038_v13 = vld [vmem:[#allocation2 + $0x28] sm:$0xff]  ;;  %v108_v55 = vld [vmem:[#allocation2 + $0x58] sm:$0xff] }
  0xfa   :  { %v1628_v11 = vpop.f32.mrb[15].mxu1  ;;  %v1737_v12 = vpop.eup %1736  ;;  %1340 = vst.msk [vmem:[%s2818_s4 + $0x8] sm:$0xff] %vm22_vm2, %v1735_v5  ;;  %v1076_v14 = vld [vmem:[#allocation2 + $0x158] sm:$0xff]  ;;  %v1197_v15 = vadd.f32 %v2293_v63, %v1117_v6  ;;  %v1118_v16 = vmul.f32 %v2288_v58, %v1038_v13  ;;  %v1235_v17 = vadd.f32 %v2293_v63, %v1155_v7 }
  0xfb   :  { %1378 = vst.msk [vmem:[%s2818_s4 + $0x138] sm:$0xff] %vm22_vm2, %v1737_v12  ;;  %v1156_v18 = vmul.f32 %v2288_v58, %v1076_v14  ;;  %963 = vst.msk [vmem:[#allocation2 + $0x38] sm:$0xff] %vm22_vm2, %v889_v8 }
  0xfc   :  { %1001 = vst.msk [vmem:[#allocation2 + $0x168] sm:$0xff] %vm22_vm2, %v927_v10  ;;  %1746 = vtanh.f32 %v1197_v15  ;;  %v1198_v21 = vadd.f32 %v2293_v63, %v1118_v16 }
  0xfd   :  { %v1236_v22 = vadd.f32 %v2293_v63, %v1156_v18  ;;  %1748 = vtanh.f32 %v1235_v17  ;;  %v620_v23 = vpop.f32.mrb[16].mxu0  ;;  %v772_v24 = vpop.f32.mrb[16].mxu1 }
  0xfe   :  { %v1739_v26 = vpop.eup %1738  ;;  %1750 = vtanh.f32 %v1198_v21  ;;  %v890_v27 = vadd.f32 %v620_v23, %v105_v19  ;;  %v1555_v28 = vpop.f32.mrb[17].mxu0  ;;  %v928_v29 = vadd.f32 %v772_v24, %v143_v20  ;;  %v109_v21 = vld [vmem:[#allocation2 + $0x60] sm:$0xff] }
  0xff   :  { %v1631_v30 = vpop.f32.mrb[17].mxu1  ;;  %v1741_v31 = vpop.eup %1740  ;;  %1341 = vst.msk [vmem:[%s2818_s4 + $0x10] sm:$0xff] %vm22_vm2, %v1739_v26  ;;  %v1039_v32 = vld [vmem:[#allocation2 + $0x30] sm:$0xff]  ;;  %1752 = vtanh.f32 %v1236_v22 }
 0x100   :  { %v1077_v33 = vld [vmem:[#allocation2 + $0x160] sm:$0xff]  ;;  %v623_v34 = vpop.f32.mrb[18].mxu0  ;;  %v775_v35 = vpop.f32.mrb[18].mxu1  ;;  %1379 = vst.msk [vmem:[%s2818_s4 + $0x140] sm:$0xff] %vm22_vm2, %v1741_v31  ;;  %v1119_v37 = vmul.f32 %v2288_v58, %v1039_v32  ;;  %964 = vst.msk [vmem:[#allocation2 + $0x40] sm:$0xff] %vm22_vm2, %v890_v27  ;;  %v147_v22 = vld [vmem:[#allocation2 + $0x190] sm:$0xff] }
 0x101   :  { %v1743_v36 = vpop.eup %1742  ;;  %v1157_v38 = vmul.f32 %v2288_v58, %v1077_v33  ;;  %v891_v39 = vadd.f32 %v623_v34, %v106_v0  ;;  %v1556_v40 = vpop.f32.mrb[19].mxu0  ;;  %1002 = vst.msk [vmem:[#allocation2 + $0x170] sm:$0xff] %vm22_vm2, %v928_v29  ;;  %v929_v41 = vadd.f32 %v775_v35, %v144_v25  ;;  %v110_v25 = vld [vmem:[#allocation2 + $0x68] sm:$0xff]  ;;  %v148_v27 = vld [vmem:[#allocation2 + $0x198] sm:$0xff] }
 0x102   :  { %v1632_v42 = vpop.f32.mrb[19].mxu1  ;;  %v1745_v43 = vpop.eup %1744  ;;  %1342 = vst.msk [vmem:[%s2818_s4 + $0x18] sm:$0xff] %vm22_vm2, %v1743_v36  ;;  %v1040_v44 = vld [vmem:[#allocation2 + $0x38] sm:$0xff]  ;;  %v1199_v46 = vadd.f32 %v2293_v63, %v1119_v37 }
 0x103   :  { %v1078_v45 = vld [vmem:[#allocation2 + $0x168] sm:$0xff]  ;;  %1380 = vst.msk [vmem:[%s2818_s4 + $0x148] sm:$0xff] %vm22_vm2, %v1745_v43  ;;  %v1120_v47 = vmul.f32 %v2288_v58, %v1040_v44  ;;  %v1237_v48 = vadd.f32 %v2293_v63, %v1157_v38  ;;  %965 = vst.msk [vmem:[#allocation2 + $0x48] sm:$0xff] %vm22_vm2, %v891_v39 }
 0x104   :  { %v1158_v49 = vmul.f32 %v2288_v58, %v1078_v45  ;;  %1003 = vst.msk [vmem:[#allocation2 + $0x178] sm:$0xff] %vm22_vm2, %v929_v41  ;;  %1754 = vtanh.f32 %v1199_v46 }
 0x105   :  { %v1200_v52 = vadd.f32 %v2293_v63, %v1120_v47  ;;  %1756 = vtanh.f32 %v1237_v48  ;;  %v628_v54 = vpop.f32.mrb[20].mxu0  ;;  %v780_v56 = vpop.f32.mrb[20].mxu1 }
 0x106   :  { %v1238_v53 = vadd.f32 %v2293_v63, %v1158_v49  ;;  %v1747_v59 = vpop.eup %1746  ;;  %v892_v60 = vadd.f32 %v628_v54, %v107_v50  ;;  %v1559_v61 = vpop.f32.mrb[21].mxu0  ;;  %v930_v62 = vadd.f32 %v780_v56, %v145_v51 }
 0x107   :  { %1758 = vtanh.f32 %v1200_v52  ;;  %v1635_v1 = vpop.f32.mrb[21].mxu1  ;;  %v1749_v2 = vpop.eup %1748  ;;  %1343 = vst.msk [vmem:[%s2818_s4 + $0x20] sm:$0xff] %vm22_vm2, %v1747_v59  ;;  %v1041_v3 = vld [vmem:[#allocation2 + $0x40] sm:$0xff]  ;;  %v111_v52 = vld [vmem:[#allocation2 + $0x70] sm:$0xff] }
 0x108   :  { %1760 = vtanh.f32 %v1238_v53  ;;  %v1079_v4 = vld [vmem:[#allocation2 + $0x170] sm:$0xff]  ;;  %v631_v5 = vpop.f32.mrb[22].mxu0  ;;  %v783_v6 = vpop.f32.mrb[22].mxu1  ;;  %1381 = vst.msk [vmem:[%s2818_s4 + $0x150] sm:$0xff] %vm22_vm2, %v1749_v2  ;;  %v1121_v8 = vmul.f32 %v2288_v58, %v1041_v3  ;;  %966 = vst.msk [vmem:[#allocation2 + $0x50] sm:$0xff] %vm22_vm2, %v892_v60  ;;  %v149_v53 = vld [vmem:[#allocation2 + $0x1a0] sm:$0xff] }
 0x109   :  { %v1751_v7 = vpop.eup %1750  ;;  %v1159_v9 = vmul.f32 %v2288_v58, %v1079_v4  ;;  %v893_v10 = vadd.f32 %v631_v5, %v108_v55  ;;  %v1560_v11 = vpop.f32.mrb[23].mxu0  ;;  %1004 = vst.msk [vmem:[#allocation2 + $0x180] sm:$0xff] %vm22_vm2, %v930_v62  ;;  %v931_v12 = vadd.f32 %v783_v6, %v146_v57  ;;  %v112_v57 = vld [vmem:[#allocation2 + $0x78] sm:$0xff]  ;;  %v150_v60 = vld [vmem:[#allocation2 + $0x1a8] sm:$0xff] }
 0x10a   :  { %v1636_v13 = vpop.f32.mrb[23].mxu1  ;;  %v1753_v14 = vpop.eup %1752  ;;  %1344 = vst.msk [vmem:[%s2818_s4 + $0x28] sm:$0xff] %vm22_vm2, %v1751_v7  ;;  %v1042_v15 = vld [vmem:[#allocation2 + $0x48] sm:$0xff]  ;;  %v1201_v17 = vadd.f32 %v2293_v63, %v1121_v8 }
 0x10b   :  { %v1080_v16 = vld [vmem:[#allocation2 + $0x178] sm:$0xff]  ;;  %1382 = vst.msk [vmem:[%s2818_s4 + $0x158] sm:$0xff] %vm22_vm2, %v1753_v14  ;;  %v1122_v18 = vmul.f32 %v2288_v58, %v1042_v15  ;;  %v1239_v19 = vadd.f32 %v2293_v63, %v1159_v9  ;;  %967 = vst.msk [vmem:[#allocation2 + $0x58] sm:$0xff] %vm22_vm2, %v893_v10 }
 0x10c   :  { %v1160_v20 = vmul.f32 %v2288_v58, %v1080_v16  ;;  %1005 = vst.msk [vmem:[#allocation2 + $0x188] sm:$0xff] %vm22_vm2, %v931_v12  ;;  %1762 = vtanh.f32 %v1201_v17 }
 0x10d   :  { %v1202_v23 = vadd.f32 %v2293_v63, %v1122_v18  ;;  %1764 = vtanh.f32 %v1239_v19  ;;  %v636_v24 = vpop.f32.mrb[24].mxu0  ;;  %v788_v26 = vpop.f32.mrb[24].mxu1 }
 0x10e   :  { %v1240_v0 = vadd.f32 %v2293_v63, %v1160_v20  ;;  %v1755_v28 = vpop.eup %1754  ;;  %v894_v29 = vadd.f32 %v636_v24, %v109_v21  ;;  %v1563_v30 = vpop.f32.mrb[25].mxu0  ;;  %v932_v31 = vadd.f32 %v788_v26, %v147_v22 }
 0x10f   :  { %1766 = vtanh.f32 %v1202_v23  ;;  %v1639_v32 = vpop.f32.mrb[25].mxu1  ;;  %v1757_v33 = vpop.eup %1756  ;;  %1345 = vst.msk [vmem:[%s2818_s4 + $0x30] sm:$0xff] %vm22_vm2, %v1755_v28  ;;  %v1043_v34 = vld [vmem:[#allocation2 + $0x50] sm:$0xff]  ;;  %v113_v23 = vld [vmem:[#allocation2 + $0x80] sm:$0xff] }
 0x110   :  { %1768 = vtanh.f32 %v1240_v0  ;;  %v1081_v35 = vld [vmem:[#allocation2 + $0x180] sm:$0xff]  ;;  %v639_v36 = vpop.f32.mrb[26].mxu0  ;;  %v791_v37 = vpop.f32.mrb[26].mxu1  ;;  %1383 = vst.msk [vmem:[%s2818_s4 + $0x160] sm:$0xff] %vm22_vm2, %v1757_v33  ;;  %v1123_v39 = vmul.f32 %v2288_v58, %v1043_v34  ;;  %968 = vst.msk [vmem:[#allocation2 + $0x60] sm:$0xff] %vm22_vm2, %v894_v29  ;;  %v151_v0 = vld [vmem:[#allocation2 + $0x1b0] sm:$0xff] }
 0x111   :  { %v1759_v38 = vpop.eup %1758  ;;  %v1161_v40 = vmul.f32 %v2288_v58, %v1081_v35  ;;  %v895_v41 = vadd.f32 %v639_v36, %v110_v25  ;;  %v1564_v42 = vpop.f32.mrb[27].mxu0  ;;  %1006 = vst.msk [vmem:[#allocation2 + $0x190] sm:$0xff] %vm22_vm2, %v932_v31  ;;  %v933_v43 = vadd.f32 %v791_v37, %v148_v27  ;;  %v114_v27 = vld [vmem:[#allocation2 + $0x88] sm:$0xff]  ;;  %v152_v29 = vld [vmem:[#allocation2 + $0x1b8] sm:$0xff] }
 0x112   :  { %v1640_v44 = vpop.f32.mrb[27].mxu1  ;;  %v1761_v45 = vpop.eup %1760  ;;  %1346 = vst.msk [vmem:[%s2818_s4 + $0x38] sm:$0xff] %vm22_vm2, %v1759_v38  ;;  %v1044_v46 = vld [vmem:[#allocation2 + $0x58] sm:$0xff]  ;;  %v1203_v48 = vadd.f32 %v2293_v63, %v1123_v39 }
 0x113   :  { %v1082_v47 = vld [vmem:[#allocation2 + $0x188] sm:$0xff]  ;;  %1384 = vst.msk [vmem:[%s2818_s4 + $0x168] sm:$0xff] %vm22_vm2, %v1761_v45  ;;  %v1124_v49 = vmul.f32 %v2288_v58, %v1044_v46  ;;  %v1241_v50 = vadd.f32 %v2293_v63, %v1161_v40  ;;  %969 = vst.msk [vmem:[#allocation2 + $0x68] sm:$0xff] %vm22_vm2, %v895_v41 }
 0x114   :  { %v1162_v51 = vmul.f32 %v2288_v58, %v1082_v47  ;;  %1007 = vst.msk [vmem:[#allocation2 + $0x198] sm:$0xff] %vm22_vm2, %v933_v43  ;;  %1770 = vtanh.f32 %v1203_v48 }
 0x115   :  { %v1204_v54 = vadd.f32 %v2293_v63, %v1124_v49  ;;  %1772 = vtanh.f32 %v1241_v50  ;;  %v644_v56 = vpop.f32.mrb[28].mxu0  ;;  %v796_v59 = vpop.f32.mrb[28].mxu1 }
 0x116   :  { %v1242_v55 = vadd.f32 %v2293_v63, %v1162_v51  ;;  %v1763_v61 = vpop.eup %1762  ;;  %v896_v62 = vadd.f32 %v644_v56, %v111_v52  ;;  %v1567_v1 = vpop.f32.mrb[29].mxu0  ;;  %v934_v2 = vadd.f32 %v796_v59, %v149_v53 }
 0x117   :  { %1774 = vtanh.f32 %v1204_v54  ;;  %v1643_v3 = vpop.f32.mrb[29].mxu1  ;;  %v1765_v4 = vpop.eup %1764  ;;  %1347 = vst.msk [vmem:[%s2818_s4 + $0x40] sm:$0xff] %vm22_vm2, %v1763_v61  ;;  %v1045_v5 = vld [vmem:[#allocation2 + $0x60] sm:$0xff]  ;;  %v115_v54 = vld [vmem:[#allocation2 + $0x90] sm:$0xff] }
 0x118   :  { %1776 = vtanh.f32 %v1242_v55  ;;  %v1083_v6 = vld [vmem:[#allocation2 + $0x190] sm:$0xff]  ;;  %v647_v7 = vpop.f32.mrb[30].mxu0  ;;  %v799_v8 = vpop.f32.mrb[30].mxu1  ;;  %1385 = vst.msk [vmem:[%s2818_s4 + $0x170] sm:$0xff] %vm22_vm2, %v1765_v4  ;;  %v1125_v10 = vmul.f32 %v2288_v58, %v1045_v5  ;;  %970 = vst.msk [vmem:[#allocation2 + $0x70] sm:$0xff] %vm22_vm2, %v896_v62  ;;  %v153_v55 = vld [vmem:[#allocation2 + $0x1c0] sm:$0xff] }
 0x119   :  { %v1767_v9 = vpop.eup %1766  ;;  %v1163_v11 = vmul.f32 %v2288_v58, %v1083_v6  ;;  %v897_v12 = vadd.f32 %v647_v7, %v112_v57  ;;  %v1568_v13 = vpop.f32.mrb[31].mxu0  ;;  %1008 = vst.msk [vmem:[#allocation2 + $0x1a0] sm:$0xff] %vm22_vm2, %v934_v2  ;;  %v935_v14 = vadd.f32 %v799_v8, %v150_v60  ;;  %v116_v60 = vld [vmem:[#allocation2 + $0x98] sm:$0xff]  ;;  %v154_v62 = vld [vmem:[#allocation2 + $0x1c8] sm:$0xff] }
 0x11a   :  { %v1644_v15 = vpop.f32.mrb[31].mxu1  ;;  %v1769_v16 = vpop.eup %1768  ;;  %1348 = vst.msk [vmem:[%s2818_s4 + $0x48] sm:$0xff] %vm22_vm2, %v1767_v9  ;;  %v1046_v17 = vld [vmem:[#allocation2 + $0x68] sm:$0xff]  ;;  %v1205_v19 = vadd.f32 %v2293_v63, %v1125_v10 }
 0x11b   :  { %v1084_v18 = vld [vmem:[#allocation2 + $0x198] sm:$0xff]  ;;  %1386 = vst.msk [vmem:[%s2818_s4 + $0x178] sm:$0xff] %vm22_vm2, %v1769_v16  ;;  %v1126_v20 = vmul.f32 %v2288_v58, %v1046_v17  ;;  %v1243_v21 = vadd.f32 %v2293_v63, %v1163_v11  ;;  %971 = vst.msk [vmem:[#allocation2 + $0x78] sm:$0xff] %vm22_vm2, %v897_v12 }
 0x11c   :  { %v1164_v22 = vmul.f32 %v2288_v58, %v1084_v18  ;;  %1009 = vst.msk [vmem:[#allocation2 + $0x1a8] sm:$0xff] %vm22_vm2, %v935_v14  ;;  %1778 = vtanh.f32 %v1205_v19 }
 0x11d   :  { %v1206_v24 = vadd.f32 %v2293_v63, %v1126_v20  ;;  %1780 = vtanh.f32 %v1243_v21  ;;  %v652_v26 = vpop.f32.mrb[32].mxu0  ;;  %v804_v28 = vpop.f32.mrb[32].mxu1 }
 0x11e   :  { %v1244_v25 = vadd.f32 %v2293_v63, %v1164_v22  ;;  %v1771_v30 = vpop.eup %1770  ;;  %v898_v31 = vadd.f32 %v652_v26, %v113_v23  ;;  %v1571_v32 = vpop.f32.mrb[33].mxu0  ;;  %v936_v33 = vadd.f32 %v804_v28, %v151_v0 }
 0x11f   :  { %1782 = vtanh.f32 %v1206_v24  ;;  %v1647_v34 = vpop.f32.mrb[33].mxu1  ;;  %v1773_v35 = vpop.eup %1772  ;;  %1349 = vst.msk [vmem:[%s2818_s4 + $0x50] sm:$0xff] %vm22_vm2, %v1771_v30  ;;  %v1047_v36 = vld [vmem:[#allocation2 + $0x70] sm:$0xff]  ;;  %v117_v24 = vld [vmem:[#allocation2 + $0xa0] sm:$0xff] }
 0x120   :  { %1784 = vtanh.f32 %v1244_v25  ;;  %v1085_v37 = vld [vmem:[#allocation2 + $0x1a0] sm:$0xff]  ;;  %v655_v38 = vpop.f32.mrb[34].mxu0  ;;  %v807_v39 = vpop.f32.mrb[34].mxu1  ;;  %1387 = vst.msk [vmem:[%s2818_s4 + $0x180] sm:$0xff] %vm22_vm2, %v1773_v35  ;;  %v1127_v41 = vmul.f32 %v2288_v58, %v1047_v36  ;;  %972 = vst.msk [vmem:[#allocation2 + $0x80] sm:$0xff] %vm22_vm2, %v898_v31  ;;  %v155_v25 = vld [vmem:[#allocation2 + $0x1d0] sm:$0xff] }
 0x121   :  { %v1775_v40 = vpop.eup %1774  ;;  %v1165_v42 = vmul.f32 %v2288_v58, %v1085_v37  ;;  %v899_v43 = vadd.f32 %v655_v38, %v114_v27  ;;  %v1572_v44 = vpop.f32.mrb[35].mxu0  ;;  %1010 = vst.msk [vmem:[#allocation2 + $0x1b0] sm:$0xff] %vm22_vm2, %v936_v33  ;;  %v937_v45 = vadd.f32 %v807_v39, %v152_v29  ;;  %v118_v29 = vld [vmem:[#allocation2 + $0xa8] sm:$0xff]  ;;  %v156_v31 = vld [vmem:[#allocation2 + $0x1d8] sm:$0xff] }
 0x122   :  { %v1648_v46 = vpop.f32.mrb[35].mxu1  ;;  %v1777_v47 = vpop.eup %1776  ;;  %1350 = vst.msk [vmem:[%s2818_s4 + $0x58] sm:$0xff] %vm22_vm2, %v1775_v40  ;;  %v1048_v48 = vld [vmem:[#allocation2 + $0x78] sm:$0xff]  ;;  %v1207_v50 = vadd.f32 %v2293_v63, %v1127_v41 }
 0x123   :  { %v1086_v49 = vld [vmem:[#allocation2 + $0x1a8] sm:$0xff]  ;;  %1388 = vst.msk [vmem:[%s2818_s4 + $0x188] sm:$0xff] %vm22_vm2, %v1777_v47  ;;  %v1128_v51 = vmul.f32 %v2288_v58, %v1048_v48  ;;  %v1245_v52 = vadd.f32 %v2293_v63, %v1165_v42  ;;  %973 = vst.msk [vmem:[#allocation2 + $0x88] sm:$0xff] %vm22_vm2, %v899_v43 }
 0x124   :  { %v1166_v53 = vmul.f32 %v2288_v58, %v1086_v49  ;;  %1011 = vst.msk [vmem:[#allocation2 + $0x1b8] sm:$0xff] %vm22_vm2, %v937_v45  ;;  %1786 = vtanh.f32 %v1207_v50 }
 0x125   :  { %v1208_v56 = vadd.f32 %v2293_v63, %v1128_v51  ;;  %1788 = vtanh.f32 %v1245_v52  ;;  %v660_v59 = vpop.f32.mrb[36].mxu0  ;;  %v812_v61 = vpop.f32.mrb[36].mxu1 }
 0x126   :  { %v1246_v57 = vadd.f32 %v2293_v63, %v1166_v53  ;;  %v1779_v1 = vpop.eup %1778  ;;  %v900_v2 = vadd.f32 %v660_v59, %v115_v54  ;;  %v1575_v3 = vpop.f32.mrb[37].mxu0  ;;  %v938_v4 = vadd.f32 %v812_v61, %v153_v55 }
 0x127   :  { %1790 = vtanh.f32 %v1208_v56  ;;  %v1651_v5 = vpop.f32.mrb[37].mxu1  ;;  %v1781_v6 = vpop.eup %1780  ;;  %1351 = vst.msk [vmem:[%s2818_s4 + $0x60] sm:$0xff] %vm22_vm2, %v1779_v1  ;;  %v1049_v7 = vld [vmem:[#allocation2 + $0x80] sm:$0xff]  ;;  %v119_v56 = vld [vmem:[#allocation2 + $0xb0] sm:$0xff] }
 0x128   :  { %1792 = vtanh.f32 %v1246_v57  ;;  %v1087_v8 = vld [vmem:[#allocation2 + $0x1b0] sm:$0xff]  ;;  %v663_v9 = vpop.f32.mrb[38].mxu0  ;;  %v815_v10 = vpop.f32.mrb[38].mxu1  ;;  %1389 = vst.msk [vmem:[%s2818_s4 + $0x190] sm:$0xff] %vm22_vm2, %v1781_v6  ;;  %v1129_v12 = vmul.f32 %v2288_v58, %v1049_v7  ;;  %974 = vst.msk [vmem:[#allocation2 + $0x90] sm:$0xff] %vm22_vm2, %v900_v2  ;;  %v157_v57 = vld [vmem:[#allocation2 + $0x1e0] sm:$0xff] }
 0x129   :  { %v1783_v11 = vpop.eup %1782  ;;  %v1167_v13 = vmul.f32 %v2288_v58, %v1087_v8  ;;  %v901_v14 = vadd.f32 %v663_v9, %v116_v60  ;;  %v1576_v15 = vpop.f32.mrb[39].mxu0  ;;  %1012 = vst.msk [vmem:[#allocation2 + $0x1c0] sm:$0xff] %vm22_vm2, %v938_v4  ;;  %v939_v16 = vadd.f32 %v815_v10, %v154_v62  ;;  %v120_v62 = vld [vmem:[#allocation2 + $0xb8] sm:$0xff]  ;;  %v158_v2 = vld [vmem:[#allocation2 + $0x1e8] sm:$0xff] }
 0x12a   :  { %v1652_v17 = vpop.f32.mrb[39].mxu1  ;;  %v1785_v18 = vpop.eup %1784  ;;  %1352 = vst.msk [vmem:[%s2818_s4 + $0x68] sm:$0xff] %vm22_vm2, %v1783_v11  ;;  %v1050_v19 = vld [vmem:[#allocation2 + $0x88] sm:$0xff]  ;;  %v1209_v21 = vadd.f32 %v2293_v63, %v1129_v12 }
 0x12b   :  { %v1088_v20 = vld [vmem:[#allocation2 + $0x1b8] sm:$0xff]  ;;  %1390 = vst.msk [vmem:[%s2818_s4 + $0x198] sm:$0xff] %vm22_vm2, %v1785_v18  ;;  %v1130_v22 = vmul.f32 %v2288_v58, %v1050_v19  ;;  %v1247_v23 = vadd.f32 %v2293_v63, %v1167_v13  ;;  %975 = vst.msk [vmem:[#allocation2 + $0x98] sm:$0xff] %vm22_vm2, %v901_v14 }
 0x12c   :  { %v1168_v0 = vmul.f32 %v2288_v58, %v1088_v20  ;;  %1013 = vst.msk [vmem:[#allocation2 + $0x1c8] sm:$0xff] %vm22_vm2, %v939_v16  ;;  %1794 = vtanh.f32 %v1209_v21 }
 0x12d   :  { %v1210_v26 = vadd.f32 %v2293_v63, %v1130_v22  ;;  %1796 = vtanh.f32 %v1247_v23  ;;  %v668_v28 = vpop.f32.mrb[40].mxu0  ;;  %v820_v30 = vpop.f32.mrb[40].mxu1 }
 0x12e   :  { %v1248_v27 = vadd.f32 %v2293_v63, %v1168_v0  ;;  %v1787_v32 = vpop.eup %1786  ;;  %v902_v33 = vadd.f32 %v668_v28, %v117_v24  ;;  %v1579_v34 = vpop.f32.mrb[41].mxu0  ;;  %v940_v35 = vadd.f32 %v820_v30, %v155_v25 }
 0x12f   :  { %1798 = vtanh.f32 %v1210_v26  ;;  %v1655_v36 = vpop.f32.mrb[41].mxu1  ;;  %v1789_v37 = vpop.eup %1788  ;;  %1353 = vst.msk [vmem:[%s2818_s4 + $0x70] sm:$0xff] %vm22_vm2, %v1787_v32  ;;  %v1051_v38 = vld [vmem:[#allocation2 + $0x90] sm:$0xff]  ;;  %v121_v26 = vld [vmem:[#allocation2 + $0xc0] sm:$0xff] }
 0x130   :  { %1800 = vtanh.f32 %v1248_v27  ;;  %v1089_v39 = vld [vmem:[#allocation2 + $0x1c0] sm:$0xff]  ;;  %v671_v40 = vpop.f32.mrb[42].mxu0  ;;  %v823_v41 = vpop.f32.mrb[42].mxu1  ;;  %1391 = vst.msk [vmem:[%s2818_s4 + $0x1a0] sm:$0xff] %vm22_vm2, %v1789_v37  ;;  %v1131_v43 = vmul.f32 %v2288_v58, %v1051_v38  ;;  %976 = vst.msk [vmem:[#allocation2 + $0xa0] sm:$0xff] %vm22_vm2, %v902_v33  ;;  %v159_v27 = vld [vmem:[#allocation2 + $0x1f0] sm:$0xff] }
 0x131   :  { %v1791_v42 = vpop.eup %1790  ;;  %v1169_v44 = vmul.f32 %v2288_v58, %v1089_v39  ;;  %v903_v45 = vadd.f32 %v671_v40, %v118_v29  ;;  %v1580_v46 = vpop.f32.mrb[43].mxu0  ;;  %1014 = vst.msk [vmem:[#allocation2 + $0x1d0] sm:$0xff] %vm22_vm2, %v940_v35  ;;  %v941_v47 = vadd.f32 %v823_v41, %v156_v31  ;;  %v122_v31 = vld [vmem:[#allocation2 + $0xc8] sm:$0xff]  ;;  %v160_v33 = vld [vmem:[#allocation2 + $0x1f8] sm:$0xff] }
 0x132   :  { %v1656_v48 = vpop.f32.mrb[43].mxu1  ;;  %v1793_v49 = vpop.eup %1792  ;;  %1354 = vst.msk [vmem:[%s2818_s4 + $0x78] sm:$0xff] %vm22_vm2, %v1791_v42  ;;  %v1052_v50 = vld [vmem:[#allocation2 + $0x98] sm:$0xff]  ;;  %v1211_v52 = vadd.f32 %v2293_v63, %v1131_v43 }
 0x133   :  { %v1090_v51 = vld [vmem:[#allocation2 + $0x1c8] sm:$0xff]  ;;  %1392 = vst.msk [vmem:[%s2818_s4 + $0x1a8] sm:$0xff] %vm22_vm2, %v1793_v49  ;;  %v1132_v53 = vmul.f32 %v2288_v58, %v1052_v50  ;;  %v1249_v54 = vadd.f32 %v2293_v63, %v1169_v44  ;;  %977 = vst.msk [vmem:[#allocation2 + $0xa8] sm:$0xff] %vm22_vm2, %v903_v45 }
 0x134   :  { %v1170_v55 = vmul.f32 %v2288_v58, %v1090_v51  ;;  %1015 = vst.msk [vmem:[#allocation2 + $0x1d8] sm:$0xff] %vm22_vm2, %v941_v47  ;;  %1802 = vtanh.f32 %v1211_v52 }
 0x135   :  { %v1212_v59 = vadd.f32 %v2293_v63, %v1132_v53  ;;  %1804 = vtanh.f32 %v1249_v54  ;;  %v676_v61 = vpop.f32.mrb[44].mxu0  ;;  %v828_v1 = vpop.f32.mrb[44].mxu1 }
 0x136   :  { %v1250_v60 = vadd.f32 %v2293_v63, %v1170_v55  ;;  %v1795_v3 = vpop.eup %1794  ;;  %v904_v4 = vadd.f32 %v676_v61, %v119_v56  ;;  %v1583_v5 = vpop.f32.mrb[45].mxu0  ;;  %v942_v6 = vadd.f32 %v828_v1, %v157_v57 }
 0x137   :  { %1806 = vtanh.f32 %v1212_v59  ;;  %v1659_v7 = vpop.f32.mrb[45].mxu1  ;;  %v1797_v8 = vpop.eup %1796  ;;  %1355 = vst.msk [vmem:[%s2818_s4 + $0x80] sm:$0xff] %vm22_vm2, %v1795_v3  ;;  %v1053_v9 = vld [vmem:[#allocation2 + $0xa0] sm:$0xff]  ;;  %v123_v59 = vld [vmem:[#allocation2 + $0xd0] sm:$0xff] }
 0x138   :  { %1808 = vtanh.f32 %v1250_v60  ;;  %v1091_v10 = vld [vmem:[#allocation2 + $0x1d0] sm:$0xff]  ;;  %v679_v11 = vpop.f32.mrb[46].mxu0  ;;  %v831_v12 = vpop.f32.mrb[46].mxu1  ;;  %1393 = vst.msk [vmem:[%s2818_s4 + $0x1b0] sm:$0xff] %vm22_vm2, %v1797_v8  ;;  %v1133_v14 = vmul.f32 %v2288_v58, %v1053_v9  ;;  %978 = vst.msk [vmem:[#allocation2 + $0xb0] sm:$0xff] %vm22_vm2, %v904_v4  ;;  %v161_v60 = vld [vmem:[#allocation2 + $0x200] sm:$0xff] }
 0x139   :  { %v1799_v13 = vpop.eup %1798  ;;  %v1171_v15 = vmul.f32 %v2288_v58, %v1091_v10  ;;  %v905_v16 = vadd.f32 %v679_v11, %v120_v62  ;;  %v1584_v17 = vpop.f32.mrb[47].mxu0  ;;  %1016 = vst.msk [vmem:[#allocation2 + $0x1e0] sm:$0xff] %vm22_vm2, %v942_v6  ;;  %v943_v18 = vadd.f32 %v831_v12, %v158_v2  ;;  %v124_v2 = vld [vmem:[#allocation2 + $0xd8] sm:$0xff]  ;;  %v162_v4 = vld [vmem:[#allocation2 + $0x208] sm:$0xff] }
 0x13a   :  { %v1660_v19 = vpop.f32.mrb[47].mxu1  ;;  %v1801_v20 = vpop.eup %1800  ;;  %1356 = vst.msk [vmem:[%s2818_s4 + $0x88] sm:$0xff] %vm22_vm2, %v1799_v13  ;;  %v1054_v21 = vld [vmem:[#allocation2 + $0xa8] sm:$0xff]  ;;  %v1213_v23 = vadd.f32 %v2293_v63, %v1133_v14  ;;  %v2612_v14 = vld [vmem:[%s2816_s2] ss:$0 sm:$0xff] }
 0x13b   :  { %v1092_v22 = vld [vmem:[#allocation2 + $0x1d8] sm:$0xff]  ;;  %1394 = vst.msk [vmem:[%s2818_s4 + $0x1b8] sm:$0xff] %vm22_vm2, %v1801_v20  ;;  %v1134_v0 = vmul.f32 %v2288_v58, %v1054_v21  ;;  %v1251_v24 = vadd.f32 %v2293_v63, %v1171_v15  ;;  %979 = vst.msk [vmem:[#allocation2 + $0xb8] sm:$0xff] %vm22_vm2, %v905_v16 }
 0x13c   :  { %v1172_v25 = vmul.f32 %v2288_v58, %v1092_v22  ;;  %1017 = vst.msk [vmem:[#allocation2 + $0x1e8] sm:$0xff] %vm22_vm2, %v943_v18  ;;  %1810 = vtanh.f32 %v1213_v23 }
 0x13d   :  { %v1214_v28 = vadd.f32 %v2293_v63, %v1134_v0  ;;  %1812 = vtanh.f32 %v1251_v24  ;;  %v684_v30 = vpop.f32.mrb[48].mxu0  ;;  %v836_v32 = vpop.f32.mrb[48].mxu1  ;;  %v2629_v0 = vld [vmem:[%s2817_s3] ss:$0 sm:$0xff] }
 0x13e   :  { %v1252_v29 = vadd.f32 %v2293_v63, %v1172_v25  ;;  %v1803_v34 = vpop.eup %1802  ;;  %v906_v35 = vadd.f32 %v684_v30, %v121_v26  ;;  %v1587_v36 = vpop.f32.mrb[49].mxu0  ;;  %v944_v37 = vadd.f32 %v836_v32, %v159_v27 }
 0x13f   :  { %1814 = vtanh.f32 %v1214_v28  ;;  %v1663_v38 = vpop.f32.mrb[49].mxu1  ;;  %v1805_v39 = vpop.eup %1804  ;;  %1357 = vst.msk [vmem:[%s2818_s4 + $0x90] sm:$0xff] %vm22_vm2, %v1803_v34  ;;  %v1055_v40 = vld [vmem:[#allocation2 + $0xb0] sm:$0xff]  ;;  %v125_v28 = vld [vmem:[#allocation2 + $0xe0] sm:$0xff] }
 0x140   :  { %1816 = vtanh.f32 %v1252_v29  ;;  %v1093_v41 = vld [vmem:[#allocation2 + $0x1e0] sm:$0xff]  ;;  %v687_v42 = vpop.f32.mrb[50].mxu0  ;;  %v839_v43 = vpop.f32.mrb[50].mxu1  ;;  %1395 = vst.msk [vmem:[%s2818_s4 + $0x1c0] sm:$0xff] %vm22_vm2, %v1805_v39  ;;  %v1135_v45 = vmul.f32 %v2288_v58, %v1055_v40  ;;  %980 = vst.msk [vmem:[#allocation2 + $0xc0] sm:$0xff] %vm22_vm2, %v906_v35  ;;  %v163_v29 = vld [vmem:[#allocation2 + $0x210] sm:$0xff] }
 0x141   :  { %v1807_v44 = vpop.eup %1806  ;;  %v1173_v46 = vmul.f32 %v2288_v58, %v1093_v41  ;;  %v907_v47 = vadd.f32 %v687_v42, %v122_v31  ;;  %v1588_v48 = vpop.f32.mrb[51].mxu0  ;;  %1018 = vst.msk [vmem:[#allocation2 + $0x1f0] sm:$0xff] %vm22_vm2, %v944_v37  ;;  %v945_v49 = vadd.f32 %v839_v43, %v160_v33  ;;  %v126_v33 = vld [vmem:[#allocation2 + $0xe8] sm:$0xff]  ;;  %v164_v35 = vld [vmem:[#allocation2 + $0x218] sm:$0xff] }
 0x142   :  { %v1664_v50 = vpop.f32.mrb[51].mxu1  ;;  %v1809_v51 = vpop.eup %1808  ;;  %1358 = vst.msk [vmem:[%s2818_s4 + $0x98] sm:$0xff] %vm22_vm2, %v1807_v44  ;;  %v1056_v52 = vld [vmem:[#allocation2 + $0xb8] sm:$0xff]  ;;  %v1215_v54 = vadd.f32 %v2293_v63, %v1135_v45 }
 0x143   :  { %v1094_v53 = vld [vmem:[#allocation2 + $0x1e8] sm:$0xff]  ;;  %1396 = vst.msk [vmem:[%s2818_s4 + $0x1c8] sm:$0xff] %vm22_vm2, %v1809_v51  ;;  %v1136_v55 = vmul.f32 %v2288_v58, %v1056_v52  ;;  %v1253_v56 = vadd.f32 %v2293_v63, %v1173_v46  ;;  %981 = vst.msk [vmem:[#allocation2 + $0xc8] sm:$0xff] %vm22_vm2, %v907_v47 }
 0x144   :  { %v1174_v57 = vmul.f32 %v2288_v58, %v1094_v53  ;;  %1019 = vst.msk [vmem:[#allocation2 + $0x1f8] sm:$0xff] %vm22_vm2, %v945_v49  ;;  %1818 = vtanh.f32 %v1215_v54 }
 0x145   :  { %v1216_v61 = vadd.f32 %v2293_v63, %v1136_v55  ;;  %1820 = vtanh.f32 %v1253_v56  ;;  %v692_v1 = vpop.f32.mrb[52].mxu0  ;;  %v844_v3 = vpop.f32.mrb[52].mxu1 }
 0x146   :  { %v1254_v62 = vadd.f32 %v2293_v63, %v1174_v57  ;;  %v1811_v5 = vpop.eup %1810  ;;  %v908_v6 = vadd.f32 %v692_v1, %v123_v59  ;;  %v1591_v58 = vpop.f32.mrb[53].mxu0  ;;  %v946_v7 = vadd.f32 %v844_v3, %v161_v60 }
 0x147   :  { %1822 = vtanh.f32 %v1216_v61  ;;  %v1667_v8 = vpop.f32.mrb[53].mxu1  ;;  %v1813_v9 = vpop.eup %1812  ;;  %1359 = vst.msk [vmem:[%s2818_s4 + $0xa0] sm:$0xff] %vm22_vm2, %v1811_v5  ;;  %v1057_v10 = vld [vmem:[#allocation2 + $0xc0] sm:$0xff]  ;;  %v127_v61 = vld [vmem:[#allocation2 + $0xf0] sm:$0xff] }
 0x148   :  { %1824 = vtanh.f32 %v1254_v62  ;;  %v1095_v63 = vld [vmem:[#allocation2 + $0x1f0] sm:$0xff]  ;;  %v695_v11 = vpop.f32.mrb[54].mxu0  ;;  %v847_v12 = vpop.f32.mrb[54].mxu1  ;;  %1397 = vst.msk [vmem:[%s2818_s4 + $0x1d0] sm:$0xff] %vm22_vm2, %v1813_v9  ;;  %v1137_v15 = vmul.f32 %v2612_v14, %v1057_v10  ;;  %982 = vst.msk [vmem:[#allocation2 + $0xd0] sm:$0xff] %vm22_vm2, %v908_v6  ;;  %v165_v62 = vld [vmem:[#allocation2 + $0x220] sm:$0xff] }
 0x149   :  { %v1815_v13 = vpop.eup %1814  ;;  %v1175_v16 = vmul.f32 %v2612_v14, %v1095_v63  ;;  %v909_v17 = vadd.f32 %v695_v11, %v124_v2  ;;  %v1592_v18 = vpop.f32.mrb[55].mxu0  ;;  %1020 = vst.msk [vmem:[#allocation2 + $0x200] sm:$0xff] %vm22_vm2, %v946_v7  ;;  %v947_v19 = vadd.f32 %v847_v12, %v162_v4  ;;  %v128_v4 = vld [vmem:[#allocation2 + $0xf8] sm:$0xff]  ;;  %v166_v6 = vld [vmem:[#allocation2 + $0x228] sm:$0xff] }
 0x14a   :  { %v1668_v20 = vpop.f32.mrb[55].mxu1  ;;  %v1817_v21 = vpop.eup %1816  ;;  %1360 = vst.msk [vmem:[%s2818_s4 + $0xa8] sm:$0xff] %vm22_vm2, %v1815_v13  ;;  %v1058_v22 = vld [vmem:[#allocation2 + $0xc8] sm:$0xff]  ;;  %v1217_v24 = vadd.f32 %v2629_v0, %v1137_v15 }
 0x14b   :  { %v1096_v23 = vld [vmem:[#allocation2 + $0x1f8] sm:$0xff]  ;;  %1398 = vst.msk [vmem:[%s2818_s4 + $0x1d8] sm:$0xff] %vm22_vm2, %v1817_v21  ;;  %v1138_v25 = vmul.f32 %v2612_v14, %v1058_v22  ;;  %v1255_v26 = vadd.f32 %v2629_v0, %v1175_v16  ;;  %983 = vst.msk [vmem:[#allocation2 + $0xd8] sm:$0xff] %vm22_vm2, %v909_v17 }
 0x14c   :  { %v1176_v27 = vmul.f32 %v2612_v14, %v1096_v23  ;;  %1021 = vst.msk [vmem:[#allocation2 + $0x208] sm:$0xff] %vm22_vm2, %v947_v19  ;;  %1826 = vtanh.f32 %v1217_v24 }
 0x14d   :  { %v1218_v30 = vadd.f32 %v2629_v0, %v1138_v25  ;;  %1828 = vtanh.f32 %v1255_v26  ;;  %v700_v32 = vpop.f32.mrb[56].mxu0  ;;  %v852_v34 = vpop.f32.mrb[56].mxu1 }
 0x14e   :  { %v1256_v31 = vadd.f32 %v2629_v0, %v1176_v27  ;;  %v1819_v36 = vpop.eup %1818  ;;  %v910_v37 = vadd.f32 %v700_v32, %v125_v28  ;;  %v1595_v38 = vpop.f32.mrb[57].mxu0  ;;  %v948_v39 = vadd.f32 %v852_v34, %v163_v29 }
 0x14f   :  { %1830 = vtanh.f32 %v1218_v30  ;;  %v1671_v40 = vpop.f32.mrb[57].mxu1  ;;  %v1821_v41 = vpop.eup %1820  ;;  %1361 = vst.msk [vmem:[%s2818_s4 + $0xb0] sm:$0xff] %vm22_vm2, %v1819_v36  ;;  %v1059_v42 = vld [vmem:[#allocation2 + $0xd0] sm:$0xff]  ;;  %v129_v30 = vld [vmem:[#allocation2 + $0x100] sm:$0xff] }
 0x150   :  { %1832 = vtanh.f32 %v1256_v31  ;;  %v1097_v43 = vld [vmem:[#allocation2 + $0x200] sm:$0xff]  ;;  %v703_v44 = vpop.f32.mrb[58].mxu0  ;;  %v855_v45 = vpop.f32.mrb[58].mxu1  ;;  %1399 = vst.msk [vmem:[%s2818_s4 + $0x1e0] sm:$0xff] %vm22_vm2, %v1821_v41  ;;  %v1139_v47 = vmul.f32 %v2612_v14, %v1059_v42  ;;  %984 = vst.msk [vmem:[#allocation2 + $0xe0] sm:$0xff] %vm22_vm2, %v910_v37  ;;  %v167_v31 = vld [vmem:[#allocation2 + $0x230] sm:$0xff] }
 0x151   :  { %v1823_v46 = vpop.eup %1822  ;;  %v1177_v48 = vmul.f32 %v2612_v14, %v1097_v43  ;;  %v911_v49 = vadd.f32 %v703_v44, %v126_v33  ;;  %v1596_v50 = vpop.f32.mrb[59].mxu0  ;;  %1022 = vst.msk [vmem:[#allocation2 + $0x210] sm:$0xff] %vm22_vm2, %v948_v39  ;;  %v949_v51 = vadd.f32 %v855_v45, %v164_v35  ;;  %v130_v35 = vld [vmem:[#allocation2 + $0x108] sm:$0xff]  ;;  %v168_v37 = vld [vmem:[#allocation2 + $0x238] sm:$0xff] }
 0x152   :  { %v1672_v52 = vpop.f32.mrb[59].mxu1  ;;  %v1825_v53 = vpop.eup %1824  ;;  %1362 = vst.msk [vmem:[%s2818_s4 + $0xb8] sm:$0xff] %vm22_vm2, %v1823_v46  ;;  %v1060_v54 = vld [vmem:[#allocation2 + $0xd8] sm:$0xff]  ;;  %v1219_v56 = vadd.f32 %v2629_v0, %v1139_v47 }
 0x153   :  { %v1098_v55 = vld [vmem:[#allocation2 + $0x208] sm:$0xff]  ;;  %1400 = vst.msk [vmem:[%s2818_s4 + $0x1e8] sm:$0xff] %vm22_vm2, %v1825_v53  ;;  %v1140_v57 = vmul.f32 %v2612_v14, %v1060_v54  ;;  %v1257_v59 = vadd.f32 %v2629_v0, %v1177_v48  ;;  %985 = vst.msk [vmem:[#allocation2 + $0xe8] sm:$0xff] %vm22_vm2, %v911_v49 }
 0x154   :  { %v1178_v60 = vmul.f32 %v2612_v14, %v1098_v55  ;;  %1023 = vst.msk [vmem:[#allocation2 + $0x218] sm:$0xff] %vm22_vm2, %v949_v51  ;;  %1834 = vtanh.f32 %v1219_v56 }
 0x155   :  { %v1220_v1 = vadd.f32 %v2629_v0, %v1140_v57  ;;  %1836 = vtanh.f32 %v1257_v59  ;;  %v708_v3 = vpop.f32.mrb[60].mxu0  ;;  %v860_v5 = vpop.f32.mrb[60].mxu1 }
 0x156   :  { %v1258_v2 = vadd.f32 %v2629_v0, %v1178_v60  ;;  %v1827_v58 = vpop.eup %1826  ;;  %v912_v7 = vadd.f32 %v708_v3, %v127_v61  ;;  %v1599_v8 = vpop.f32.mrb[61].mxu0  ;;  %v950_v9 = vadd.f32 %v860_v5, %v165_v62 }
 0x157   :  { %1838 = vtanh.f32 %v1220_v1  ;;  %v1675_v10 = vpop.f32.mrb[61].mxu1  ;;  %v1829_v63 = vpop.eup %1828  ;;  %1363 = vst.msk [vmem:[%s2818_s4 + $0xc0] sm:$0xff] %vm22_vm2, %v1827_v58  ;;  %v1061_v11 = vld [vmem:[#allocation2 + $0xe0] sm:$0xff]  ;;  %v131_v1 = vld [vmem:[#allocation2 + $0x110] sm:$0xff] }
 0x158   :  { %1840 = vtanh.f32 %v1258_v2  ;;  %v1099_v12 = vld [vmem:[#allocation2 + $0x210] sm:$0xff]  ;;  %v711_v13 = vpop.f32.mrb[62].mxu0  ;;  %v863_v15 = vpop.f32.mrb[62].mxu1  ;;  %1401 = vst.msk [vmem:[%s2818_s4 + $0x1f0] sm:$0xff] %vm22_vm2, %v1829_v63  ;;  %v1141_v17 = vmul.f32 %v2612_v14, %v1061_v11  ;;  %986 = vst.msk [vmem:[#allocation2 + $0xf0] sm:$0xff] %vm22_vm2, %v912_v7 }
 0x159   :  { %v1831_v16 = vpop.eup %1830  ;;  %v1179_v18 = vmul.f32 %v2612_v14, %v1099_v12  ;;  %v913_v19 = vadd.f32 %v711_v13, %v128_v4  ;;  %v1600_v20 = vpop.f32.mrb[63].mxu0  ;;  %1024 = vst.msk [vmem:[#allocation2 + $0x220] sm:$0xff] %vm22_vm2, %v950_v9  ;;  %v951_v21 = vadd.f32 %v863_v15, %v166_v6  ;;  %v169_v2 = vld [vmem:[#allocation2 + $0x240] sm:$0x3]  ;;  %v132_v6 = vld [vmem:[#allocation2 + $0x118] sm:$0xff] }
 0x15a   :  { %v1676_v22 = vpop.f32.mrb[63].mxu1  ;;  %v1833_v23 = vpop.eup %1832  ;;  %1364 = vst.msk [vmem:[%s2818_s4 + $0xc8] sm:$0xff] %vm22_vm2, %v1831_v16  ;;  %v1062_v24 = vld [vmem:[#allocation2 + $0xe8] sm:$0xff]  ;;  %v1221_v26 = vadd.f32 %v2629_v0, %v1141_v17 }
 0x15b   :  { %v1100_v25 = vld [vmem:[#allocation2 + $0x218] sm:$0xff]  ;;  %1402 = vst.msk [vmem:[%s2818_s4 + $0x1f8] sm:$0xff] %vm22_vm2, %v1833_v23  ;;  %v1142_v27 = vmul.f32 %v2612_v14, %v1062_v24  ;;  %v1259_v28 = vadd.f32 %v2629_v0, %v1179_v18  ;;  %987 = vst.msk [vmem:[#allocation2 + $0xf8] sm:$0xff] %vm22_vm2, %v913_v19 }
 0x15c   :  { %v1180_v29 = vmul.f32 %v2612_v14, %v1100_v25  ;;  %1025 = vst.msk [vmem:[#allocation2 + $0x228] sm:$0xff] %vm22_vm2, %v951_v21  ;;  %1842 = vtanh.f32 %v1221_v26 }
 0x15d   :  { %v1222_v32 = vadd.f32 %v2629_v0, %v1142_v27  ;;  %1844 = vtanh.f32 %v1259_v28  ;;  %v716_v34 = vpop.f32.mrb[64].mxu0  ;;  %v868_v36 = vpop.f32.mrb[64].mxu1 }
 0x15e   :  { %v1260_v33 = vadd.f32 %v2629_v0, %v1180_v29  ;;  %v1835_v38 = vpop.eup %1834  ;;  %v914_v39 = vadd.f32 %v716_v34, %v129_v30  ;;  %v1603_v40 = vpop.f32.mrb[65].mxu0  ;;  %v952_v41 = vadd.f32 %v868_v36, %v167_v31  ;;  %v133_v30 = vld [vmem:[#allocation2 + $0x120] sm:$0xff]  ;;  %v134_v34 = vld [vmem:[#allocation2 + $0x128] sm:$0xff] }
 0x15f   :  { %1846 = vtanh.f32 %v1222_v32  ;;  %v1679_v42 = vpop.f32.mrb[65].mxu1  ;;  %v1837_v43 = vpop.eup %1836  ;;  %1365 = vst.msk [vmem:[%s2818_s4 + $0xd0] sm:$0xff] %vm22_vm2, %v1835_v38  ;;  %v1063_v44 = vld [vmem:[#allocation2 + $0xf0] sm:$0xff] }
 0x160   :  { %1848 = vtanh.f32 %v1260_v33  ;;  %v1101_v45 = vld [vmem:[#allocation2 + $0x220] sm:$0xff]  ;;  %v719_v46 = vpop.f32.mrb[66].mxu0  ;;  %v871_v47 = vpop.f32.mrb[66].mxu1  ;;  %1403 = vst.msk [vmem:[%s2818_s4 + $0x200] sm:$0xff] %vm22_vm2, %v1837_v43  ;;  %v1143_v49 = vmul.f32 %v2612_v14, %v1063_v44  ;;  %988 = vst.msk [vmem:[#allocation2 + $0x100] sm:$0xff] %vm22_vm2, %v914_v39 }
 0x161   :  { %v1839_v48 = vpop.eup %1838  ;;  %v1181_v50 = vmul.f32 %v2612_v14, %v1101_v45  ;;  %v915_v51 = vadd.f32 %v719_v46, %v130_v35  ;;  %v1604_v52 = vpop.f32.mrb[67].mxu0  ;;  %1026 = vst.msk [vmem:[#allocation2 + $0x230] sm:$0xff] %vm22_vm2, %v952_v41  ;;  %v953_v53 = vadd.f32 %v871_v47, %v168_v37 }
 0x162   :  { %v1680_v54 = vpop.f32.mrb[67].mxu1  ;;  %v1841_v55 = vpop.eup %1840  ;;  %1366 = vst.msk [vmem:[%s2818_s4 + $0xd8] sm:$0xff] %vm22_vm2, %v1839_v48  ;;  %v1064_v56 = vld [vmem:[#allocation2 + $0xf8] sm:$0xff]  ;;  %v1223_v59 = vadd.f32 %v2629_v0, %v1143_v49 }
 0x163   :  { %v1102_v57 = vld [vmem:[#allocation2 + $0x228] sm:$0xff]  ;;  %1404 = vst.msk [vmem:[%s2818_s4 + $0x208] sm:$0xff] %vm22_vm2, %v1841_v55  ;;  %v1144_v60 = vmul.f32 %v2612_v14, %v1064_v56  ;;  %v1261_v61 = vadd.f32 %v2629_v0, %v1181_v50  ;;  %989 = vst.msk [vmem:[#allocation2 + $0x108] sm:$0xff] %vm22_vm2, %v915_v51 }
 0x164   :  { %v1182_v62 = vmul.f32 %v2612_v14, %v1102_v57  ;;  %1027 = vst.msk [vmem:[#allocation2 + $0x238] sm:$0xff] %vm22_vm2, %v953_v53  ;;  %1850 = vtanh.f32 %v1223_v59 }
 0x165   :  { %v1224_v3 = vadd.f32 %v2629_v0, %v1144_v60  ;;  %1852 = vtanh.f32 %v1261_v61  ;;  %v724_v5 = vpop.f32.mrb[68].mxu0  ;;  %v876_v58 = vpop.f32.mrb[68].mxu1 }
 0x166   :  { %v1262_v4 = vadd.f32 %v2629_v0, %v1182_v62  ;;  %v1843_v7 = vpop.eup %1842  ;;  %v916_v8 = vadd.f32 %v724_v5, %v131_v1  ;;  %v1607_v9 = vpop.f32.mrb[69].mxu0  ;;  %v954_v10 = vadd.f32 %v876_v58, %v169_v2 }
 0x167   :  { %1854 = vtanh.f32 %v1224_v3  ;;  %v1683_v63 = vpop.f32.mrb[69].mxu1  ;;  %v1845_v11 = vpop.eup %1844  ;;  %1367 = vst.msk [vmem:[%s2818_s4 + $0xe0] sm:$0xff] %vm22_vm2, %v1843_v7  ;;  %v1065_v12 = vld [vmem:[#allocation2 + $0x100] sm:$0xff] }
 0x168   :  { %1856 = vtanh.f32 %v1262_v4  ;;  %v1103_v13 = vld [vmem:[#allocation2 + $0x230] sm:$0xff]  ;;  %v727_v15 = vpop.f32.mrb[70].mxu0  ;;  %v879_v16 = vpop.f32.mrb[70].mxu1  ;;  %1405 = vst.msk [vmem:[%s2818_s4 + $0x210] sm:$0xff] %vm22_vm2, %v1845_v11  ;;  %v1145_v18 = vmul.f32 %v2612_v14, %v1065_v12  ;;  %990 = vst.msk [vmem:[#allocation2 + $0x110] sm:$0xff] %vm22_vm2, %v916_v8 }
 0x169   :  { %v1847_v17 = vpop.eup %1846  ;;  %v1183_v19 = vmul.f32 %v2612_v14, %v1103_v13  ;;  %v917_v20 = vadd.f32 %v727_v15, %v132_v6  ;;  %v1608_v21 = vpop.f32.mrb[71].mxu0  ;;  %1029 = vst.msk [vmem:[#allocation2 + $0x240] sm:$0x3] %vm95_vm3, %v954_v10 }
 0x16a   :  { %v1684_v22 = vpop.f32.mrb[71].mxu1  ;;  %v1849_v23 = vpop.eup %1848  ;;  %1368 = vst.msk [vmem:[%s2818_s4 + $0xe8] sm:$0xff] %vm22_vm2, %v1847_v17  ;;  %v1066_v24 = vld [vmem:[#allocation2 + $0x108] sm:$0xff]  ;;  %v1225_v26 = vadd.f32 %v2629_v0, %v1145_v18 }
 0x16b   :  { %v1104_v25 = vld [vmem:[#allocation2 + $0x238] sm:$0xff]  ;;  %1406 = vst.msk [vmem:[%s2818_s4 + $0x218] sm:$0xff] %vm22_vm2, %v1849_v23  ;;  %v1146_v27 = vmul.f32 %v2612_v14, %v1066_v24  ;;  %v1263_v28 = vadd.f32 %v2629_v0, %v1183_v19  ;;  %991 = vst.msk [vmem:[#allocation2 + $0x118] sm:$0xff] %vm22_vm2, %v917_v20 }
 0x16c   :  { %v1184_v29 = vmul.f32 %v2612_v14, %v1104_v25  ;;  %1858 = vtanh.f32 %v1225_v26 }
 0x16d   :  { %v1226_v31 = vadd.f32 %v2629_v0, %v1146_v27  ;;  %1860 = vtanh.f32 %v1263_v28  ;;  %v732_v33 = vpop.f32.mrb[72].mxu0 }
 0x16e   :  { %v1264_v32 = vadd.f32 %v2629_v0, %v1184_v29  ;;  %v1851_v35 = vpop.eup %1850  ;;  %v918_v36 = vadd.f32 %v732_v33, %v133_v30  ;;  %v1611_v37 = vpop.f32.mrb[73].mxu0 }
 0x16f   :  { %1862 = vtanh.f32 %v1226_v31  ;;  %v1853_v38 = vpop.eup %1852  ;;  %1369 = vst.msk [vmem:[%s2818_s4 + $0xf0] sm:$0xff] %vm22_vm2, %v1851_v35  ;;  %v1067_v39 = vld [vmem:[#allocation2 + $0x110] sm:$0xff]  ;;  %v735_v41 = vpop.f32.mrb[74].mxu0 }
 0x170   :  { %1864 = vtanh.f32 %v1264_v32  ;;  %v1105_v40 = vld [vmem:[#allocation2 + $0x240] sm:$0x3]  ;;  %1407 = vst.msk [vmem:[%s2818_s4 + $0x220] sm:$0xff] %vm22_vm2, %v1853_v38  ;;  %v1147_v43 = vmul.f32 %v2612_v14, %v1067_v39  ;;  %992 = vst.msk [vmem:[#allocation2 + $0x120] sm:$0xff] %vm22_vm2, %v918_v36  ;;  %v919_v45 = vadd.f32 %v735_v41, %v134_v34  ;;  %v1612_v46 = vpop.f32.mrb[75].mxu0 }
 0x171   :  { %v1855_v42 = vpop.eup %1854  ;;  %v1185_v44 = vmul.f32 %v2612_v14, %v1105_v40 }
 0x172   :  { %v1857_v47 = vpop.eup %1856  ;;  %1370 = vst.msk [vmem:[%s2818_s4 + $0xf8] sm:$0xff] %vm22_vm2, %v1855_v42  ;;  %v1068_v48 = vld [vmem:[#allocation2 + $0x118] sm:$0xff]  ;;  %v1227_v49 = vadd.f32 %v2629_v0, %v1147_v43  ;;  %993 = vst.msk [vmem:[#allocation2 + $0x128] sm:$0xff] %vm22_vm2, %v919_v45 }
 0x173   :  { %1408 = vst.msk [vmem:[%s2818_s4 + $0x228] sm:$0xff] %vm22_vm2, %v1857_v47  ;;  %v1148_v50 = vmul.f32 %v2612_v14, %v1068_v48  ;;  %v1265_v51 = vadd.f32 %v2629_v0, %v1185_v44 }
 0x174   :  { %1866 = vtanh.f32 %v1227_v49 }
 0x175   :  { %v1228_v52 = vadd.f32 %v2629_v0, %v1148_v50  ;;  %1868 = vtanh.f32 %v1265_v51 }
 0x176   :  { %v1859_v53 = vpop.eup %1858 }
 0x177   :  { %1870 = vtanh.f32 %v1228_v52  ;;  %v1861_v54 = vpop.eup %1860  ;;  %1371 = vst.msk [vmem:[%s2818_s4 + $0x100] sm:$0xff] %vm22_vm2, %v1859_v53  ;;  %v1069_v55 = vld [vmem:[#allocation2 + $0x120] sm:$0xff] }
 0x178   :  { %1409 = vst.msk [vmem:[%s2818_s4 + $0x230] sm:$0xff] %vm22_vm2, %v1861_v54  ;;  %v1149_v57 = vmul.f32 %v2612_v14, %v1069_v55 }
 0x179   :  { %v1863_v56 = vpop.eup %1862  ;;  %v1070_v60 = vld [vmem:[#allocation2 + $0x128] sm:$0xff] }
 0x17a   :  { %v1865_v59 = vpop.eup %1864  ;;  %1372 = vst.msk [vmem:[%s2818_s4 + $0x108] sm:$0xff] %vm22_vm2, %v1863_v56  ;;  %v1229_v61 = vadd.f32 %v2629_v0, %v1149_v57  ;;  %v1150_v62 = vmul.f32 %v2612_v14, %v1070_v60 }
 0x17b   :  { %1410 = vst.msk [vmem:[%s2818_s4 + $0x238] sm:$0xff] %vm22_vm2, %v1865_v59 }
 0x17c   :  { %1872 = vtanh.f32 %v1229_v61  ;;  %v1230_v1 = vadd.f32 %v2629_v0, %v1150_v62 }
 0x17e   :  { %v1867_v2 = vpop.eup %1866  ;;  %1874 = vtanh.f32 %v1230_v1 }
 0x17f   :  { %v1869_v3 = vpop.eup %1868  ;;  %1373 = vst.msk [vmem:[%s2818_s4 + $0x110] sm:$0xff] %vm22_vm2, %v1867_v2 }
 0x180   :  { %1411 = vst.msk [vmem:[%s2818_s4 + $0x240] sm:$0x3] %vm95_vm3, %v1869_v3 }
 0x181   :  { %v1871_v4 = vpop.eup %1870 }
 0x182   :  { %1374 = vst.msk [vmem:[%s2818_s4 + $0x118] sm:$0xff] %vm22_vm2, %v1871_v4 }
 0x186   :  { %v1873_v14 = vpop.eup %1872 }
 0x187   :  { %1375 = vst.msk [vmem:[%s2818_s4 + $0x120] sm:$0xff] %vm22_vm2, %v1873_v14 }
 0x188   :  { %v1875_v0 = vpop.eup %1874 }
 0x189   :  { %1376 = vst.msk [vmem:[%s2818_s4 + $0x128] sm:$0xff] %vm22_vm2, %v1875_v0 }

</bundles_post_ra>
